<compile_context>
chip_gen: v7x
topology: tpu7x:2x2x1
jax: 0.10.0
libtpu: 0.0.40
codegen_flags: <defaults>
</compile_context>

<pallas_src>
import functools

import jax
import jax.numpy as jnp
import numpy as np
from jax import lax
from jax.experimental import pallas as pl
from jax.experimental.pallas import tpu as pltpu


# ----------------------------------------------------------------------------
# Fused Pallas kernel: LSTM1 -> LSTM2 -> FC, one time-chunk per grid step.
# ----------------------------------------------------------------------------
def _fused_lstm_fc_kernel(x_ref, wih1_ref, whh1_ref, b1_ref,
                          wih2_ref, whh2_ref, b2_ref,
                          wfc_ref, bfc_ref,
                          out_ref,
                          h1_scr, c1_scr, h2_scr, c2_scr, gx_scr, y2_scr):
    Tc, B, E = x_ref.shape           # (time_chunk, B_pad, E)
    H = h1_scr.shape[-1]             # H_pad (multiple of 128)

    # Zero the carried (h, c) state on the first chunk only.
    @pl.when(pl.program_id(0) == 0)
    def _():
        h1_scr[...] = jnp.zeros_like(h1_scr)
        c1_scr[...] = jnp.zeros_like(c1_scr)
        h2_scr[...] = jnp.zeros_like(h2_scr)
        c2_scr[...] = jnp.zeros_like(c2_scr)

    # Hoisted layer-1 input projection, batched over the whole time chunk:
    # one (Tc*B, E) @ (E, 4H) MXU matmul instead of Tc tiny ones.
    x2d = x_ref[...].reshape(Tc * B, E)
    gx = jnp.dot(x2d, wih1_ref[...], preferred_element_type=jnp.float32) + b1_ref[...]
    gx_scr[...] = gx.reshape(Tc, B, 4 * H)

    # Loop-invariant weights: load once per grid step.
    whh1 = whh1_ref[...]
    wih2 = wih2_ref[...]
    whh2 = whh2_ref[...]
    b2 = b2_ref[...]

    h1 = h1_scr[...]
    c1 = c1_scr[...]
    h2 = h2_scr[...]
    c2 = c2_scr[...]

    def gates_to_hc(gates, c_prev):
        # Gate slices are 128-lane aligned because H is padded to 128.
        i = jax.nn.sigmoid(gates[:, 0 * H:1 * H])
        f = jax.nn.sigmoid(gates[:, 1 * H:2 * H])
        g = jnp.tanh(gates[:, 2 * H:3 * H])
        o = jax.nn.sigmoid(gates[:, 3 * H:4 * H])
        c_new = f * c_prev + i * g
        h_new = o * jnp.tanh(c_new)
        return h_new, c_new

    # Statically unrolled recurrence over the chunk (Tc is small + static).
    for t in range(Tc):
        gates1 = gx_scr[t] + jnp.dot(h1, whh1, preferred_element_type=jnp.float32)
        h1, c1 = gates_to_hc(gates1, c1)

        gates2 = (jnp.dot(h1, wih2, preferred_element_type=jnp.float32)
                  + jnp.dot(h2, whh2, preferred_element_type=jnp.float32)
                  + b2)
        h2, c2 = gates_to_hc(gates2, c2)
        y2_scr[t] = h2

    # Persist carried state for the next chunk.
    h1_scr[...] = h1
    c1_scr[...] = c1
    h2_scr[...] = h2
    c2_scr[...] = c2

    # Fused FC over the whole chunk: one (Tc*B, H) @ (H, V_pad) matmul and a
    # lane-dense, sublane-full output store.
    y2 = y2_scr[...].reshape(Tc * B, H)
    logits = jnp.dot(y2, wfc_ref[...], preferred_element_type=jnp.float32) + bfc_ref[...]
    out_ref[...] = logits.reshape(Tc, B, out_ref.shape[-1])


def fused_lstm_fc(x_tbe, wih1, whh1, b1, wih2, whh2, b2, wfc, bfc, *, time_chunk):
    """x_tbe: (T_pad, B_pad, E) f32, padded weights -> (T_pad, B_pad, V_pad) f32."""
    T_pad, B_pad, E = x_tbe.shape
    H_pad = whh1.shape[0]
    V_pad = wfc.shape[1]
    Tc = time_chunk
    n_chunks = T_pad // Tc

    flops = int(2 * T_pad * B_pad
                * (E * 4 * H_pad + 3 * H_pad * 4 * H_pad + H_pad * V_pad))
    total_in = sum(int(a.size) for a in (x_tbe, wih1, whh1, b1, wih2, whh2, b2, wfc, bfc))
    bytes_accessed = int(4 * (total_in + T_pad * B_pad * V_pad))

    return pl.pallas_call(
        _fused_lstm_fc_kernel,
        out_shape=jax.ShapeDtypeStruct((T_pad, B_pad, V_pad), jnp.float32),
        grid_spec=pltpu.PrefetchScalarGridSpec(
            num_scalar_prefetch=0,
            grid=(n_chunks,),
            in_specs=[
                pl.BlockSpec((Tc, B_pad, E), lambda tc: (tc, 0, 0)),      # x chunk
                pl.BlockSpec((E, 4 * H_pad), lambda tc: (0, 0)),          # W_ih1
                pl.BlockSpec((H_pad, 4 * H_pad), lambda tc: (0, 0)),      # W_hh1
                pl.BlockSpec((1, 4 * H_pad), lambda tc: (0, 0)),          # b1
                pl.BlockSpec((H_pad, 4 * H_pad), lambda tc: (0, 0)),      # W_ih2
                pl.BlockSpec((H_pad, 4 * H_pad), lambda tc: (0, 0)),      # W_hh2
                pl.BlockSpec((1, 4 * H_pad), lambda tc: (0, 0)),          # b2
                pl.BlockSpec((H_pad, V_pad), lambda tc: (0, 0)),          # W_fc
                pl.BlockSpec((1, V_pad), lambda tc: (0, 0)),              # b_fc
            ],
            out_specs=pl.BlockSpec((Tc, B_pad, V_pad), lambda tc: (tc, 0, 0)),
            scratch_shapes=[
                pltpu.VMEM((B_pad, H_pad), jnp.float32),          # h1
                pltpu.VMEM((B_pad, H_pad), jnp.float32),          # c1
                pltpu.VMEM((B_pad, H_pad), jnp.float32),          # h2
                pltpu.VMEM((B_pad, H_pad), jnp.float32),          # c2
                pltpu.VMEM((Tc, B_pad, 4 * H_pad), jnp.float32),  # gates_x chunk
                pltpu.VMEM((Tc, B_pad, H_pad), jnp.float32),      # h2 chunk (FC input)
            ],
        ),
        compiler_params=pltpu.CompilerParams(
            dimension_semantics=("arbitrary",)),   # time recurrence is sequential
        cost_estimate=pl.CostEstimate(
            flops=flops,
            transcendentals=int(8 * T_pad * B_pad * H_pad),
            bytes_accessed=bytes_accessed),
    )(x_tbe, wih1, whh1, b1, wih2, whh2, b2, wfc, bfc)


# ----------------------------------------------------------------------------
# Model wrapper
# ----------------------------------------------------------------------------
def _round_up(x, m):
    return ((x + m - 1) // m) * m


def _pad_gates_lastdim(w, H, H_pad):
    """w: (in_dim, 4*H), gate order [i,f,g,o] -> (in_dim, 4*H_pad), per-gate zero pad."""
    in_dim = w.shape[0]
    w4 = w.reshape(in_dim, 4, H)
    w4 = jnp.pad(w4, ((0, 0), (0, 0), (0, H_pad - H)))
    return w4.reshape(in_dim, 4 * H_pad)


def init_params(key, vocab_size, embedding_dim, rnn_units):
    ks = jax.random.split(key, 12)
    E, H, V = embedding_dim, rnn_units, vocab_size
    s1 = 1.0 / np.sqrt(H)

    def u(k, shape, scale):
        return jax.random.uniform(k, shape, jnp.float32, -scale, scale)

    return {
        "embedding": jax.random.normal(ks[0], (V, E), jnp.float32),
        # LSTM 1 (stored transposed vs torch: (in, 4H))
        "l1_wih": u(ks[1], (E, 4 * H), s1),
        "l1_whh": u(ks[2], (H, 4 * H), s1),
        "l1_b": u(ks[3], (1, 4 * H), s1) + u(ks[4], (1, 4 * H), s1),  # b_ih + b_hh
        # LSTM 2
        "l2_wih": u(ks[5], (H, 4 * H), s1),
        "l2_whh": u(ks[6], (H, 4 * H), s1),
        "l2_b": u(ks[7], (1, 4 * H), s1) + u(ks[8], (1, 4 * H), s1),
        # fc
        "fc_w": u(ks[9], (H, V), s1),
        "fc_b": u(ks[10], (1, V), s1),
    }


@functools.partial(jax.jit, static_argnames=("time_chunk",))
def shakespeare_forward(params, tokens_bt, *, time_chunk=8):
    """tokens_bt: (B, T) int32 -> logits (B, T, V)."""
    B, T = tokens_bt.shape
    E = params["embedding"].shape[1]
    H = params["l1_whh"].shape[0]
    V = params["fc_w"].shape[1]

    Tc = time_chunk
    B_pad = _round_up(B, 8)        # sublane-full batch
    H_pad = _round_up(H, 128)      # 128-lane-aligned gates / hidden
    V_pad = _round_up(V, 128)      # lane-dense FC output
    T_pad = _round_up(T, Tc)

    # Embedding gather directly into time-major (T, B, E) -- no HBM transpose
    # of the activations.  TODO(synk): could be fused into the kernel via
    # scalar-prefetched token ids + pl.Element row gather.
    emb = jnp.take(params["embedding"], tokens_bt.T, axis=0)          # (T, B, E)
    x = jnp.pad(emb, ((0, T_pad - T), (0, B_pad - B), (0, 0)))

    # Pad weights (zero pads keep the padded lanes exactly zero in h/c).
    # At production sizes these would be pre-padded once, outside the step fn.
    wih1 = _pad_gates_lastdim(params["l1_wih"], H, H_pad)                          # (E, 4H_pad)
    whh1 = jnp.pad(_pad_gates_lastdim(params["l1_whh"], H, H_pad),
                   ((0, H_pad - H), (0, 0)))                                       # (H_pad, 4H_pad)
    b1 = _pad_gates_lastdim(params["l1_b"], H, H_pad)                              # (1, 4H_pad)
    wih2 = jnp.pad(_pad_gates_lastdim(params["l2_wih"], H, H_pad),
                   ((0, H_pad - H), (0, 0)))
    whh2 = jnp.pad(_pad_gates_lastdim(params["l2_whh"], H, H_pad),
                   ((0, H_pad - H), (0, 0)))
    b2 = _pad_gates_lastdim(params["l2_b"], H, H_pad)
    wfc = jnp.pad(params["fc_w"], ((0, H_pad - H), (0, V_pad - V)))                # (H_pad, V_pad)
    bfc = jnp.pad(params["fc_b"], ((0, 0), (0, V_pad - V)))                        # (1, V_pad)

    out_p = fused_lstm_fc(x, wih1, whh1, b1, wih2, whh2, b2, wfc, bfc,
                          time_chunk=Tc)                                           # (T_pad, B_pad, V_pad)

    logits = out_p[:T, :B, :V]                       # drop padding (exact)
    return jnp.transpose(logits, (1, 0, 2))          # (B, T, V) batch_first


# ----------------------------------------------------------------------------
# Pure-JAX reference (same math as torch.nn.LSTM, gate order i,f,g,o)
# ----------------------------------------------------------------------------
def _lstm_ref(x_tbe, w_ih, w_hh, b):
    T, B, E = x_tbe.shape
    H = w_hh.shape[0]

    def step(carry, x_t):
        h, c = carry
        gates = x_t @ w_ih + h @ w_hh + b
        i = jax.nn.sigmoid(gates[:, 0 * H:1 * H])
        f = jax.nn.sigmoid(gates[:, 1 * H:2 * H])
        g = jnp.tanh(gates[:, 2 * H:3 * H])
        o = jax.nn.sigmoid(gates[:, 3 * H:4 * H])
        c = f * c + i * g
        h = o * jnp.tanh(c)
        return (h, c), h

    init = (jnp.zeros((B, H), jnp.float32), jnp.zeros((B, H), jnp.float32))
    _, ys = lax.scan(step, init, x_tbe)
    return ys


def reference_forward(params, tokens_bt):
    emb = jnp.take(params["embedding"], tokens_bt, axis=0)
    x = jnp.transpose(emb, (1, 0, 2))
    h1 = _lstm_ref(x, params["l1_wih"], params["l1_whh"], params["l1_b"])
    h2 = _lstm_ref(h1, params["l2_wih"], params["l2_whh"], params["l2_b"])
    logits = h2 @ params["fc_w"] + params["fc_b"]
    return jnp.transpose(logits, (1, 0, 2))


# ----------------------------------------------------------------------------
if __name__ == "__main__":
    # Small shapes consistent with the module (vocab/embed/hidden scaled down).
    # T=10 / time_chunk=8 exercises time padding + cross-chunk state carry;
    # vocab=65 and rnn_units=64 exercise the lane (128) padding path.
    B, T = 2, 10
    vocab_size, embedding_dim, rnn_units = 65, 32, 64

    key = jax.random.PRNGKey(0)
    kp, kt = jax.random.split(key)
    params = init_params(kp, vocab_size, embedding_dim, rnn_units)
    tokens = jax.random.randint(kt, (B, T), 0, vocab_size, dtype=jnp.int32)

    out = jax.block_until_ready(shakespeare_forward(params, tokens))
    ref = jax.block_until_ready(reference_forward(params, tokens))

    assert out.shape == (B, T, vocab_size), out.shape
    np.testing.assert_allclose(np.asarray(out), np.asarray(ref), rtol=5e-4, atol=5e-4)

    print("KERNEL_OK")
</pallas_src>

<mosaic_0001>
module attributes {stable_mosaic.version = 11 : i64} {
  func.func @_fused_lstm_fc_kernel(%arg0: i32, %arg1: memref<8x8x32xf32, #tpu.memory_space<vmem>>, %arg2: memref<32x512xf32, #tpu.memory_space<vmem>>, %arg3: memref<128x512xf32, #tpu.memory_space<vmem>>, %arg4: memref<1x512xf32, #tpu.memory_space<vmem>>, %arg5: memref<128x512xf32, #tpu.memory_space<vmem>>, %arg6: memref<128x512xf32, #tpu.memory_space<vmem>>, %arg7: memref<1x512xf32, #tpu.memory_space<vmem>>, %arg8: memref<128x128xf32, #tpu.memory_space<vmem>>, %arg9: memref<1x128xf32, #tpu.memory_space<vmem>>, %arg10: memref<8x8x128xf32, #tpu.memory_space<vmem>>, %arg11: memref<8x128xf32, #tpu.memory_space<vmem>>, %arg12: memref<8x128xf32, #tpu.memory_space<vmem>>, %arg13: memref<8x128xf32, #tpu.memory_space<vmem>>, %arg14: memref<8x128xf32, #tpu.memory_space<vmem>>, %arg15: memref<8x8x512xf32, #tpu.memory_space<vmem>>, %arg16: memref<8x8x128xf32, #tpu.memory_space<vmem>>) attributes {dimension_semantics = [#tpu.dimension_semantics<arbitrary>], iteration_bounds = array<i64: 2>, scalar_prefetch = 0 : i64, scratch_operands = 6 : i64, tpu.core_type = #tpu.core_type<tc>, window_params = [{transform_indices = @transform_0, window_bounds = array<i64: 8, 8, 32>}, {pipeline_mode = #tpu.pipeline_mode<synchronous>, transform_indices = @transform_1, window_bounds = array<i64: 32, 512>}, {pipeline_mode = #tpu.pipeline_mode<synchronous>, transform_indices = @transform_2, window_bounds = array<i64: 128, 512>}, {pipeline_mode = #tpu.pipeline_mode<synchronous>, transform_indices = @transform_3, window_bounds = array<i64: 1, 512>}, {pipeline_mode = #tpu.pipeline_mode<synchronous>, transform_indices = @transform_4, window_bounds = array<i64: 128, 512>}, {pipeline_mode = #tpu.pipeline_mode<synchronous>, transform_indices = @transform_5, window_bounds = array<i64: 128, 512>}, {pipeline_mode = #tpu.pipeline_mode<synchronous>, transform_indices = @transform_6, window_bounds = array<i64: 1, 512>}, {pipeline_mode = #tpu.pipeline_mode<synchronous>, transform_indices = @transform_7, window_bounds = array<i64: 128, 128>}, {pipeline_mode = #tpu.pipeline_mode<synchronous>, transform_indices = @transform_8, window_bounds = array<i64: 1, 128>}, {transform_indices = @transform_9, window_bounds = array<i64: 8, 8, 128>}]} {
    %c0_i32 = arith.constant 0 : i32
    %0 = arith.cmpi eq, %arg0, %c0_i32 : i32
    %1 = arith.extui %0 : i1 to i32
    %c0_i32_0 = arith.constant 0 : i32
    %2 = arith.cmpi ne, %1, %c0_i32_0 : i32
    scf.if %2 {
      %cst_158 = arith.constant 0.000000e+00 : f32
      %529 = vector.broadcast %cst_158 : f32 to vector<8x128xf32>
      %c0_159 = arith.constant 0 : index
      %c0_160 = arith.constant 0 : index
      %530 = vector.load %arg11[%c0_159, %c0_160] : memref<8x128xf32, #tpu.memory_space<vmem>>, vector<8x128xf32>
      tpu.vector_store %arg11[%c0_159, %c0_160], %529 {strides = array<i32>} : memref<8x128xf32, #tpu.memory_space<vmem>>, vector<8x128xf32>,
      %cst_161 = arith.constant 0.000000e+00 : f32
      %531 = vector.broadcast %cst_161 : f32 to vector<8x128xf32>
      %c0_162 = arith.constant 0 : index
      %c0_163 = arith.constant 0 : index
      %532 = vector.load %arg12[%c0_162, %c0_163] : memref<8x128xf32, #tpu.memory_space<vmem>>, vector<8x128xf32>
      tpu.vector_store %arg12[%c0_162, %c0_163], %531 {strides = array<i32>} : memref<8x128xf32, #tpu.memory_space<vmem>>, vector<8x128xf32>,
      %cst_164 = arith.constant 0.000000e+00 : f32
      %533 = vector.broadcast %cst_164 : f32 to vector<8x128xf32>
      %c0_165 = arith.constant 0 : index
      %c0_166 = arith.constant 0 : index
      %534 = vector.load %arg13[%c0_165, %c0_166] : memref<8x128xf32, #tpu.memory_space<vmem>>, vector<8x128xf32>
      tpu.vector_store %arg13[%c0_165, %c0_166], %533 {strides = array<i32>} : memref<8x128xf32, #tpu.memory_space<vmem>>, vector<8x128xf32>,
      %cst_167 = arith.constant 0.000000e+00 : f32
      %535 = vector.broadcast %cst_167 : f32 to vector<8x128xf32>
      %c0_168 = arith.constant 0 : index
      %c0_169 = arith.constant 0 : index
      %536 = vector.load %arg14[%c0_168, %c0_169] : memref<8x128xf32, #tpu.memory_space<vmem>>, vector<8x128xf32>
      tpu.vector_store %arg14[%c0_168, %c0_169], %535 {strides = array<i32>} : memref<8x128xf32, #tpu.memory_space<vmem>>, vector<8x128xf32>,
    } else {
    }
    %c0 = arith.constant 0 : index
    %c0_1 = arith.constant 0 : index
    %c0_2 = arith.constant 0 : index
    %3 = vector.load %arg1[%c0, %c0_1, %c0_2] : memref<8x8x32xf32, #tpu.memory_space<vmem>>, vector<8x8x32xf32>
    %4 = vector.shape_cast %3 : vector<8x8x32xf32> to vector<64x32xf32>
    %c0_3 = arith.constant 0 : index
    %c0_4 = arith.constant 0 : index
    %5 = vector.load %arg2[%c0_3, %c0_4] : memref<32x512xf32, #tpu.memory_space<vmem>>, vector<32x512xf32>
    %cst = arith.constant dense<0.000000e+00> : vector<64x512xf32>
    %6 = tpu.matmul %4, %5, %cst {dimension_numbers = #tpu.dot_dimension_numbers<[1], [0], [0], [1], [0, 0, 1, 1], [], []>} : vector<64x32xf32>, vector<32x512xf32>, vector<64x512xf32> -> vector<64x512xf32>
    %c0_5 = arith.constant 0 : index
    %c0_6 = arith.constant 0 : index
    %7 = vector.load %arg4[%c0_5, %c0_6] : memref<1x512xf32, #tpu.memory_space<vmem>>, vector<1x512xf32>
    %8 = vector.broadcast %7 : vector<1x512xf32> to vector<64x512xf32>
    %9 = arith.addf %6, %8 : vector<64x512xf32>
    %10 = vector.shape_cast %9 : vector<64x512xf32> to vector<8x8x512xf32>
    %c0_7 = arith.constant 0 : index
    %c0_8 = arith.constant 0 : index
    %c0_9 = arith.constant 0 : index
    %11 = vector.load %arg15[%c0_7, %c0_8, %c0_9] : memref<8x8x512xf32, #tpu.memory_space<vmem>>, vector<8x8x512xf32>
    tpu.vector_store %arg15[%c0_7, %c0_8, %c0_9], %10 {strides = array<i32>} : memref<8x8x512xf32, #tpu.memory_space<vmem>>, vector<8x8x512xf32>,
    %c0_10 = arith.constant 0 : index
    %c0_11 = arith.constant 0 : index
    %12 = vector.load %arg3[%c0_10, %c0_11] : memref<128x512xf32, #tpu.memory_space<vmem>>, vector<128x512xf32>
    %c0_12 = arith.constant 0 : index
    %c0_13 = arith.constant 0 : index
    %13 = vector.load %arg5[%c0_12, %c0_13] : memref<128x512xf32, #tpu.memory_space<vmem>>, vector<128x512xf32>
    %c0_14 = arith.constant 0 : index
    %c0_15 = arith.constant 0 : index
    %14 = vector.load %arg6[%c0_14, %c0_15] : memref<128x512xf32, #tpu.memory_space<vmem>>, vector<128x512xf32>
    %c0_16 = arith.constant 0 : index
    %c0_17 = arith.constant 0 : index
    %15 = vector.load %arg7[%c0_16, %c0_17] : memref<1x512xf32, #tpu.memory_space<vmem>>, vector<1x512xf32>
    %c0_18 = arith.constant 0 : index
    %c0_19 = arith.constant 0 : index
    %16 = vector.load %arg11[%c0_18, %c0_19] : memref<8x128xf32, #tpu.memory_space<vmem>>, vector<8x128xf32>
    %c0_20 = arith.constant 0 : index
    %c0_21 = arith.constant 0 : index
    %17 = vector.load %arg12[%c0_20, %c0_21] : memref<8x128xf32, #tpu.memory_space<vmem>>, vector<8x128xf32>
    %c0_22 = arith.constant 0 : index
    %c0_23 = arith.constant 0 : index
    %18 = vector.load %arg13[%c0_22, %c0_23] : memref<8x128xf32, #tpu.memory_space<vmem>>, vector<8x128xf32>
    %c0_24 = arith.constant 0 : index
    %c0_25 = arith.constant 0 : index
    %19 = vector.load %arg14[%c0_24, %c0_25] : memref<8x128xf32, #tpu.memory_space<vmem>>, vector<8x128xf32>
    %c0_26 = arith.constant 0 : index
    %c0_27 = arith.constant 0 : index
    %c0_28 = arith.constant 0 : index
    %20 = vector.load %arg15[%c0_26, %c0_27, %c0_28] : memref<8x8x512xf32, #tpu.memory_space<vmem>>, vector<1x8x512xf32>
    %21 = vector.shape_cast %20 : vector<1x8x512xf32> to vector<8x512xf32>
    %cst_29 = arith.constant dense<0.000000e+00> : vector<8x512xf32>
    %22 = tpu.matmul %16, %12, %cst_29 {dimension_numbers = #tpu.dot_dimension_numbers<[1], [0], [0], [1], [0, 0, 1, 1], [], []>} : vector<8x128xf32>, vector<128x512xf32>, vector<8x512xf32> -> vector<8x512xf32>
    %23 = arith.addf %21, %22 : vector<8x512xf32>
    %24 = vector.extract_strided_slice %23 {offsets = [0, 0], sizes = [8, 128], strides = [1, 1]} : vector<8x512xf32> to vector<8x128xf32>
    %25 = arith.negf %24 : vector<8x128xf32>
    %26 = math.exp %25 : vector<8x128xf32>
    %cst_30 = arith.constant 1.000000e+00 : f32
    %27 = vector.broadcast %cst_30 : f32 to vector<8x128xf32>
    %28 = arith.addf %27, %26 : vector<8x128xf32>
    %29 = arith.divf %27, %28 : vector<8x128xf32>
    %30 = vector.extract_strided_slice %23 {offsets = [0, 128], sizes = [8, 128], strides = [1, 1]} : vector<8x512xf32> to vector<8x128xf32>
    %31 = arith.negf %30 : vector<8x128xf32>
    %32 = math.exp %31 : vector<8x128xf32>
    %cst_31 = arith.constant 1.000000e+00 : f32
    %33 = vector.broadcast %cst_31 : f32 to vector<8x128xf32>
    %34 = arith.addf %33, %32 : vector<8x128xf32>
    %35 = arith.divf %33, %34 : vector<8x128xf32>
    %36 = vector.extract_strided_slice %23 {offsets = [0, 256], sizes = [8, 128], strides = [1, 1]} : vector<8x512xf32> to vector<8x128xf32>
    %37 = math.tanh %36 : vector<8x128xf32>
    %38 = vector.extract_strided_slice %23 {offsets = [0, 384], sizes = [8, 128], strides = [1, 1]} : vector<8x512xf32> to vector<8x128xf32>
    %39 = arith.negf %38 : vector<8x128xf32>
    %40 = math.exp %39 : vector<8x128xf32>
    %cst_32 = arith.constant 1.000000e+00 : f32
    %41 = vector.broadcast %cst_32 : f32 to vector<8x128xf32>
    %42 = arith.addf %41, %40 : vector<8x128xf32>
    %43 = arith.divf %41, %42 : vector<8x128xf32>
    %44 = arith.mulf %35, %17 : vector<8x128xf32>
    %45 = arith.mulf %29, %37 : vector<8x128xf32>
    %46 = arith.addf %44, %45 : vector<8x128xf32>
    %47 = math.tanh %46 : vector<8x128xf32>
    %48 = arith.mulf %43, %47 : vector<8x128xf32>
    %cst_33 = arith.constant dense<0.000000e+00> : vector<8x512xf32>
    %49 = tpu.matmul %48, %13, %cst_33 {dimension_numbers = #tpu.dot_dimension_numbers<[1], [0], [0], [1], [0, 0, 1, 1], [], []>} : vector<8x128xf32>, vector<128x512xf32>, vector<8x512xf32> -> vector<8x512xf32>
    %cst_34 = arith.constant dense<0.000000e+00> : vector<8x512xf32>
    %50 = tpu.matmul %18, %14, %cst_34 {dimension_numbers = #tpu.dot_dimension_numbers<[1], [0], [0], [1], [0, 0, 1, 1], [], []>} : vector<8x128xf32>, vector<128x512xf32>, vector<8x512xf32> -> vector<8x512xf32>
    %51 = arith.addf %49, %50 : vector<8x512xf32>
    %52 = vector.broadcast %15 : vector<1x512xf32> to vector<8x512xf32>
    %53 = arith.addf %51, %52 : vector<8x512xf32>
    %54 = vector.extract_strided_slice %53 {offsets = [0, 0], sizes = [8, 128], strides = [1, 1]} : vector<8x512xf32> to vector<8x128xf32>
    %55 = arith.negf %54 : vector<8x128xf32>
    %56 = math.exp %55 : vector<8x128xf32>
    %cst_35 = arith.constant 1.000000e+00 : f32
    %57 = vector.broadcast %cst_35 : f32 to vector<8x128xf32>
    %58 = arith.addf %57, %56 : vector<8x128xf32>
    %59 = arith.divf %57, %58 : vector<8x128xf32>
    %60 = vector.extract_strided_slice %53 {offsets = [0, 128], sizes = [8, 128], strides = [1, 1]} : vector<8x512xf32> to vector<8x128xf32>
    %61 = arith.negf %60 : vector<8x128xf32>
    %62 = math.exp %61 : vector<8x128xf32>
    %cst_36 = arith.constant 1.000000e+00 : f32
    %63 = vector.broadcast %cst_36 : f32 to vector<8x128xf32>
    %64 = arith.addf %63, %62 : vector<8x128xf32>
    %65 = arith.divf %63, %64 : vector<8x128xf32>
    %66 = vector.extract_strided_slice %53 {offsets = [0, 256], sizes = [8, 128], strides = [1, 1]} : vector<8x512xf32> to vector<8x128xf32>
    %67 = math.tanh %66 : vector<8x128xf32>
    %68 = vector.extract_strided_slice %53 {offsets = [0, 384], sizes = [8, 128], strides = [1, 1]} : vector<8x512xf32> to vector<8x128xf32>
    %69 = arith.negf %68 : vector<8x128xf32>
    %70 = math.exp %69 : vector<8x128xf32>
    %cst_37 = arith.constant 1.000000e+00 : f32
    %71 = vector.broadcast %cst_37 : f32 to vector<8x128xf32>
    %72 = arith.addf %71, %70 : vector<8x128xf32>
    %73 = arith.divf %71, %72 : vector<8x128xf32>
    %74 = arith.mulf %65, %19 : vector<8x128xf32>
    %75 = arith.mulf %59, %67 : vector<8x128xf32>
    %76 = arith.addf %74, %75 : vector<8x128xf32>
    %77 = math.tanh %76 : vector<8x128xf32>
    %78 = arith.mulf %73, %77 : vector<8x128xf32>
    %c0_38 = arith.constant 0 : index
    %c0_39 = arith.constant 0 : index
    %c0_40 = arith.constant 0 : index
    %79 = vector.load %arg16[%c0_38, %c0_39, %c0_40] : memref<8x8x128xf32, #tpu.memory_space<vmem>>, vector<1x8x128xf32>
    %80 = vector.shape_cast %79 : vector<1x8x128xf32> to vector<8x128xf32>
    %81 = vector.shape_cast %78 : vector<8x128xf32> to vector<1x8x128xf32>
    tpu.vector_store %arg16[%c0_38, %c0_39, %c0_40], %81 {strides = array<i32>} : memref<8x8x128xf32, #tpu.memory_space<vmem>>, vector<1x8x128xf32>,
    %c1 = arith.constant 1 : index
    %c0_41 = arith.constant 0 : index
    %c0_42 = arith.constant 0 : index
    %82 = vector.load %arg15[%c1, %c0_41, %c0_42] : memref<8x8x512xf32, #tpu.memory_space<vmem>>, vector<1x8x512xf32>
    %83 = vector.shape_cast %82 : vector<1x8x512xf32> to vector<8x512xf32>
    %cst_43 = arith.constant dense<0.000000e+00> : vector<8x512xf32>
    %84 = tpu.matmul %48, %12, %cst_43 {dimension_numbers = #tpu.dot_dimension_numbers<[1], [0], [0], [1], [0, 0, 1, 1], [], []>} : vector<8x128xf32>, vector<128x512xf32>, vector<8x512xf32> -> vector<8x512xf32>
    %85 = arith.addf %83, %84 : vector<8x512xf32>
    %86 = vector.extract_strided_slice %85 {offsets = [0, 0], sizes = [8, 128], strides = [1, 1]} : vector<8x512xf32> to vector<8x128xf32>
    %87 = arith.negf %86 : vector<8x128xf32>
    %88 = math.exp %87 : vector<8x128xf32>
    %cst_44 = arith.constant 1.000000e+00 : f32
    %89 = vector.broadcast %cst_44 : f32 to vector<8x128xf32>
    %90 = arith.addf %89, %88 : vector<8x128xf32>
    %91 = arith.divf %89, %90 : vector<8x128xf32>
    %92 = vector.extract_strided_slice %85 {offsets = [0, 128], sizes = [8, 128], strides = [1, 1]} : vector<8x512xf32> to vector<8x128xf32>
    %93 = arith.negf %92 : vector<8x128xf32>
    %94 = math.exp %93 : vector<8x128xf32>
    %cst_45 = arith.constant 1.000000e+00 : f32
    %95 = vector.broadcast %cst_45 : f32 to vector<8x128xf32>
    %96 = arith.addf %95, %94 : vector<8x128xf32>
    %97 = arith.divf %95, %96 : vector<8x128xf32>
    %98 = vector.extract_strided_slice %85 {offsets = [0, 256], sizes = [8, 128], strides = [1, 1]} : vector<8x512xf32> to vector<8x128xf32>
    %99 = math.tanh %98 : vector<8x128xf32>
    %100 = vector.extract_strided_slice %85 {offsets = [0, 384], sizes = [8, 128], strides = [1, 1]} : vector<8x512xf32> to vector<8x128xf32>
    %101 = arith.negf %100 : vector<8x128xf32>
    %102 = math.exp %101 : vector<8x128xf32>
    %cst_46 = arith.constant 1.000000e+00 : f32
    %103 = vector.broadcast %cst_46 : f32 to vector<8x128xf32>
    %104 = arith.addf %103, %102 : vector<8x128xf32>
    %105 = arith.divf %103, %104 : vector<8x128xf32>
    %106 = arith.mulf %97, %46 : vector<8x128xf32>
    %107 = arith.mulf %91, %99 : vector<8x128xf32>
    %108 = arith.addf %106, %107 : vector<8x128xf32>
    %109 = math.tanh %108 : vector<8x128xf32>
    %110 = arith.mulf %105, %109 : vector<8x128xf32>
    %cst_47 = arith.constant dense<0.000000e+00> : vector<8x512xf32>
    %111 = tpu.matmul %110, %13, %cst_47 {dimension_numbers = #tpu.dot_dimension_numbers<[1], [0], [0], [1], [0, 0, 1, 1], [], []>} : vector<8x128xf32>, vector<128x512xf32>, vector<8x512xf32> -> vector<8x512xf32>
    %cst_48 = arith.constant dense<0.000000e+00> : vector<8x512xf32>
    %112 = tpu.matmul %78, %14, %cst_48 {dimension_numbers = #tpu.dot_dimension_numbers<[1], [0], [0], [1], [0, 0, 1, 1], [], []>} : vector<8x128xf32>, vector<128x512xf32>, vector<8x512xf32> -> vector<8x512xf32>
    %113 = arith.addf %111, %112 : vector<8x512xf32>
    %114 = vector.broadcast %15 : vector<1x512xf32> to vector<8x512xf32>
    %115 = arith.addf %113, %114 : vector<8x512xf32>
    %116 = vector.extract_strided_slice %115 {offsets = [0, 0], sizes = [8, 128], strides = [1, 1]} : vector<8x512xf32> to vector<8x128xf32>
    %117 = arith.negf %116 : vector<8x128xf32>
    %118 = math.exp %117 : vector<8x128xf32>
    %cst_49 = arith.constant 1.000000e+00 : f32
    %119 = vector.broadcast %cst_49 : f32 to vector<8x128xf32>
    %120 = arith.addf %119, %118 : vector<8x128xf32>
    %121 = arith.divf %119, %120 : vector<8x128xf32>
    %122 = vector.extract_strided_slice %115 {offsets = [0, 128], sizes = [8, 128], strides = [1, 1]} : vector<8x512xf32> to vector<8x128xf32>
    %123 = arith.negf %122 : vector<8x128xf32>
    %124 = math.exp %123 : vector<8x128xf32>
    %cst_50 = arith.constant 1.000000e+00 : f32
    %125 = vector.broadcast %cst_50 : f32 to vector<8x128xf32>
    %126 = arith.addf %125, %124 : vector<8x128xf32>
    %127 = arith.divf %125, %126 : vector<8x128xf32>
    %128 = vector.extract_strided_slice %115 {offsets = [0, 256], sizes = [8, 128], strides = [1, 1]} : vector<8x512xf32> to vector<8x128xf32>
    %129 = math.tanh %128 : vector<8x128xf32>
    %130 = vector.extract_strided_slice %115 {offsets = [0, 384], sizes = [8, 128], strides = [1, 1]} : vector<8x512xf32> to vector<8x128xf32>
    %131 = arith.negf %130 : vector<8x128xf32>
    %132 = math.exp %131 : vector<8x128xf32>
    %cst_51 = arith.constant 1.000000e+00 : f32
    %133 = vector.broadcast %cst_51 : f32 to vector<8x128xf32>
    %134 = arith.addf %133, %132 : vector<8x128xf32>
    %135 = arith.divf %133, %134 : vector<8x128xf32>
    %136 = arith.mulf %127, %76 : vector<8x128xf32>
    %137 = arith.mulf %121, %129 : vector<8x128xf32>
    %138 = arith.addf %136, %137 : vector<8x128xf32>
    %139 = math.tanh %138 : vector<8x128xf32>
    %140 = arith.mulf %135, %139 : vector<8x128xf32>
    %c1_52 = arith.constant 1 : index
    %c0_53 = arith.constant 0 : index
    %c0_54 = arith.constant 0 : index
    %141 = vector.load %arg16[%c1_52, %c0_53, %c0_54] : memref<8x8x128xf32, #tpu.memory_space<vmem>>, vector<1x8x128xf32>
    %142 = vector.shape_cast %141 : vector<1x8x128xf32> to vector<8x128xf32>
    %143 = vector.shape_cast %140 : vector<8x128xf32> to vector<1x8x128xf32>
    tpu.vector_store %arg16[%c1_52, %c0_53, %c0_54], %143 {strides = array<i32>} : memref<8x8x128xf32, #tpu.memory_space<vmem>>, vector<1x8x128xf32>,
    %c2 = arith.constant 2 : index
    %c0_55 = arith.constant 0 : index
    %c0_56 = arith.constant 0 : index
    %144 = vector.load %arg15[%c2, %c0_55, %c0_56] : memref<8x8x512xf32, #tpu.memory_space<vmem>>, vector<1x8x512xf32>
    %145 = vector.shape_cast %144 : vector<1x8x512xf32> to vector<8x512xf32>
    %cst_57 = arith.constant dense<0.000000e+00> : vector<8x512xf32>
    %146 = tpu.matmul %110, %12, %cst_57 {dimension_numbers = #tpu.dot_dimension_numbers<[1], [0], [0], [1], [0, 0, 1, 1], [], []>} : vector<8x128xf32>, vector<128x512xf32>, vector<8x512xf32> -> vector<8x512xf32>
    %147 = arith.addf %145, %146 : vector<8x512xf32>
    %148 = vector.extract_strided_slice %147 {offsets = [0, 0], sizes = [8, 128], strides = [1, 1]} : vector<8x512xf32> to vector<8x128xf32>
    %149 = arith.negf %148 : vector<8x128xf32>
    %150 = math.exp %149 : vector<8x128xf32>
    %cst_58 = arith.constant 1.000000e+00 : f32
    %151 = vector.broadcast %cst_58 : f32 to vector<8x128xf32>
    %152 = arith.addf %151, %150 : vector<8x128xf32>
    %153 = arith.divf %151, %152 : vector<8x128xf32>
    %154 = vector.extract_strided_slice %147 {offsets = [0, 128], sizes = [8, 128], strides = [1, 1]} : vector<8x512xf32> to vector<8x128xf32>
    %155 = arith.negf %154 : vector<8x128xf32>
    %156 = math.exp %155 : vector<8x128xf32>
    %cst_59 = arith.constant 1.000000e+00 : f32
    %157 = vector.broadcast %cst_59 : f32 to vector<8x128xf32>
    %158 = arith.addf %157, %156 : vector<8x128xf32>
    %159 = arith.divf %157, %158 : vector<8x128xf32>
    %160 = vector.extract_strided_slice %147 {offsets = [0, 256], sizes = [8, 128], strides = [1, 1]} : vector<8x512xf32> to vector<8x128xf32>
    %161 = math.tanh %160 : vector<8x128xf32>
    %162 = vector.extract_strided_slice %147 {offsets = [0, 384], sizes = [8, 128], strides = [1, 1]} : vector<8x512xf32> to vector<8x128xf32>
    %163 = arith.negf %162 : vector<8x128xf32>
    %164 = math.exp %163 : vector<8x128xf32>
    %cst_60 = arith.constant 1.000000e+00 : f32
    %165 = vector.broadcast %cst_60 : f32 to vector<8x128xf32>
    %166 = arith.addf %165, %164 : vector<8x128xf32>
    %167 = arith.divf %165, %166 : vector<8x128xf32>
    %168 = arith.mulf %159, %108 : vector<8x128xf32>
    %169 = arith.mulf %153, %161 : vector<8x128xf32>
    %170 = arith.addf %168, %169 : vector<8x128xf32>
    %171 = math.tanh %170 : vector<8x128xf32>
    %172 = arith.mulf %167, %171 : vector<8x128xf32>
    %cst_61 = arith.constant dense<0.000000e+00> : vector<8x512xf32>
    %173 = tpu.matmul %172, %13, %cst_61 {dimension_numbers = #tpu.dot_dimension_numbers<[1], [0], [0], [1], [0, 0, 1, 1], [], []>} : vector<8x128xf32>, vector<128x512xf32>, vector<8x512xf32> -> vector<8x512xf32>
    %cst_62 = arith.constant dense<0.000000e+00> : vector<8x512xf32>
    %174 = tpu.matmul %140, %14, %cst_62 {dimension_numbers = #tpu.dot_dimension_numbers<[1], [0], [0], [1], [0, 0, 1, 1], [], []>} : vector<8x128xf32>, vector<128x512xf32>, vector<8x512xf32> -> vector<8x512xf32>
    %175 = arith.addf %173, %174 : vector<8x512xf32>
    %176 = vector.broadcast %15 : vector<1x512xf32> to vector<8x512xf32>
    %177 = arith.addf %175, %176 : vector<8x512xf32>
    %178 = vector.extract_strided_slice %177 {offsets = [0, 0], sizes = [8, 128], strides = [1, 1]} : vector<8x512xf32> to vector<8x128xf32>
    %179 = arith.negf %178 : vector<8x128xf32>
    %180 = math.exp %179 : vector<8x128xf32>
    %cst_63 = arith.constant 1.000000e+00 : f32
    %181 = vector.broadcast %cst_63 : f32 to vector<8x128xf32>
    %182 = arith.addf %181, %180 : vector<8x128xf32>
    %183 = arith.divf %181, %182 : vector<8x128xf32>
    %184 = vector.extract_strided_slice %177 {offsets = [0, 128], sizes = [8, 128], strides = [1, 1]} : vector<8x512xf32> to vector<8x128xf32>
    %185 = arith.negf %184 : vector<8x128xf32>
    %186 = math.exp %185 : vector<8x128xf32>
    %cst_64 = arith.constant 1.000000e+00 : f32
    %187 = vector.broadcast %cst_64 : f32 to vector<8x128xf32>
    %188 = arith.addf %187, %186 : vector<8x128xf32>
    %189 = arith.divf %187, %188 : vector<8x128xf32>
    %190 = vector.extract_strided_slice %177 {offsets = [0, 256], sizes = [8, 128], strides = [1, 1]} : vector<8x512xf32> to vector<8x128xf32>
    %191 = math.tanh %190 : vector<8x128xf32>
    %192 = vector.extract_strided_slice %177 {offsets = [0, 384], sizes = [8, 128], strides = [1, 1]} : vector<8x512xf32> to vector<8x128xf32>
    %193 = arith.negf %192 : vector<8x128xf32>
    %194 = math.exp %193 : vector<8x128xf32>
    %cst_65 = arith.constant 1.000000e+00 : f32
    %195 = vector.broadcast %cst_65 : f32 to vector<8x128xf32>
    %196 = arith.addf %195, %194 : vector<8x128xf32>
    %197 = arith.divf %195, %196 : vector<8x128xf32>
    %198 = arith.mulf %189, %138 : vector<8x128xf32>
    %199 = arith.mulf %183, %191 : vector<8x128xf32>
    %200 = arith.addf %198, %199 : vector<8x128xf32>
    %201 = math.tanh %200 : vector<8x128xf32>
    %202 = arith.mulf %197, %201 : vector<8x128xf32>
    %c2_66 = arith.constant 2 : index
    %c0_67 = arith.constant 0 : index
    %c0_68 = arith.constant 0 : index
    %203 = vector.load %arg16[%c2_66, %c0_67, %c0_68] : memref<8x8x128xf32, #tpu.memory_space<vmem>>, vector<1x8x128xf32>
    %204 = vector.shape_cast %203 : vector<1x8x128xf32> to vector<8x128xf32>
    %205 = vector.shape_cast %202 : vector<8x128xf32> to vector<1x8x128xf32>
    tpu.vector_store %arg16[%c2_66, %c0_67, %c0_68], %205 {strides = array<i32>} : memref<8x8x128xf32, #tpu.memory_space<vmem>>, vector<1x8x128xf32>,
    %c3 = arith.constant 3 : index
    %c0_69 = arith.constant 0 : index
    %c0_70 = arith.constant 0 : index
    %206 = vector.load %arg15[%c3, %c0_69, %c0_70] : memref<8x8x512xf32, #tpu.memory_space<vmem>>, vector<1x8x512xf32>
    %207 = vector.shape_cast %206 : vector<1x8x512xf32> to vector<8x512xf32>
    %cst_71 = arith.constant dense<0.000000e+00> : vector<8x512xf32>
    %208 = tpu.matmul %172, %12, %cst_71 {dimension_numbers = #tpu.dot_dimension_numbers<[1], [0], [0], [1], [0, 0, 1, 1], [], []>} : vector<8x128xf32>, vector<128x512xf32>, vector<8x512xf32> -> vector<8x512xf32>
    %209 = arith.addf %207, %208 : vector<8x512xf32>
    %210 = vector.extract_strided_slice %209 {offsets = [0, 0], sizes = [8, 128], strides = [1, 1]} : vector<8x512xf32> to vector<8x128xf32>
    %211 = arith.negf %210 : vector<8x128xf32>
    %212 = math.exp %211 : vector<8x128xf32>
    %cst_72 = arith.constant 1.000000e+00 : f32
    %213 = vector.broadcast %cst_72 : f32 to vector<8x128xf32>
    %214 = arith.addf %213, %212 : vector<8x128xf32>
    %215 = arith.divf %213, %214 : vector<8x128xf32>
    %216 = vector.extract_strided_slice %209 {offsets = [0, 128], sizes = [8, 128], strides = [1, 1]} : vector<8x512xf32> to vector<8x128xf32>
    %217 = arith.negf %216 : vector<8x128xf32>
    %218 = math.exp %217 : vector<8x128xf32>
    %cst_73 = arith.constant 1.000000e+00 : f32
    %219 = vector.broadcast %cst_73 : f32 to vector<8x128xf32>
    %220 = arith.addf %219, %218 : vector<8x128xf32>
    %221 = arith.divf %219, %220 : vector<8x128xf32>
    %222 = vector.extract_strided_slice %209 {offsets = [0, 256], sizes = [8, 128], strides = [1, 1]} : vector<8x512xf32> to vector<8x128xf32>
    %223 = math.tanh %222 : vector<8x128xf32>
    %224 = vector.extract_strided_slice %209 {offsets = [0, 384], sizes = [8, 128], strides = [1, 1]} : vector<8x512xf32> to vector<8x128xf32>
    %225 = arith.negf %224 : vector<8x128xf32>
    %226 = math.exp %225 : vector<8x128xf32>
    %cst_74 = arith.constant 1.000000e+00 : f32
    %227 = vector.broadcast %cst_74 : f32 to vector<8x128xf32>
    %228 = arith.addf %227, %226 : vector<8x128xf32>
    %229 = arith.divf %227, %228 : vector<8x128xf32>
    %230 = arith.mulf %221, %170 : vector<8x128xf32>
    %231 = arith.mulf %215, %223 : vector<8x128xf32>
    %232 = arith.addf %230, %231 : vector<8x128xf32>
    %233 = math.tanh %232 : vector<8x128xf32>
    %234 = arith.mulf %229, %233 : vector<8x128xf32>
    %cst_75 = arith.constant dense<0.000000e+00> : vector<8x512xf32>
    %235 = tpu.matmul %234, %13, %cst_75 {dimension_numbers = #tpu.dot_dimension_numbers<[1], [0], [0], [1], [0, 0, 1, 1], [], []>} : vector<8x128xf32>, vector<128x512xf32>, vector<8x512xf32> -> vector<8x512xf32>
    %cst_76 = arith.constant dense<0.000000e+00> : vector<8x512xf32>
    %236 = tpu.matmul %202, %14, %cst_76 {dimension_numbers = #tpu.dot_dimension_numbers<[1], [0], [0], [1], [0, 0, 1, 1], [], []>} : vector<8x128xf32>, vector<128x512xf32>, vector<8x512xf32> -> vector<8x512xf32>
    %237 = arith.addf %235, %236 : vector<8x512xf32>
    %238 = vector.broadcast %15 : vector<1x512xf32> to vector<8x512xf32>
    %239 = arith.addf %237, %238 : vector<8x512xf32>
    %240 = vector.extract_strided_slice %239 {offsets = [0, 0], sizes = [8, 128], strides = [1, 1]} : vector<8x512xf32> to vector<8x128xf32>
    %241 = arith.negf %240 : vector<8x128xf32>
    %242 = math.exp %241 : vector<8x128xf32>
    %cst_77 = arith.constant 1.000000e+00 : f32
    %243 = vector.broadcast %cst_77 : f32 to vector<8x128xf32>
    %244 = arith.addf %243, %242 : vector<8x128xf32>
    %245 = arith.divf %243, %244 : vector<8x128xf32>
    %246 = vector.extract_strided_slice %239 {offsets = [0, 128], sizes = [8, 128], strides = [1, 1]} : vector<8x512xf32> to vector<8x128xf32>
    %247 = arith.negf %246 : vector<8x128xf32>
    %248 = math.exp %247 : vector<8x128xf32>
    %cst_78 = arith.constant 1.000000e+00 : f32
    %249 = vector.broadcast %cst_78 : f32 to vector<8x128xf32>
    %250 = arith.addf %249, %248 : vector<8x128xf32>
    %251 = arith.divf %249, %250 : vector<8x128xf32>
    %252 = vector.extract_strided_slice %239 {offsets = [0, 256], sizes = [8, 128], strides = [1, 1]} : vector<8x512xf32> to vector<8x128xf32>
    %253 = math.tanh %252 : vector<8x128xf32>
    %254 = vector.extract_strided_slice %239 {offsets = [0, 384], sizes = [8, 128], strides = [1, 1]} : vector<8x512xf32> to vector<8x128xf32>
    %255 = arith.negf %254 : vector<8x128xf32>
    %256 = math.exp %255 : vector<8x128xf32>
    %cst_79 = arith.constant 1.000000e+00 : f32
    %257 = vector.broadcast %cst_79 : f32 to vector<8x128xf32>
    %258 = arith.addf %257, %256 : vector<8x128xf32>
    %259 = arith.divf %257, %258 : vector<8x128xf32>
    %260 = arith.mulf %251, %200 : vector<8x128xf32>
    %261 = arith.mulf %245, %253 : vector<8x128xf32>
    %262 = arith.addf %260, %261 : vector<8x128xf32>
    %263 = math.tanh %262 : vector<8x128xf32>
    %264 = arith.mulf %259, %263 : vector<8x128xf32>
    %c3_80 = arith.constant 3 : index
    %c0_81 = arith.constant 0 : index
    %c0_82 = arith.constant 0 : index
    %265 = vector.load %arg16[%c3_80, %c0_81, %c0_82] : memref<8x8x128xf32, #tpu.memory_space<vmem>>, vector<1x8x128xf32>
    %266 = vector.shape_cast %265 : vector<1x8x128xf32> to vector<8x128xf32>
    %267 = vector.shape_cast %264 : vector<8x128xf32> to vector<1x8x128xf32>
    tpu.vector_store %arg16[%c3_80, %c0_81, %c0_82], %267 {strides = array<i32>} : memref<8x8x128xf32, #tpu.memory_space<vmem>>, vector<1x8x128xf32>,
    %c4 = arith.constant 4 : index
    %c0_83 = arith.constant 0 : index
    %c0_84 = arith.constant 0 : index
    %268 = vector.load %arg15[%c4, %c0_83, %c0_84] : memref<8x8x512xf32, #tpu.memory_space<vmem>>, vector<1x8x512xf32>
    %269 = vector.shape_cast %268 : vector<1x8x512xf32> to vector<8x512xf32>
    %cst_85 = arith.constant dense<0.000000e+00> : vector<8x512xf32>
    %270 = tpu.matmul %234, %12, %cst_85 {dimension_numbers = #tpu.dot_dimension_numbers<[1], [0], [0], [1], [0, 0, 1, 1], [], []>} : vector<8x128xf32>, vector<128x512xf32>, vector<8x512xf32> -> vector<8x512xf32>
    %271 = arith.addf %269, %270 : vector<8x512xf32>
    %272 = vector.extract_strided_slice %271 {offsets = [0, 0], sizes = [8, 128], strides = [1, 1]} : vector<8x512xf32> to vector<8x128xf32>
    %273 = arith.negf %272 : vector<8x128xf32>
    %274 = math.exp %273 : vector<8x128xf32>
    %cst_86 = arith.constant 1.000000e+00 : f32
    %275 = vector.broadcast %cst_86 : f32 to vector<8x128xf32>
    %276 = arith.addf %275, %274 : vector<8x128xf32>
    %277 = arith.divf %275, %276 : vector<8x128xf32>
    %278 = vector.extract_strided_slice %271 {offsets = [0, 128], sizes = [8, 128], strides = [1, 1]} : vector<8x512xf32> to vector<8x128xf32>
    %279 = arith.negf %278 : vector<8x128xf32>
    %280 = math.exp %279 : vector<8x128xf32>
    %cst_87 = arith.constant 1.000000e+00 : f32
    %281 = vector.broadcast %cst_87 : f32 to vector<8x128xf32>
    %282 = arith.addf %281, %280 : vector<8x128xf32>
    %283 = arith.divf %281, %282 : vector<8x128xf32>
    %284 = vector.extract_strided_slice %271 {offsets = [0, 256], sizes = [8, 128], strides = [1, 1]} : vector<8x512xf32> to vector<8x128xf32>
    %285 = math.tanh %284 : vector<8x128xf32>
    %286 = vector.extract_strided_slice %271 {offsets = [0, 384], sizes = [8, 128], strides = [1, 1]} : vector<8x512xf32> to vector<8x128xf32>
    %287 = arith.negf %286 : vector<8x128xf32>
    %288 = math.exp %287 : vector<8x128xf32>
    %cst_88 = arith.constant 1.000000e+00 : f32
    %289 = vector.broadcast %cst_88 : f32 to vector<8x128xf32>
    %290 = arith.addf %289, %288 : vector<8x128xf32>
    %291 = arith.divf %289, %290 : vector<8x128xf32>
    %292 = arith.mulf %283, %232 : vector<8x128xf32>
    %293 = arith.mulf %277, %285 : vector<8x128xf32>
    %294 = arith.addf %292, %293 : vector<8x128xf32>
    %295 = math.tanh %294 : vector<8x128xf32>
    %296 = arith.mulf %291, %295 : vector<8x128xf32>
    %cst_89 = arith.constant dense<0.000000e+00> : vector<8x512xf32>
    %297 = tpu.matmul %296, %13, %cst_89 {dimension_numbers = #tpu.dot_dimension_numbers<[1], [0], [0], [1], [0, 0, 1, 1], [], []>} : vector<8x128xf32>, vector<128x512xf32>, vector<8x512xf32> -> vector<8x512xf32>
    %cst_90 = arith.constant dense<0.000000e+00> : vector<8x512xf32>
    %298 = tpu.matmul %264, %14, %cst_90 {dimension_numbers = #tpu.dot_dimension_numbers<[1], [0], [0], [1], [0, 0, 1, 1], [], []>} : vector<8x128xf32>, vector<128x512xf32>, vector<8x512xf32> -> vector<8x512xf32>
    %299 = arith.addf %297, %298 : vector<8x512xf32>
    %300 = vector.broadcast %15 : vector<1x512xf32> to vector<8x512xf32>
    %301 = arith.addf %299, %300 : vector<8x512xf32>
    %302 = vector.extract_strided_slice %301 {offsets = [0, 0], sizes = [8, 128], strides = [1, 1]} : vector<8x512xf32> to vector<8x128xf32>
    %303 = arith.negf %302 : vector<8x128xf32>
    %304 = math.exp %303 : vector<8x128xf32>
    %cst_91 = arith.constant 1.000000e+00 : f32
    %305 = vector.broadcast %cst_91 : f32 to vector<8x128xf32>
    %306 = arith.addf %305, %304 : vector<8x128xf32>
    %307 = arith.divf %305, %306 : vector<8x128xf32>
    %308 = vector.extract_strided_slice %301 {offsets = [0, 128], sizes = [8, 128], strides = [1, 1]} : vector<8x512xf32> to vector<8x128xf32>
    %309 = arith.negf %308 : vector<8x128xf32>
    %310 = math.exp %309 : vector<8x128xf32>
    %cst_92 = arith.constant 1.000000e+00 : f32
    %311 = vector.broadcast %cst_92 : f32 to vector<8x128xf32>
    %312 = arith.addf %311, %310 : vector<8x128xf32>
    %313 = arith.divf %311, %312 : vector<8x128xf32>
    %314 = vector.extract_strided_slice %301 {offsets = [0, 256], sizes = [8, 128], strides = [1, 1]} : vector<8x512xf32> to vector<8x128xf32>
    %315 = math.tanh %314 : vector<8x128xf32>
    %316 = vector.extract_strided_slice %301 {offsets = [0, 384], sizes = [8, 128], strides = [1, 1]} : vector<8x512xf32> to vector<8x128xf32>
    %317 = arith.negf %316 : vector<8x128xf32>
    %318 = math.exp %317 : vector<8x128xf32>
    %cst_93 = arith.constant 1.000000e+00 : f32
    %319 = vector.broadcast %cst_93 : f32 to vector<8x128xf32>
    %320 = arith.addf %319, %318 : vector<8x128xf32>
    %321 = arith.divf %319, %320 : vector<8x128xf32>
    %322 = arith.mulf %313, %262 : vector<8x128xf32>
    %323 = arith.mulf %307, %315 : vector<8x128xf32>
    %324 = arith.addf %322, %323 : vector<8x128xf32>
    %325 = math.tanh %324 : vector<8x128xf32>
    %326 = arith.mulf %321, %325 : vector<8x128xf32>
    %c4_94 = arith.constant 4 : index
    %c0_95 = arith.constant 0 : index
    %c0_96 = arith.constant 0 : index
    %327 = vector.load %arg16[%c4_94, %c0_95, %c0_96] : memref<8x8x128xf32, #tpu.memory_space<vmem>>, vector<1x8x128xf32>
    %328 = vector.shape_cast %327 : vector<1x8x128xf32> to vector<8x128xf32>
    %329 = vector.shape_cast %326 : vector<8x128xf32> to vector<1x8x128xf32>
    tpu.vector_store %arg16[%c4_94, %c0_95, %c0_96], %329 {strides = array<i32>} : memref<8x8x128xf32, #tpu.memory_space<vmem>>, vector<1x8x128xf32>,
    %c5 = arith.constant 5 : index
    %c0_97 = arith.constant 0 : index
    %c0_98 = arith.constant 0 : index
    %330 = vector.load %arg15[%c5, %c0_97, %c0_98] : memref<8x8x512xf32, #tpu.memory_space<vmem>>, vector<1x8x512xf32>
    %331 = vector.shape_cast %330 : vector<1x8x512xf32> to vector<8x512xf32>
    %cst_99 = arith.constant dense<0.000000e+00> : vector<8x512xf32>
    %332 = tpu.matmul %296, %12, %cst_99 {dimension_numbers = #tpu.dot_dimension_numbers<[1], [0], [0], [1], [0, 0, 1, 1], [], []>} : vector<8x128xf32>, vector<128x512xf32>, vector<8x512xf32> -> vector<8x512xf32>
    %333 = arith.addf %331, %332 : vector<8x512xf32>
    %334 = vector.extract_strided_slice %333 {offsets = [0, 0], sizes = [8, 128], strides = [1, 1]} : vector<8x512xf32> to vector<8x128xf32>
    %335 = arith.negf %334 : vector<8x128xf32>
    %336 = math.exp %335 : vector<8x128xf32>
    %cst_100 = arith.constant 1.000000e+00 : f32
    %337 = vector.broadcast %cst_100 : f32 to vector<8x128xf32>
    %338 = arith.addf %337, %336 : vector<8x128xf32>
    %339 = arith.divf %337, %338 : vector<8x128xf32>
    %340 = vector.extract_strided_slice %333 {offsets = [0, 128], sizes = [8, 128], strides = [1, 1]} : vector<8x512xf32> to vector<8x128xf32>
    %341 = arith.negf %340 : vector<8x128xf32>
    %342 = math.exp %341 : vector<8x128xf32>
    %cst_101 = arith.constant 1.000000e+00 : f32
    %343 = vector.broadcast %cst_101 : f32 to vector<8x128xf32>
    %344 = arith.addf %343, %342 : vector<8x128xf32>
    %345 = arith.divf %343, %344 : vector<8x128xf32>
    %346 = vector.extract_strided_slice %333 {offsets = [0, 256], sizes = [8, 128], strides = [1, 1]} : vector<8x512xf32> to vector<8x128xf32>
    %347 = math.tanh %346 : vector<8x128xf32>
    %348 = vector.extract_strided_slice %333 {offsets = [0, 384], sizes = [8, 128], strides = [1, 1]} : vector<8x512xf32> to vector<8x128xf32>
    %349 = arith.negf %348 : vector<8x128xf32>
    %350 = math.exp %349 : vector<8x128xf32>
    %cst_102 = arith.constant 1.000000e+00 : f32
    %351 = vector.broadcast %cst_102 : f32 to vector<8x128xf32>
    %352 = arith.addf %351, %350 : vector<8x128xf32>
    %353 = arith.divf %351, %352 : vector<8x128xf32>
    %354 = arith.mulf %345, %294 : vector<8x128xf32>
    %355 = arith.mulf %339, %347 : vector<8x128xf32>
    %356 = arith.addf %354, %355 : vector<8x128xf32>
    %357 = math.tanh %356 : vector<8x128xf32>
    %358 = arith.mulf %353, %357 : vector<8x128xf32>
    %cst_103 = arith.constant dense<0.000000e+00> : vector<8x512xf32>
    %359 = tpu.matmul %358, %13, %cst_103 {dimension_numbers = #tpu.dot_dimension_numbers<[1], [0], [0], [1], [0, 0, 1, 1], [], []>} : vector<8x128xf32>, vector<128x512xf32>, vector<8x512xf32> -> vector<8x512xf32>
    %cst_104 = arith.constant dense<0.000000e+00> : vector<8x512xf32>
    %360 = tpu.matmul %326, %14, %cst_104 {dimension_numbers = #tpu.dot_dimension_numbers<[1], [0], [0], [1], [0, 0, 1, 1], [], []>} : vector<8x128xf32>, vector<128x512xf32>, vector<8x512xf32> -> vector<8x512xf32>
    %361 = arith.addf %359, %360 : vector<8x512xf32>
    %362 = vector.broadcast %15 : vector<1x512xf32> to vector<8x512xf32>
    %363 = arith.addf %361, %362 : vector<8x512xf32>
    %364 = vector.extract_strided_slice %363 {offsets = [0, 0], sizes = [8, 128], strides = [1, 1]} : vector<8x512xf32> to vector<8x128xf32>
    %365 = arith.negf %364 : vector<8x128xf32>
    %366 = math.exp %365 : vector<8x128xf32>
    %cst_105 = arith.constant 1.000000e+00 : f32
    %367 = vector.broadcast %cst_105 : f32 to vector<8x128xf32>
    %368 = arith.addf %367, %366 : vector<8x128xf32>
    %369 = arith.divf %367, %368 : vector<8x128xf32>
    %370 = vector.extract_strided_slice %363 {offsets = [0, 128], sizes = [8, 128], strides = [1, 1]} : vector<8x512xf32> to vector<8x128xf32>
    %371 = arith.negf %370 : vector<8x128xf32>
    %372 = math.exp %371 : vector<8x128xf32>
    %cst_106 = arith.constant 1.000000e+00 : f32
    %373 = vector.broadcast %cst_106 : f32 to vector<8x128xf32>
    %374 = arith.addf %373, %372 : vector<8x128xf32>
    %375 = arith.divf %373, %374 : vector<8x128xf32>
    %376 = vector.extract_strided_slice %363 {offsets = [0, 256], sizes = [8, 128], strides = [1, 1]} : vector<8x512xf32> to vector<8x128xf32>
    %377 = math.tanh %376 : vector<8x128xf32>
    %378 = vector.extract_strided_slice %363 {offsets = [0, 384], sizes = [8, 128], strides = [1, 1]} : vector<8x512xf32> to vector<8x128xf32>
    %379 = arith.negf %378 : vector<8x128xf32>
    %380 = math.exp %379 : vector<8x128xf32>
    %cst_107 = arith.constant 1.000000e+00 : f32
    %381 = vector.broadcast %cst_107 : f32 to vector<8x128xf32>
    %382 = arith.addf %381, %380 : vector<8x128xf32>
    %383 = arith.divf %381, %382 : vector<8x128xf32>
    %384 = arith.mulf %375, %324 : vector<8x128xf32>
    %385 = arith.mulf %369, %377 : vector<8x128xf32>
    %386 = arith.addf %384, %385 : vector<8x128xf32>
    %387 = math.tanh %386 : vector<8x128xf32>
    %388 = arith.mulf %383, %387 : vector<8x128xf32>
    %c5_108 = arith.constant 5 : index
    %c0_109 = arith.constant 0 : index
    %c0_110 = arith.constant 0 : index
    %389 = vector.load %arg16[%c5_108, %c0_109, %c0_110] : memref<8x8x128xf32, #tpu.memory_space<vmem>>, vector<1x8x128xf32>
    %390 = vector.shape_cast %389 : vector<1x8x128xf32> to vector<8x128xf32>
    %391 = vector.shape_cast %388 : vector<8x128xf32> to vector<1x8x128xf32>
    tpu.vector_store %arg16[%c5_108, %c0_109, %c0_110], %391 {strides = array<i32>} : memref<8x8x128xf32, #tpu.memory_space<vmem>>, vector<1x8x128xf32>,
    %c6 = arith.constant 6 : index
    %c0_111 = arith.constant 0 : index
    %c0_112 = arith.constant 0 : index
    %392 = vector.load %arg15[%c6, %c0_111, %c0_112] : memref<8x8x512xf32, #tpu.memory_space<vmem>>, vector<1x8x512xf32>
    %393 = vector.shape_cast %392 : vector<1x8x512xf32> to vector<8x512xf32>
    %cst_113 = arith.constant dense<0.000000e+00> : vector<8x512xf32>
    %394 = tpu.matmul %358, %12, %cst_113 {dimension_numbers = #tpu.dot_dimension_numbers<[1], [0], [0], [1], [0, 0, 1, 1], [], []>} : vector<8x128xf32>, vector<128x512xf32>, vector<8x512xf32> -> vector<8x512xf32>
    %395 = arith.addf %393, %394 : vector<8x512xf32>
    %396 = vector.extract_strided_slice %395 {offsets = [0, 0], sizes = [8, 128], strides = [1, 1]} : vector<8x512xf32> to vector<8x128xf32>
    %397 = arith.negf %396 : vector<8x128xf32>
    %398 = math.exp %397 : vector<8x128xf32>
    %cst_114 = arith.constant 1.000000e+00 : f32
    %399 = vector.broadcast %cst_114 : f32 to vector<8x128xf32>
    %400 = arith.addf %399, %398 : vector<8x128xf32>
    %401 = arith.divf %399, %400 : vector<8x128xf32>
    %402 = vector.extract_strided_slice %395 {offsets = [0, 128], sizes = [8, 128], strides = [1, 1]} : vector<8x512xf32> to vector<8x128xf32>
    %403 = arith.negf %402 : vector<8x128xf32>
    %404 = math.exp %403 : vector<8x128xf32>
    %cst_115 = arith.constant 1.000000e+00 : f32
    %405 = vector.broadcast %cst_115 : f32 to vector<8x128xf32>
    %406 = arith.addf %405, %404 : vector<8x128xf32>
    %407 = arith.divf %405, %406 : vector<8x128xf32>
    %408 = vector.extract_strided_slice %395 {offsets = [0, 256], sizes = [8, 128], strides = [1, 1]} : vector<8x512xf32> to vector<8x128xf32>
    %409 = math.tanh %408 : vector<8x128xf32>
    %410 = vector.extract_strided_slice %395 {offsets = [0, 384], sizes = [8, 128], strides = [1, 1]} : vector<8x512xf32> to vector<8x128xf32>
    %411 = arith.negf %410 : vector<8x128xf32>
    %412 = math.exp %411 : vector<8x128xf32>
    %cst_116 = arith.constant 1.000000e+00 : f32
    %413 = vector.broadcast %cst_116 : f32 to vector<8x128xf32>
    %414 = arith.addf %413, %412 : vector<8x128xf32>
    %415 = arith.divf %413, %414 : vector<8x128xf32>
    %416 = arith.mulf %407, %356 : vector<8x128xf32>
    %417 = arith.mulf %401, %409 : vector<8x128xf32>
    %418 = arith.addf %416, %417 : vector<8x128xf32>
    %419 = math.tanh %418 : vector<8x128xf32>
    %420 = arith.mulf %415, %419 : vector<8x128xf32>
    %cst_117 = arith.constant dense<0.000000e+00> : vector<8x512xf32>
    %421 = tpu.matmul %420, %13, %cst_117 {dimension_numbers = #tpu.dot_dimension_numbers<[1], [0], [0], [1], [0, 0, 1, 1], [], []>} : vector<8x128xf32>, vector<128x512xf32>, vector<8x512xf32> -> vector<8x512xf32>
    %cst_118 = arith.constant dense<0.000000e+00> : vector<8x512xf32>
    %422 = tpu.matmul %388, %14, %cst_118 {dimension_numbers = #tpu.dot_dimension_numbers<[1], [0], [0], [1], [0, 0, 1, 1], [], []>} : vector<8x128xf32>, vector<128x512xf32>, vector<8x512xf32> -> vector<8x512xf32>
    %423 = arith.addf %421, %422 : vector<8x512xf32>
    %424 = vector.broadcast %15 : vector<1x512xf32> to vector<8x512xf32>
    %425 = arith.addf %423, %424 : vector<8x512xf32>
    %426 = vector.extract_strided_slice %425 {offsets = [0, 0], sizes = [8, 128], strides = [1, 1]} : vector<8x512xf32> to vector<8x128xf32>
    %427 = arith.negf %426 : vector<8x128xf32>
    %428 = math.exp %427 : vector<8x128xf32>
    %cst_119 = arith.constant 1.000000e+00 : f32
    %429 = vector.broadcast %cst_119 : f32 to vector<8x128xf32>
    %430 = arith.addf %429, %428 : vector<8x128xf32>
    %431 = arith.divf %429, %430 : vector<8x128xf32>
    %432 = vector.extract_strided_slice %425 {offsets = [0, 128], sizes = [8, 128], strides = [1, 1]} : vector<8x512xf32> to vector<8x128xf32>
    %433 = arith.negf %432 : vector<8x128xf32>
    %434 = math.exp %433 : vector<8x128xf32>
    %cst_120 = arith.constant 1.000000e+00 : f32
    %435 = vector.broadcast %cst_120 : f32 to vector<8x128xf32>
    %436 = arith.addf %435, %434 : vector<8x128xf32>
    %437 = arith.divf %435, %436 : vector<8x128xf32>
    %438 = vector.extract_strided_slice %425 {offsets = [0, 256], sizes = [8, 128], strides = [1, 1]} : vector<8x512xf32> to vector<8x128xf32>
    %439 = math.tanh %438 : vector<8x128xf32>
    %440 = vector.extract_strided_slice %425 {offsets = [0, 384], sizes = [8, 128], strides = [1, 1]} : vector<8x512xf32> to vector<8x128xf32>
    %441 = arith.negf %440 : vector<8x128xf32>
    %442 = math.exp %441 : vector<8x128xf32>
    %cst_121 = arith.constant 1.000000e+00 : f32
    %443 = vector.broadcast %cst_121 : f32 to vector<8x128xf32>
    %444 = arith.addf %443, %442 : vector<8x128xf32>
    %445 = arith.divf %443, %444 : vector<8x128xf32>
    %446 = arith.mulf %437, %386 : vector<8x128xf32>
    %447 = arith.mulf %431, %439 : vector<8x128xf32>
    %448 = arith.addf %446, %447 : vector<8x128xf32>
    %449 = math.tanh %448 : vector<8x128xf32>
    %450 = arith.mulf %445, %449 : vector<8x128xf32>
    %c6_122 = arith.constant 6 : index
    %c0_123 = arith.constant 0 : index
    %c0_124 = arith.constant 0 : index
    %451 = vector.load %arg16[%c6_122, %c0_123, %c0_124] : memref<8x8x128xf32, #tpu.memory_space<vmem>>, vector<1x8x128xf32>
    %452 = vector.shape_cast %451 : vector<1x8x128xf32> to vector<8x128xf32>
    %453 = vector.shape_cast %450 : vector<8x128xf32> to vector<1x8x128xf32>
    tpu.vector_store %arg16[%c6_122, %c0_123, %c0_124], %453 {strides = array<i32>} : memref<8x8x128xf32, #tpu.memory_space<vmem>>, vector<1x8x128xf32>,
    %c7 = arith.constant 7 : index
    %c0_125 = arith.constant 0 : index
    %c0_126 = arith.constant 0 : index
    %454 = vector.load %arg15[%c7, %c0_125, %c0_126] : memref<8x8x512xf32, #tpu.memory_space<vmem>>, vector<1x8x512xf32>
    %455 = vector.shape_cast %454 : vector<1x8x512xf32> to vector<8x512xf32>
    %cst_127 = arith.constant dense<0.000000e+00> : vector<8x512xf32>
    %456 = tpu.matmul %420, %12, %cst_127 {dimension_numbers = #tpu.dot_dimension_numbers<[1], [0], [0], [1], [0, 0, 1, 1], [], []>} : vector<8x128xf32>, vector<128x512xf32>, vector<8x512xf32> -> vector<8x512xf32>
    %457 = arith.addf %455, %456 : vector<8x512xf32>
    %458 = vector.extract_strided_slice %457 {offsets = [0, 0], sizes = [8, 128], strides = [1, 1]} : vector<8x512xf32> to vector<8x128xf32>
    %459 = arith.negf %458 : vector<8x128xf32>
    %460 = math.exp %459 : vector<8x128xf32>
    %cst_128 = arith.constant 1.000000e+00 : f32
    %461 = vector.broadcast %cst_128 : f32 to vector<8x128xf32>
    %462 = arith.addf %461, %460 : vector<8x128xf32>
    %463 = arith.divf %461, %462 : vector<8x128xf32>
    %464 = vector.extract_strided_slice %457 {offsets = [0, 128], sizes = [8, 128], strides = [1, 1]} : vector<8x512xf32> to vector<8x128xf32>
    %465 = arith.negf %464 : vector<8x128xf32>
    %466 = math.exp %465 : vector<8x128xf32>
    %cst_129 = arith.constant 1.000000e+00 : f32
    %467 = vector.broadcast %cst_129 : f32 to vector<8x128xf32>
    %468 = arith.addf %467, %466 : vector<8x128xf32>
    %469 = arith.divf %467, %468 : vector<8x128xf32>
    %470 = vector.extract_strided_slice %457 {offsets = [0, 256], sizes = [8, 128], strides = [1, 1]} : vector<8x512xf32> to vector<8x128xf32>
    %471 = math.tanh %470 : vector<8x128xf32>
    %472 = vector.extract_strided_slice %457 {offsets = [0, 384], sizes = [8, 128], strides = [1, 1]} : vector<8x512xf32> to vector<8x128xf32>
    %473 = arith.negf %472 : vector<8x128xf32>
    %474 = math.exp %473 : vector<8x128xf32>
    %cst_130 = arith.constant 1.000000e+00 : f32
    %475 = vector.broadcast %cst_130 : f32 to vector<8x128xf32>
    %476 = arith.addf %475, %474 : vector<8x128xf32>
    %477 = arith.divf %475, %476 : vector<8x128xf32>
    %478 = arith.mulf %469, %418 : vector<8x128xf32>
    %479 = arith.mulf %463, %471 : vector<8x128xf32>
    %480 = arith.addf %478, %479 : vector<8x128xf32>
    %481 = math.tanh %480 : vector<8x128xf32>
    %482 = arith.mulf %477, %481 : vector<8x128xf32>
    %cst_131 = arith.constant dense<0.000000e+00> : vector<8x512xf32>
    %483 = tpu.matmul %482, %13, %cst_131 {dimension_numbers = #tpu.dot_dimension_numbers<[1], [0], [0], [1], [0, 0, 1, 1], [], []>} : vector<8x128xf32>, vector<128x512xf32>, vector<8x512xf32> -> vector<8x512xf32>
    %cst_132 = arith.constant dense<0.000000e+00> : vector<8x512xf32>
    %484 = tpu.matmul %450, %14, %cst_132 {dimension_numbers = #tpu.dot_dimension_numbers<[1], [0], [0], [1], [0, 0, 1, 1], [], []>} : vector<8x128xf32>, vector<128x512xf32>, vector<8x512xf32> -> vector<8x512xf32>
    %485 = arith.addf %483, %484 : vector<8x512xf32>
    %486 = vector.broadcast %15 : vector<1x512xf32> to vector<8x512xf32>
    %487 = arith.addf %485, %486 : vector<8x512xf32>
    %488 = vector.extract_strided_slice %487 {offsets = [0, 0], sizes = [8, 128], strides = [1, 1]} : vector<8x512xf32> to vector<8x128xf32>
    %489 = arith.negf %488 : vector<8x128xf32>
    %490 = math.exp %489 : vector<8x128xf32>
    %cst_133 = arith.constant 1.000000e+00 : f32
    %491 = vector.broadcast %cst_133 : f32 to vector<8x128xf32>
    %492 = arith.addf %491, %490 : vector<8x128xf32>
    %493 = arith.divf %491, %492 : vector<8x128xf32>
    %494 = vector.extract_strided_slice %487 {offsets = [0, 128], sizes = [8, 128], strides = [1, 1]} : vector<8x512xf32> to vector<8x128xf32>
    %495 = arith.negf %494 : vector<8x128xf32>
    %496 = math.exp %495 : vector<8x128xf32>
    %cst_134 = arith.constant 1.000000e+00 : f32
    %497 = vector.broadcast %cst_134 : f32 to vector<8x128xf32>
    %498 = arith.addf %497, %496 : vector<8x128xf32>
    %499 = arith.divf %497, %498 : vector<8x128xf32>
    %500 = vector.extract_strided_slice %487 {offsets = [0, 256], sizes = [8, 128], strides = [1, 1]} : vector<8x512xf32> to vector<8x128xf32>
    %501 = math.tanh %500 : vector<8x128xf32>
    %502 = vector.extract_strided_slice %487 {offsets = [0, 384], sizes = [8, 128], strides = [1, 1]} : vector<8x512xf32> to vector<8x128xf32>
    %503 = arith.negf %502 : vector<8x128xf32>
    %504 = math.exp %503 : vector<8x128xf32>
    %cst_135 = arith.constant 1.000000e+00 : f32
    %505 = vector.broadcast %cst_135 : f32 to vector<8x128xf32>
    %506 = arith.addf %505, %504 : vector<8x128xf32>
    %507 = arith.divf %505, %506 : vector<8x128xf32>
    %508 = arith.mulf %499, %448 : vector<8x128xf32>
    %509 = arith.mulf %493, %501 : vector<8x128xf32>
    %510 = arith.addf %508, %509 : vector<8x128xf32>
    %511 = math.tanh %510 : vector<8x128xf32>
    %512 = arith.mulf %507, %511 : vector<8x128xf32>
    %c7_136 = arith.constant 7 : index
    %c0_137 = arith.constant 0 : index
    %c0_138 = arith.constant 0 : index
    %513 = vector.load %arg16[%c7_136, %c0_137, %c0_138] : memref<8x8x128xf32, #tpu.memory_space<vmem>>, vector<1x8x128xf32>
    %514 = vector.shape_cast %513 : vector<1x8x128xf32> to vector<8x128xf32>
    %515 = vector.shape_cast %512 : vector<8x128xf32> to vector<1x8x128xf32>
    tpu.vector_store %arg16[%c7_136, %c0_137, %c0_138], %515 {strides = array<i32>} : memref<8x8x128xf32, #tpu.memory_space<vmem>>, vector<1x8x128xf32>,
    %c0_139 = arith.constant 0 : index
    %c0_140 = arith.constant 0 : index
    %516 = vector.load %arg11[%c0_139, %c0_140] : memref<8x128xf32, #tpu.memory_space<vmem>>, vector<8x128xf32>
    tpu.vector_store %arg11[%c0_139, %c0_140], %482 {strides = array<i32>} : memref<8x128xf32, #tpu.memory_space<vmem>>, vector<8x128xf32>,
    %c0_141 = arith.constant 0 : index
    %c0_142 = arith.constant 0 : index
    %517 = vector.load %arg12[%c0_141, %c0_142] : memref<8x128xf32, #tpu.memory_space<vmem>>, vector<8x128xf32>
    tpu.vector_store %arg12[%c0_141, %c0_142], %480 {strides = array<i32>} : memref<8x128xf32, #tpu.memory_space<vmem>>, vector<8x128xf32>,
    %c0_143 = arith.constant 0 : index
    %c0_144 = arith.constant 0 : index
    %518 = vector.load %arg13[%c0_143, %c0_144] : memref<8x128xf32, #tpu.memory_space<vmem>>, vector<8x128xf32>
    tpu.vector_store %arg13[%c0_143, %c0_144], %512 {strides = array<i32>} : memref<8x128xf32, #tpu.memory_space<vmem>>, vector<8x128xf32>,
    %c0_145 = arith.constant 0 : index
    %c0_146 = arith.constant 0 : index
    %519 = vector.load %arg14[%c0_145, %c0_146] : memref<8x128xf32, #tpu.memory_space<vmem>>, vector<8x128xf32>
    tpu.vector_store %arg14[%c0_145, %c0_146], %510 {strides = array<i32>} : memref<8x128xf32, #tpu.memory_space<vmem>>, vector<8x128xf32>,
    %c0_147 = arith.constant 0 : index
    %c0_148 = arith.constant 0 : index
    %c0_149 = arith.constant 0 : index
    %520 = vector.load %arg16[%c0_147, %c0_148, %c0_149] : memref<8x8x128xf32, #tpu.memory_space<vmem>>, vector<8x8x128xf32>
    %521 = vector.shape_cast %520 : vector<8x8x128xf32> to vector<64x128xf32>
    %c0_150 = arith.constant 0 : index
    %c0_151 = arith.constant 0 : index
    %522 = vector.load %arg8[%c0_150, %c0_151] : memref<128x128xf32, #tpu.memory_space<vmem>>, vector<128x128xf32>
    %cst_152 = arith.constant dense<0.000000e+00> : vector<64x128xf32>
    %523 = tpu.matmul %521, %522, %cst_152 {dimension_numbers = #tpu.dot_dimension_numbers<[1], [0], [0], [1], [0, 0, 1, 1], [], []>} : vector<64x128xf32>, vector<128x128xf32>, vector<64x128xf32> -> vector<64x128xf32>
    %c0_153 = arith.constant 0 : index
    %c0_154 = arith.constant 0 : index
    %524 = vector.load %arg9[%c0_153, %c0_154] : memref<1x128xf32, #tpu.memory_space<vmem>>, vector<1x128xf32>
    %525 = vector.broadcast %524 : vector<1x128xf32> to vector<64x128xf32>
    %526 = arith.addf %523, %525 : vector<64x128xf32>
    %527 = vector.shape_cast %526 : vector<64x128xf32> to vector<8x8x128xf32>
    %c0_155 = arith.constant 0 : index
    %c0_156 = arith.constant 0 : index
    %c0_157 = arith.constant 0 : index
    %528 = vector.load %arg10[%c0_155, %c0_156, %c0_157] : memref<8x8x128xf32, #tpu.memory_space<vmem>>, vector<8x8x128xf32>
    tpu.vector_store %arg10[%c0_155, %c0_156, %c0_157], %527 {strides = array<i32>} : memref<8x8x128xf32, #tpu.memory_space<vmem>>, vector<8x8x128xf32>,
    return
  }
  func.func @transform_0(%arg0: i32) -> (i32, i32, i32) {
    %c0_i32 = arith.constant 0 : i32
    %c0_i32_0 = arith.constant 0 : i32
    %c0_i32_1 = arith.constant 0 : i32
    return %arg0, %c0_i32, %c0_i32_0 : i32, i32, i32
  }
  func.func @transform_1(%arg0: i32) -> (i32, i32) {
    %c0_i32 = arith.constant 0 : i32
    %c0_i32_0 = arith.constant 0 : i32
    %c0_i32_1 = arith.constant 0 : i32
    return %c0_i32, %c0_i32_0 : i32, i32
  }
  func.func @transform_2(%arg0: i32) -> (i32, i32) {
    %c0_i32 = arith.constant 0 : i32
    %c0_i32_0 = arith.constant 0 : i32
    %c0_i32_1 = arith.constant 0 : i32
    return %c0_i32, %c0_i32_0 : i32, i32
  }
  func.func @transform_3(%arg0: i32) -> (i32, i32) {
    %c0_i32 = arith.constant 0 : i32
    %c0_i32_0 = arith.constant 0 : i32
    %c0_i32_1 = arith.constant 0 : i32
    return %c0_i32, %c0_i32_0 : i32, i32
  }
  func.func @transform_4(%arg0: i32) -> (i32, i32) {
    %c0_i32 = arith.constant 0 : i32
    %c0_i32_0 = arith.constant 0 : i32
    %c0_i32_1 = arith.constant 0 : i32
    return %c0_i32, %c0_i32_0 : i32, i32
  }
  func.func @transform_5(%arg0: i32) -> (i32, i32) {
    %c0_i32 = arith.constant 0 : i32
    %c0_i32_0 = arith.constant 0 : i32
    %c0_i32_1 = arith.constant 0 : i32
    return %c0_i32, %c0_i32_0 : i32, i32
  }
  func.func @transform_6(%arg0: i32) -> (i32, i32) {
    %c0_i32 = arith.constant 0 : i32
    %c0_i32_0 = arith.constant 0 : i32
    %c0_i32_1 = arith.constant 0 : i32
    return %c0_i32, %c0_i32_0 : i32, i32
  }
  func.func @transform_7(%arg0: i32) -> (i32, i32) {
    %c0_i32 = arith.constant 0 : i32
    %c0_i32_0 = arith.constant 0 : i32
    %c0_i32_1 = arith.constant 0 : i32
    return %c0_i32, %c0_i32_0 : i32, i32
  }
  func.func @transform_8(%arg0: i32) -> (i32, i32) {
    %c0_i32 = arith.constant 0 : i32
    %c0_i32_0 = arith.constant 0 : i32
    %c0_i32_1 = arith.constant 0 : i32
    return %c0_i32, %c0_i32_0 : i32, i32
  }
  func.func @transform_9(%arg0: i32) -> (i32, i32, i32) {
    %c0_i32 = arith.constant 0 : i32
    %c0_i32_0 = arith.constant 0 : i32
    %c0_i32_1 = arith.constant 0 : i32
    return %arg0, %c0_i32, %c0_i32_0 : i32, i32, i32
  }
}

</mosaic_0001>

<bundles_post_ra>
// kernel: shakespeare_forward.1
= control target key start
LH: loop header
LB: loop body
LE: loop exit
PB: predicated region body
PF: predicated region fallthrough
CT: control target
= control target key end

     0   :  { %s7156_s30 = smov 0   ;;  %s9123_s0 = inlined_call_operand.vmem [shape: f32[16,8,32], index: 0, kind: input, shape index: {}]   ;;  %s9124_s1 = inlined_call_operand.vmem [shape: f32[32,512], index: 1, kind: input, shape index: {}]   ;;  %s9125_s2 = inlined_call_operand.vmem [shape: f32[128,512], index: 2, kind: input, shape index: {}]   ;;  %s9126_s3 = inlined_call_operand.vmem [shape: f32[1,512], index: 3, kind: input, shape index: {}]   ;;  %s9127_s4 = inlined_call_operand.vmem [shape: f32[128,512], index: 4, kind: input, shape index: {}]   ;;  %s9128_s5 = inlined_call_operand.vmem [shape: f32[128,512], index: 5, kind: input, shape index: {}]   ;;  %s9129_s6 = inlined_call_operand.vmem [shape: f32[1,512], index: 6, kind: input, shape index: {}]   ;;  %s9130_s7 = inlined_call_operand.vmem [shape: f32[128,128], index: 7, kind: input, shape index: {}]   ;;  %s9131_s8 = inlined_call_operand.vmem [shape: f32[1,128], index: 8, kind: input, shape index: {}]   ;;  %s9132_s9 = inlined_call_operand.vmem [shape: f32[16,8,128], index: 9, kind: output, shape index: {}]  }
   0x1 LB: > { %s5005_s10 = sadd.s32 4294967295, %s7102_s30   ;;  %p5009_p0 = scmp.ge.s32.totalorder %s7102_s30, 1  ;;  %s7102_s30 = sphi %s7156_s30, %s19_s30  }
   0x2   : > { %p288_p1 = scmp.lt.s32.totalorder %s7102_s30, 3 }
   0x4   : > { %p289_p2 = pnand %p5009_p0, %p288_p1 }
   0x6   : > { %292 = sbr.rel (%p289_p2) target bundleno = 2845 (0xb1d), region = 56 }
   0xd   : > { %s5010_s11 = sshll.u32 %s5005_s10, 3  ;;  %p5014_p4 = scmp.ne.s32.totalorder %s5005_s10, 0 }
   0xe   : > { %p325_p3 = scmp.lt.s32.totalorder %s5010_s11, 15  ;;  %v7104_v0 = vmov (!%p5014_p4), 0.0  }
   0xf   : > { %339 = sbr.rel (%p5014_p4) target bundleno = 22 (0x16), region = 60  ;;  %340 = vst [vmem:[#allocation2] sm:$0xff] (!%p5014_p4), %v7104_v0  ;;  %341 = vst [vmem:[#allocation3] sm:$0xff] (!%p5014_p4), %v7104_v0 }
  0x10   : > { %s9824_s11 = smov (!%p325_p3, %s5010_s11), 15  ;;  %342 = vst [vmem:[#allocation4] sm:$0xff] (!%p5014_p4), %v7104_v0  ;;  %343 = vst [vmem:[#allocation5] sm:$0xff] (!%p5014_p4), %v7104_v0 }
  0x11   : > { %s5011_s12 = sshll.u32 %s9824_s11, 3 }
  0x12   : > { %s7167_s15 = scalar_lea.vmem %s9123_s0, %s5011_s12  ;;  %s7172_s18 = scalar_lea.vmem %s9132_s9, %s5011_s12 }
  0x16 PF: > { %v355_v1 = vld [vmem:[%s9124_s1 + $0x18] sm:$0xff]  ;;  %v354_v3 = vld [vmem:[%s9124_s1 + $0x10] sm:$0xff]  ;;  %v9133_v8 = vmov 0.0   ;;  %v674_v13 = vld [vmem:[%s9125_s2 + $0x8] sm:$0xff]  ;;  %vm390_vm0 = vcmask 261120  }
  0x17   : > { %v359_v2 = vld [vmem:[%s9124_s1 + $0x38] sm:$0xff]  ;;  %v358_v5 = vld [vmem:[%s9124_s1 + $0x30] sm:$0xff]  ;;  %592 = vmatprep.mubr.f32.mxu1 %v9133_v8  ;;  %479 = vmatprep.mubr.f32.mxu0 %v9133_v8  ;;  %v678_v14 = vld [vmem:[%s9125_s2 + $0x28] sm:$0xff] }
  0x18   : > { %v5158_v4 = vpack.c.bf16 %v359_v2, %v355_v1  ;;  %v363_v6 = vld [vmem:[%s9124_s1 + $0x58] sm:$0xff]  ;;  %v5160_v9 = vpack.c.bf16 %v358_v5, %v354_v3  ;;  %v362_v11 = vld [vmem:[%s9124_s1 + $0x50] sm:$0xff]  ;;  %v7206_v16 = vpack.c.bf16 %v678_v14, %v674_v13  ;;  %v673_v17 = vld [vmem:[%s9125_s2] sm:$0xff] }
  0x19   : > { %v367_v7 = vld [vmem:[%s9124_s1 + $0x78] sm:$0xff]  ;;  %v366_v12 = vld [vmem:[%s9124_s1 + $0x70] sm:$0xff]  ;;  %v677_v18 = vld [vmem:[%s9125_s2 + $0x20] sm:$0xff] }
  0x1a   : > { %v5162_v10 = vpack.c.bf16 %v367_v7, %v363_v6  ;;  %5159 = vmatprep.subr.bf16.mxu1 %v5158_v4  ;;  %v5164_v15 = vpack.c.bf16 %v366_v12, %v362_v11  ;;  %9336 = vst [vmem:[#allocation8_spill] sm:$0xff] %v7206_v16  ;;  %v682_v19 = vld [vmem:[%s9125_s2 + $0x48] sm:$0xff]  ;;  %v7221_v21 = vld [vmem:[%s7167_s15] sm:$0xff]  ;;  %v7223_v22 = vpack.c.bf16 %v677_v18, %v673_v17  ;;  %v7279_v41 = vld [vmem:[%s7167_s15 + $0x10] sm:$0xff] }
  0x1b   : > { %5161 = vmatpush1.bf16.msra.mxu1 %v5160_v9  ;;  %v686_v20 = vld [vmem:[%s9125_s2 + $0x68] sm:$0xff]  ;;  %v681_v24 = vld [vmem:[%s9125_s2 + $0x40] sm:$0xff]  ;;  %v347_v54 = vld [vmem:[%s7167_s15 + $0x18] sm:$0xff] }
  0x1c   : > { %5163 = vmatprep.subr.bf16.mxu1 %v5162_v10  ;;  %v7226_v23 = vpack.c.bf16 %v686_v20, %v682_v19  ;;  %v685_v25 = vld [vmem:[%s9125_s2 + $0x60] sm:$0xff]  ;;  %v690_v26 = vld [vmem:[%s9125_s2 + $0x88] sm:$0xff]  ;;  %v350_v12 = vld [vmem:[%s7167_s15 + $0x30] sm:$0xff] }
  0x1d   : > { %v694_v27 = vld [vmem:[%s9125_s2 + $0xa8] sm:$0xff]  ;;  %v7247_v29 = vpack.c.bf16 %v685_v25, %v681_v24  ;;  %v689_v30 = vld [vmem:[%s9125_s2 + $0x80] sm:$0xff]  ;;  %v676_v18 = vld [vmem:[%s9125_s2 + $0x18] sm:$0xff] }
  0x1e   : > { %v7243_v28 = vld [vmem:[%s7167_s15 + $0x8] sm:$0xff]  ;;  %v693_v31 = vld [vmem:[%s9125_s2 + $0xa0] sm:$0xff]  ;;  %v7259_v33 = vpack.c.bf16 %v694_v27, %v690_v26  ;;  %v680_v19 = vld [vmem:[%s9125_s2 + $0x38] sm:$0xff] }
  0x1f   : > { %5165 = vmatpush1.bf16.msra.mxu1 %v5164_v15  ;;  %v353_v32 = vld [vmem:[%s9124_s1 + $0x8] sm:$0xff]  ;;  %v352_v35 = vld [vmem:[%s9124_s1] sm:$0xff]  ;;  %v7286_v43 = vpack.c.bf16 %v693_v31, %v689_v30  ;;  %v351_v20 = vld [vmem:[%s7167_s15 + $0x38] sm:$0xff]  ;;  %v7413_v24 = vpack.c.bf16 %v680_v19, %v676_v18 }
  0x20   : > { %5167 = vmatprep.subr.bf16.mxu1 %v7206_v16  ;;  %9337 = vst [vmem:[#allocation9_spill] sm:$0xff] %v7259_v33  ;;  %v357_v34 = vld [vmem:[%s9124_s1 + $0x28] sm:$0xff]  ;;  %v356_v36 = vld [vmem:[%s9124_s1 + $0x20] sm:$0xff]  ;;  %v675_v25 = vld [vmem:[%s9125_s2 + $0x10] sm:$0xff] }
  0x21   : > { %v698_v37 = vld [vmem:[%s9125_s2 + $0xc8] sm:$0xff]  ;;  %v5150_v39 = vpack.c.bf16 %v357_v34, %v353_v32  ;;  %v5152_v40 = vpack.c.bf16 %v356_v36, %v352_v35  ;;  %9338 = vst [vmem:[#allocation10_spill] sm:$0xff] %v7286_v43  ;;  %v360_v45 = vld [vmem:[%s9124_s1 + $0x40] sm:$0xff]  ;;  %9349 = vst [vmem:[#allocation21_spill] sm:$0xff] %v7413_v24 }
  0x22   : > { %5023 = vmatmul.mubr.msk.f32.vlgmr.msra.gmra.mrb[0].mxu1 %vm390_vm0, %v7221_v21  ;;  %v702_v38 = vld [vmem:[%s9125_s2 + $0xe8] sm:$0xff]  ;;  %v364_v46 = vld [vmem:[%s9124_s1 + $0x60] sm:$0xff]  ;;  %v679_v26 = vld [vmem:[%s9125_s2 + $0x30] sm:$0xff] }
  0x23   : > { %5169 = vmatpush1.bf16.msra.mxu1 %v7223_v22  ;;  %598 = vmatprep.mubr.f32.mxu1 %v9133_v8  ;;  %v361_v42 = vld [vmem:[%s9124_s1 + $0x48] sm:$0xff]  ;;  %v7298_v47 = vpack.c.bf16 %v702_v38, %v698_v37  ;;  %v697_v48 = vld [vmem:[%s9125_s2 + $0xc0] sm:$0xff]  ;;  %v5156_v53 = vpack.c.bf16 %v364_v46, %v360_v45  ;;  %v684_v27 = vld [vmem:[%s9125_s2 + $0x58] sm:$0xff]  ;;  %v7434_v31 = vpack.c.bf16 %v679_v26, %v675_v25 }
  0x24   : > { %5171 = vmatprep.subr.bf16.mxu1 %v7226_v23  ;;  %v365_v44 = vld [vmem:[%s9124_s1 + $0x68] sm:$0xff]  ;;  %v701_v49 = vld [vmem:[%s9125_s2 + $0xe0] sm:$0xff]  ;;  %5151 = vmatprep.subr.bf16.mxu0 %v5150_v39  ;;  %v683_v34 = vld [vmem:[%s9125_s2 + $0x50] sm:$0xff] }
  0x25   : > { %9339 = vst [vmem:[#allocation11_spill] sm:$0xff] %v7298_v47  ;;  %v5154_v50 = vpack.c.bf16 %v365_v44, %v361_v42  ;;  %v706_v51 = vld [vmem:[%s9125_s2 + $0x108] sm:$0xff]  ;;  %5153 = vmatpush1.bf16.msra.mxu0 %v5152_v40  ;;  %v7317_v55 = vpack.c.bf16 %v701_v49, %v697_v48  ;;  %v705_v57 = vld [vmem:[%s9125_s2 + $0x100] sm:$0xff]  ;;  %v687_v35 = vld [vmem:[%s9125_s2 + $0x70] sm:$0xff] }
  0x26   : > { %5024 = vmatmul.mubr.msk.f32.gmra.mrb[2].mxu1 %vm390_vm0, %v7243_v28  ;;  %v710_v52 = vld [vmem:[%s9125_s2 + $0x128] sm:$0xff]  ;;  %v709_v58 = vld [vmem:[%s9125_s2 + $0x120] sm:$0xff]  ;;  %v692_v36 = vld [vmem:[%s9125_s2 + $0x98] sm:$0xff]  ;;  %v7455_v38 = vpack.c.bf16 %v687_v35, %v683_v34 }
  0x27   : > { %5173 = vmatpush1.bf16.msra.mxu1 %v7247_v29  ;;  %604 = vmatprep.mubr.f32.mxu1 %v9133_v8  ;;  %9340 = vst [vmem:[#allocation12_spill] sm:$0xff] %v7317_v55  ;;  %v7320_v56 = vpack.c.bf16 %v710_v52, %v706_v51  ;;  %v714_v59 = vld [vmem:[%s9125_s2 + $0x148] sm:$0xff]  ;;  %v348_v61 = vld [vmem:[%s7167_s15 + $0x20] sm:$0xff]  ;;  %v7338_v62 = vpack.c.bf16 %v709_v58, %v705_v57  ;;  %v696_v37 = vld [vmem:[%s9125_s2 + $0xb8] sm:$0xff] }
  0x28   : > { %5175 = vmatprep.subr.bf16.mxu1 %v7259_v33  ;;  %5155 = vmatprep.subr.bf16.mxu0 %v5154_v50  ;;  %v718_v60 = vld [vmem:[%s9125_s2 + $0x168] sm:$0xff]  ;;  %v713_v0 = vld [vmem:[%s9125_s2 + $0x140] sm:$0xff]  ;;  %v7459_v39 = vpack.c.bf16 %v696_v37, %v692_v36  ;;  %v691_v40 = vld [vmem:[%s9125_s2 + $0x90] sm:$0xff] }
  0x29   : > { %9341 = vst [vmem:[#allocation13_spill] sm:$0xff] %v7320_v56  ;;  %5157 = vmatpush1.bf16.msra.mxu0 %v5156_v53  ;;  %9342 = vst [vmem:[#allocation14_spill] sm:$0xff] %v7338_v62  ;;  %v7341_v63 = vpack.c.bf16 %v718_v60, %v714_v59  ;;  %v717_v1 = vld [vmem:[%s9125_s2 + $0x160] sm:$0xff]  ;;  %v722_v2 = vld [vmem:[%s9125_s2 + $0x188] sm:$0xff] }
  0x2a   : > { %5025 = vmatmul.mubr.msk.f32.gmra.mrb[4].mxu1 %vm390_vm0, %v7279_v41  ;;  %v726_v3 = vld [vmem:[%s9125_s2 + $0x1a8] sm:$0xff]  ;;  %v7362_v5 = vpack.c.bf16 %v717_v1, %v713_v0  ;;  %v721_v7 = vld [vmem:[%s9125_s2 + $0x180] sm:$0xff]  ;;  %9350 = vst [vmem:[#allocation22_spill] sm:$0xff] %v7459_v39  ;;  %v700_v42 = vld [vmem:[%s9125_s2 + $0xd8] sm:$0xff] }
  0x2b   : > { %5177 = vmatpush1.bf16.msra.mxu1 %v7286_v43  ;;  %610 = vmatprep.mubr.f32.mxu1 %v9133_v8  ;;  %9343 = vst [vmem:[#allocation15_spill] sm:$0xff] %v7341_v63  ;;  %v349_v4 = vld [vmem:[%s7167_s15 + $0x28] sm:$0xff]  ;;  %v7365_v6 = vpack.c.bf16 %v726_v3, %v722_v2  ;;  %v725_v9 = vld [vmem:[%s9125_s2 + $0x1a0] sm:$0xff]  ;;  %v704_v44 = vld [vmem:[%s9125_s2 + $0xf8] sm:$0xff] }
  0x2c   : > { %5179 = vmatprep.subr.bf16.mxu1 %v7298_v47  ;;  %5015 = vmatmul.mubr.msk.f32.vlgmr.msra.gmra.mrb[0].mxu0 %vm390_vm0, %v7221_v21  ;;  %9344 = vst [vmem:[#allocation16_spill] sm:$0xff] %v7362_v5  ;;  %v730_v10 = vld [vmem:[%s9125_s2 + $0x1c8] sm:$0xff]  ;;  %v7386_v13 = vpack.c.bf16 %v725_v9, %v721_v7  ;;  %v729_v15 = vld [vmem:[%s9125_s2 + $0x1c0] sm:$0xff]  ;;  %v7479_v46 = vpack.c.bf16 %v704_v44, %v700_v42  ;;  %v699_v48 = vld [vmem:[%s9125_s2 + $0xd0] sm:$0xff] }
  0x2d   : > { %485 = vmatprep.mubr.f32.mxu0 %v9133_v8  ;;  %9345 = vst [vmem:[#allocation17_spill] sm:$0xff] %v7365_v6  ;;  %v734_v11 = vld [vmem:[%s9125_s2 + $0x1e8] sm:$0xff]  ;;  %v733_v17 = vld [vmem:[%s9125_s2 + $0x1e0] sm:$0xff]  ;;  %v703_v49 = vld [vmem:[%s9125_s2 + $0xf0] sm:$0xff] }
  0x2e   : > { %5026 = vmatmul.mubr.msk.f32.gmra.mrb[6].mxu1 %vm390_vm0, %v347_v54  ;;  %9346 = vst [vmem:[#allocation18_spill] sm:$0xff] %v7386_v13  ;;  %v7389_v14 = vpack.c.bf16 %v734_v11, %v730_v10  ;;  %v7410_v21 = vpack.c.bf16 %v733_v17, %v729_v15  ;;  %v7432_v30 = vld [vmem:[#allocation2] sm:$0xff]  ;;  %9352 = vst [vmem:[#allocation24_spill] sm:$0xff] %v7479_v46  ;;  %v708_v50 = vld [vmem:[%s9125_s2 + $0x118] sm:$0xff]  ;;  %v7496_v52 = vpack.c.bf16 %v703_v49, %v699_v48 }
  0x2f   : > { %5181 = vmatpush1.bf16.msra.mxu1 %v7317_v55  ;;  %616 = vmatprep.mubr.f32.mxu1 %v9133_v8  ;;  %v712_v51 = vld [vmem:[%s9125_s2 + $0x138] sm:$0xff]  ;;  %v711_v57 = vld [vmem:[%s9125_s2 + $0x130] sm:$0xff]  ;;  %v802_v25 = vld [vmem:[%s9128_s5 + $0x8] sm:$0xff] }
  0x30   : > { %5183 = vmatprep.subr.bf16.mxu1 %v7320_v56  ;;  %5016 = vmatmul.mubr.msk.f32.gmra.mrb[2].mxu0 %vm390_vm0, %v7243_v28  ;;  %9347 = vst [vmem:[#allocation19_spill] sm:$0xff] %v7389_v14  ;;  %9348 = vst [vmem:[#allocation20_spill] sm:$0xff] %v7410_v21  ;;  %v688_v28 = vld [vmem:[%s9125_s2 + $0x78] sm:$0xff]  ;;  %v7499_v53 = vpack.c.bf16 %v712_v51, %v708_v50  ;;  %v715_v0 = vld [vmem:[%s9125_s2 + $0x150] sm:$0xff] }
  0x31   : > { %491 = vmatprep.mubr.f32.mxu0 %v9133_v8  ;;  %v7437_v32 = vpack.c.bf16 %v688_v28, %v684_v27  ;;  %9353 = vst [vmem:[#allocation25_spill] sm:$0xff] %v7496_v52  ;;  %v716_v58 = vld [vmem:[%s9125_s2 + $0x158] sm:$0xff]  ;;  %v719_v1 = vld [vmem:[%s9125_s2 + $0x170] sm:$0xff]  ;;  %v806_v26 = vld [vmem:[%s9128_s5 + $0x28] sm:$0xff] }
  0x32   : > { %5027 = vmatmul.mubr.msk.f32.gmra.mrb[8].mxu1 %vm390_vm0, %v348_v61  ;;  %9354 = vst [vmem:[#allocation26_spill] sm:$0xff] %v7499_v53  ;;  %v720_v59 = vld [vmem:[%s9125_s2 + $0x178] sm:$0xff]  ;;  %v723_v9 = vld [vmem:[%s9125_s2 + $0x190] sm:$0xff]  ;;  %v7579_v28 = vpack.c.bf16 %v806_v26, %v802_v25  ;;  %v801_v35 = vld [vmem:[%s9128_s5] sm:$0xff] }
  0x33   : > { %5185 = vmatpush1.bf16.msra.mxu1 %v7338_v62  ;;  %622 = vmatprep.mubr.f32.mxu1 %v9133_v8  ;;  %v724_v2 = vld [vmem:[%s9125_s2 + $0x198] sm:$0xff]  ;;  %v727_v10 = vld [vmem:[%s9125_s2 + $0x1b0] sm:$0xff]  ;;  %v805_v36 = vld [vmem:[%s9128_s5 + $0x20] sm:$0xff] }
  0x34   : > { %5187 = vmatprep.subr.bf16.mxu1 %v7341_v63  ;;  %5017 = vmatmul.mubr.msk.f32.gmra.mrb[4].mxu0 %vm390_vm0, %v7279_v41  ;;  %v695_v41 = vld [vmem:[%s9125_s2 + $0xb0] sm:$0xff]  ;;  %v728_v3 = vld [vmem:[%s9125_s2 + $0x1b8] sm:$0xff]  ;;  %v7552_v15 = vpack.c.bf16 %v727_v10, %v723_v9  ;;  %9362 = vst [vmem:[#allocation34_spill] sm:$0xff] %v7579_v28  ;;  %v810_v44 = vld [vmem:[%s9128_s5 + $0x48] sm:$0xff] }
  0x35   : > { %497 = vmatprep.mubr.f32.mxu0 %v9133_v8  ;;  %v7476_v45 = vpack.c.bf16 %v695_v41, %v691_v40  ;;  %v7537_v7 = vpack.c.bf16 %v728_v3, %v724_v2  ;;  %v732_v11 = vld [vmem:[%s9125_s2 + $0x1d8] sm:$0xff]  ;;  %v731_v18 = vld [vmem:[%s9125_s2 + $0x1d0] sm:$0xff]  ;;  %5231 = vmatprep.subr.bf16.mxu0 %v7579_v28  ;;  %v7597_v40 = vpack.c.bf16 %v805_v36, %v801_v35  ;;  %v814_v48 = vld [vmem:[%s9128_s5 + $0x68] sm:$0xff] }
  0x36   : > { %5028 = vmatmul.mubr.msk.f32.gmra.mrb[10].mxu1 %vm390_vm0, %v349_v4  ;;  %9359 = vst [vmem:[#allocation31_spill] sm:$0xff] %v7552_v15  ;;  %v735_v19 = vld [vmem:[%s9125_s2 + $0x1f0] sm:$0xff]  ;;  %v804_v27 = vld [vmem:[%s9128_s5 + $0x18] sm:$0xff]  ;;  %v7615_v50 = vpack.c.bf16 %v814_v48, %v810_v44  ;;  %v818_v3 = vld [vmem:[%s9128_s5 + $0x88] sm:$0xff] }
  0x37   : > { %5189 = vmatpush1.bf16.msra.mxu1 %v7362_v5  ;;  %628 = vmatprep.mubr.f32.mxu1 %v9133_v8  ;;  %9351 = vst [vmem:[#allocation23_spill] sm:$0xff] %v7476_v45  ;;  %9358 = vst [vmem:[#allocation30_spill] sm:$0xff] %v7537_v7  ;;  %v803_v37 = vld [vmem:[%s9128_s5 + $0x10] sm:$0xff]  ;;  %v812_v49 = vld [vmem:[%s9128_s5 + $0x58] sm:$0xff] }
  0x38   : > { %5191 = vmatprep.subr.bf16.mxu1 %v7365_v6  ;;  %5018 = vmatmul.mubr.msk.f32.gmra.mrb[6].mxu0 %vm390_vm0, %v347_v54  ;;  %v707_v54 = vld [vmem:[%s9125_s2 + $0x110] sm:$0xff]  ;;  %9364 = vst [vmem:[#allocation36_spill] sm:$0xff] %v7597_v40  ;;  %9366 = vst [vmem:[#allocation38_spill] sm:$0xff] %v7615_v50  ;;  %v816_v51 = vld [vmem:[%s9128_s5 + $0x78] sm:$0xff] }
  0x39   : > { %503 = vmatprep.mubr.f32.mxu0 %v9133_v8  ;;  %v7516_v60 = vpack.c.bf16 %v711_v57, %v707_v54  ;;  %v807_v41 = vld [vmem:[%s9128_s5 + $0x30] sm:$0xff]  ;;  %5233 = vmatpush1.bf16.msra.mxu0 %v7597_v40  ;;  %v809_v54 = vld [vmem:[%s9128_s5 + $0x40] sm:$0xff]  ;;  %v822_v9 = vld [vmem:[%s9128_s5 + $0xa8] sm:$0xff] }
  0x3a   : > { %5029 = vmatmul.mubr.msk.f32.gmra.mrb[12].mxu1 %vm390_vm0, %v350_v12  ;;  %v7602_v42 = vpack.c.bf16 %v807_v41, %v803_v37  ;;  %v813_v57 = vld [vmem:[%s9128_s5 + $0x60] sm:$0xff]  ;;  %5235 = vmatprep.subr.bf16.mxu0 %v7615_v50  ;;  %v820_v10 = vld [vmem:[%s9128_s5 + $0x98] sm:$0xff]  ;;  %v826_v36 = vld [vmem:[%s9128_s5 + $0xc8] sm:$0xff] }
  0x3b   : > { %5193 = vmatpush1.bf16.msra.mxu1 %v7386_v13  ;;  %634 = vmatprep.mubr.f32.mxu1 %v9133_v8  ;;  %9355 = vst [vmem:[#allocation27_spill] sm:$0xff] %v7516_v60  ;;  %v830_v37 = vld [vmem:[%s9128_s5 + $0xe8] sm:$0xff]  ;;  %v828_v41 = vld [vmem:[%s9128_s5 + $0xd8] sm:$0xff] }
  0x3c   : > { %5195 = vmatprep.subr.bf16.mxu1 %v7389_v14  ;;  %5019 = vmatmul.mubr.msk.f32.gmra.mrb[8].mxu0 %vm390_vm0, %v348_v61  ;;  %v7519_v61 = vpack.c.bf16 %v720_v59, %v716_v58  ;;  %9365 = vst [vmem:[#allocation37_spill] sm:$0xff] %v7602_v42  ;;  %v7626_v58 = vpack.c.bf16 %v816_v51, %v812_v49  ;;  %v832_v48 = vld [vmem:[%s9128_s5 + $0xf8] sm:$0xff]  ;;  %v825_v49 = vld [vmem:[%s9128_s5 + $0xc0] sm:$0xff] }
  0x3d   : > { %509 = vmatprep.mubr.f32.mxu0 %v9133_v8  ;;  %v7628_v59 = vpack.c.bf16 %v813_v57, %v809_v54  ;;  %v7687_v44 = vpack.c.bf16 %v830_v37, %v826_v36  ;;  %v829_v51 = vld [vmem:[%s9128_s5 + $0xe0] sm:$0xff]  ;;  %v7698_v54 = vpack.c.bf16 %v832_v48, %v828_v41  ;;  %v835_v41 = vld [vmem:[%s9128_s5 + $0x110] sm:$0xff] }
  0x3e   : > { %5030 = vmatmul.mubr.msk.f32.gmra.mrb[14].mxu1 %vm390_vm0, %v351_v20  ;;  %9356 = vst [vmem:[#allocation28_spill] sm:$0xff] %v7519_v61  ;;  %9367 = vst [vmem:[#allocation39_spill] sm:$0xff] %v7626_v58  ;;  %v7700_v57 = vpack.c.bf16 %v829_v51, %v825_v49  ;;  %v839_v48 = vld [vmem:[%s9128_s5 + $0x130] sm:$0xff]  ;;  %v842_v51 = vld [vmem:[%s9128_s5 + $0x148] sm:$0xff] }
  0x3f   : > { %5197 = vmatpush1.bf16.msra.mxu1 %v7410_v21  ;;  %938 = vmatprep.mubr.f32.mxu1 %v9133_v8  ;;  %9368 = vst [vmem:[#allocation40_spill] sm:$0xff] %v7628_v59  ;;  %9374 = vst [vmem:[#allocation46_spill] sm:$0xff] %v7687_v44  ;;  %v7745_v49 = vpack.c.bf16 %v839_v48, %v835_v41  ;;  %v843_v41 = vld [vmem:[%s9128_s5 + $0x150] sm:$0xff] }
  0x40   : > { %5199 = vmatprep.subr.bf16.mxu1 %v7413_v24  ;;  %5020 = vmatmul.mubr.msk.f32.gmra.mrb[10].mxu0 %vm390_vm0, %v349_v4  ;;  %v7534_v4 = vpack.c.bf16 %v719_v1, %v715_v0  ;;  %v811_v0 = vld [vmem:[%s9128_s5 + $0x50] sm:$0xff]  ;;  %9375 = vst [vmem:[#allocation47_spill] sm:$0xff] %v7698_v54  ;;  %9376 = vst [vmem:[#allocation48_spill] sm:$0xff] %v7700_v57 }
  0x41   : > { %515 = vmatprep.mubr.f32.mxu0 %v9133_v8  ;;  %v815_v1 = vld [vmem:[%s9128_s5 + $0x70] sm:$0xff]  ;;  %5237 = vmatpush1.bf16.msra.mxu0 %v7628_v59  ;;  %9381 = vst [vmem:[#allocation53_spill] sm:$0xff] %v7745_v49 }
  0x42   : > { %939 = vmatmul.mubr.f32.vlgmr.msra.gmra.mrb[16].mxu1 %v7432_v30  ;;  %9357 = vst [vmem:[#allocation29_spill] sm:$0xff] %v7534_v4  ;;  %v7637_v2 = vpack.c.bf16 %v815_v1, %v811_v0  ;;  %v827_v0 = vld [vmem:[%s9128_s5 + $0xd0] sm:$0xff] }
  0x43   : > { %5201 = vmatpush1.bf16.msra.mxu1 %v7434_v31  ;;  %1009 = vmatprep.mubr.f32.mxu1 %v9133_v8  ;;  %v831_v1 = vld [vmem:[%s9128_s5 + $0xf0] sm:$0xff] }
  0x44   : > { %5203 = vmatprep.subr.bf16.mxu1 %v7437_v32  ;;  %5021 = vmatmul.mubr.msk.f32.gmra.mrb[12].mxu0 %vm390_vm0, %v350_v12  ;;  %v736_v12 = vld [vmem:[%s9125_s2 + $0x1f8] sm:$0xff]  ;;  %9369 = vst [vmem:[#allocation41_spill] sm:$0xff] %v7637_v2  ;;  %v847_v48 = vld [vmem:[%s9128_s5 + $0x170] sm:$0xff] }
  0x45   : > { %521 = vmatprep.mubr.f32.mxu0 %v9133_v8  ;;  %v7555_v17 = vpack.c.bf16 %v736_v12, %v732_v11  ;;  %v7651_v11 = vpack.c.bf16 %v822_v9, %v818_v3  ;;  %v824_v12 = vld [vmem:[%s9128_s5 + $0xb8] sm:$0xff]  ;;  %v7709_v3 = vpack.c.bf16 %v831_v1, %v827_v0  ;;  %v834_v9 = vld [vmem:[%s9128_s5 + $0x108] sm:$0xff] }
  0x46   : > { %v7662_v25 = vpack.c.bf16 %v824_v12, %v820_v10  ;;  %v838_v10 = vld [vmem:[%s9128_s5 + $0x128] sm:$0xff]  ;;  %v836_v12 = vld [vmem:[%s9128_s5 + $0x118] sm:$0xff] }
  0x47   : > { %5205 = vmatpush1.bf16.msra.mxu1 %v7455_v38  ;;  %9360 = vst [vmem:[#allocation32_spill] sm:$0xff] %v7555_v17  ;;  %9370 = vst [vmem:[#allocation42_spill] sm:$0xff] %v7651_v11  ;;  %5239 = vmatprep.subr.bf16.mxu0 %v7651_v11  ;;  %v846_v0 = vld [vmem:[%s9128_s5 + $0x168] sm:$0xff]  ;;  %v844_v1 = vld [vmem:[%s9128_s5 + $0x158] sm:$0xff] }
  0x48   : > { %5207 = vmatprep.subr.bf16.mxu1 %v7459_v39  ;;  %5022 = vmatmul.mubr.msk.f32.gmra.mrb[14].mxu0 %vm390_vm0, %v351_v20  ;;  %v7564_v20 = vpack.c.bf16 %v735_v19, %v731_v18  ;;  %v817_v18 = vld [vmem:[%s9128_s5 + $0x80] sm:$0xff]  ;;  %9371 = vst [vmem:[#allocation43_spill] sm:$0xff] %v7662_v25  ;;  %9377 = vst [vmem:[#allocation49_spill] sm:$0xff] %v7709_v3 }
  0x49   : > { %1108 = vmatprep.mubr.f32.mxu0 %v9133_v8  ;;  %v821_v19 = vld [vmem:[%s9128_s5 + $0xa0] sm:$0xff] }
  0x4a   : > { %9361 = vst [vmem:[#allocation33_spill] sm:$0xff] %v7564_v20  ;;  %v7664_v26 = vpack.c.bf16 %v821_v19, %v817_v18  ;;  %v7723_v18 = vpack.c.bf16 %v838_v10, %v834_v9  ;;  %v840_v19 = vld [vmem:[%s9128_s5 + $0x138] sm:$0xff]  ;;  %v7759_v9 = vpack.c.bf16 %v846_v0, %v842_v51  ;;  %v7781_v51 = vpack.c.bf16 %v847_v48, %v843_v41  ;;  %v850_v0 = vld [vmem:[%s9128_s5 + $0x188] sm:$0xff]  ;;  %v849_v41 = vld [vmem:[%s9128_s5 + $0x180] sm:$0xff] }
  0x4b   : > { %5209 = vmatpush1.bf16.msra.mxu1 %v7476_v45  ;;  %v7734_v36 = vpack.c.bf16 %v840_v19, %v836_v12  ;;  %v848_v10 = vld [vmem:[%s9128_s5 + $0x178] sm:$0xff]  ;;  %v841_v12 = vld [vmem:[%s9128_s5 + $0x140] sm:$0xff] }
  0x4c   : > { %5211 = vmatprep.subr.bf16.mxu1 %v7479_v46  ;;  %9372 = vst [vmem:[#allocation44_spill] sm:$0xff] %v7664_v26  ;;  %5241 = vmatpush1.bf16.msra.mxu0 %v7664_v26  ;;  %9378 = vst [vmem:[#allocation50_spill] sm:$0xff] %v7723_v18  ;;  %v845_v19 = vld [vmem:[%s9128_s5 + $0x160] sm:$0xff] }
  0x4d   : > { %5243 = vmatprep.subr.bf16.mxu0 %v7687_v44  ;;  %9379 = vst [vmem:[#allocation51_spill] sm:$0xff] %v7734_v36  ;;  %9382 = vst [vmem:[#allocation54_spill] sm:$0xff] %v7759_v9  ;;  %v853_v48 = vld [vmem:[%s9128_s5 + $0x1a0] sm:$0xff] }
  0x4e   : > { %9385 = vst [vmem:[#allocation57_spill] sm:$0xff] %v7781_v51 }
  0x4f   : > { %5213 = vmatpush1.bf16.msra.mxu1 %v7496_v52 }
  0x50   : > { %5215 = vmatprep.subr.bf16.mxu1 %v7499_v53  ;;  %5245 = vmatpush1.bf16.msra.mxu0 %v7700_v57 }
  0x51   : > { %5247 = vmatprep.subr.bf16.mxu0 %v7723_v18 }
  0x53   : > { %5217 = vmatpush1.bf16.msra.mxu1 %v7516_v60 }
  0x54   : > { %5219 = vmatprep.subr.bf16.mxu1 %v7519_v61 }
  0x57   : > { %5221 = vmatpush1.bf16.msra.mxu1 %v7534_v4 }
  0x58   : > { %5223 = vmatprep.subr.bf16.mxu1 %v7537_v7 }
  0x5b   : > { %5225 = vmatpush1.bf16.msra.mxu1 %v7552_v15 }
  0x5c   : > { %5227 = vmatprep.subr.bf16.mxu1 %v7555_v17 }
  0x5f   : > { %5229 = vmatpush1.bf16.msra.mxu1 %v7564_v20 }
  0x62   : > { %1010 = vmatmul.mubr.f32.vlgmr.msra.gmra.mrb[0].mxu1 %v7432_v30  ;;  %v808_v30 = vld [vmem:[%s9128_s5 + $0x38] sm:$0xff] }
  0x63   : > { %1179 = vmatprep.mubr.f32.mxu1 %v9133_v8  ;;  %v7584_v34 = vpack.c.bf16 %v808_v30, %v804_v27  ;;  %v819_v27 = vld [vmem:[%s9128_s5 + $0x90] sm:$0xff] }
  0x64   : > { %v823_v30 = vld [vmem:[%s9128_s5 + $0xb0] sm:$0xff] }
  0x65   : > { %9363 = vst [vmem:[#allocation35_spill] sm:$0xff] %v7584_v34  ;;  %5263 = vmatprep.subr.bf16.mxu1 %v7584_v34  ;;  %v7673_v35 = vpack.c.bf16 %v823_v30, %v819_v27  ;;  %v833_v27 = vld [vmem:[%s9128_s5 + $0x100] sm:$0xff] }
  0x66   : > { %5265 = vmatpush1.bf16.msra.mxu1 %v7602_v42  ;;  %v837_v30 = vld [vmem:[%s9128_s5 + $0x120] sm:$0xff] }
  0x67   : > { %5267 = vmatprep.subr.bf16.mxu1 %v7626_v58  ;;  %9373 = vst [vmem:[#allocation45_spill] sm:$0xff] %v7673_v35  ;;  %v7736_v37 = vpack.c.bf16 %v837_v30, %v833_v27  ;;  %v7770_v27 = vpack.c.bf16 %v848_v10, %v844_v1  ;;  %v7772_v30 = vpack.c.bf16 %v845_v19, %v841_v12  ;;  %v854_v1 = vld [vmem:[%s9128_s5 + $0x1a8] sm:$0xff]  ;;  %v852_v10 = vld [vmem:[%s9128_s5 + $0x198] sm:$0xff] }
  0x68   : > { %v7795_v12 = vpack.c.bf16 %v854_v1, %v850_v0  ;;  %v856_v19 = vld [vmem:[%s9128_s5 + $0x1b8] sm:$0xff]  ;;  %v851_v0 = vld [vmem:[%s9128_s5 + $0x190] sm:$0xff] }
  0x69   : > { %9380 = vst [vmem:[#allocation52_spill] sm:$0xff] %v7736_v37  ;;  %5249 = vmatpush1.bf16.msra.mxu0 %v7736_v37  ;;  %9383 = vst [vmem:[#allocation55_spill] sm:$0xff] %v7770_v27  ;;  %v7806_v8 = vpack.c.bf16 %v856_v19, %v852_v10  ;;  %v855_v1 = vld [vmem:[%s9128_s5 + $0x1b0] sm:$0xff]  ;;  %v858_v10 = vld [vmem:[%s9128_s5 + $0x1c8] sm:$0xff] }
  0x6a   : > { %5269 = vmatpush1.bf16.msra.mxu1 %v7637_v2  ;;  %9384 = vst [vmem:[#allocation56_spill] sm:$0xff] %v7772_v30  ;;  %5251 = vmatprep.subr.bf16.mxu0 %v7759_v9  ;;  %9386 = vst [vmem:[#allocation58_spill] sm:$0xff] %v7795_v12  ;;  %v862_v19 = vld [vmem:[%s9128_s5 + $0x1e8] sm:$0xff] }
  0x6b   : > { %5271 = vmatprep.subr.bf16.mxu1 %v7662_v25  ;;  %9387 = vst [vmem:[#allocation59_spill] sm:$0xff] %v7806_v8 }
  0x6d   : > { %5253 = vmatpush1.bf16.msra.mxu0 %v7772_v30  ;;  %v7808_v30 = vpack.c.bf16 %v853_v48, %v849_v41  ;;  %v860_v41 = vld [vmem:[%s9128_s5 + $0x1d8] sm:$0xff]  ;;  %v7831_v48 = vpack.c.bf16 %v862_v19, %v858_v10  ;;  %v859_v10 = vld [vmem:[%s9128_s5 + $0x1d0] sm:$0xff] }
  0x6e   : > { %5273 = vmatpush1.bf16.msra.mxu1 %v7673_v35  ;;  %5255 = vmatprep.subr.bf16.mxu0 %v7795_v12  ;;  %v863_v19 = vld [vmem:[%s9128_s5 + $0x1f0] sm:$0xff] }
  0x6f   : > { %5275 = vmatprep.subr.bf16.mxu1 %v7698_v54  ;;  %9388 = vst [vmem:[#allocation60_spill] sm:$0xff] %v7808_v30  ;;  %9390 = vst [vmem:[#allocation62_spill] sm:$0xff] %v7831_v48 }
  0x71   : > { %5257 = vmatpush1.bf16.msra.mxu0 %v7808_v30  ;;  %v861_v30 = vld [vmem:[%s9128_s5 + $0x1e0] sm:$0xff] }
  0x72   : > { %5277 = vmatpush1.bf16.msra.mxu1 %v7709_v3  ;;  %5259 = vmatprep.subr.bf16.mxu0 %v7831_v48 }
  0x73   : > { %5279 = vmatprep.subr.bf16.mxu1 %v7734_v36 }
  0x76   : > { %5281 = vmatpush1.bf16.msra.mxu1 %v7745_v49 }
  0x77   : > { %5283 = vmatprep.subr.bf16.mxu1 %v7770_v27 }
  0x7a   : > { %5285 = vmatpush1.bf16.msra.mxu1 %v7781_v51  ;;  %v7817_v51 = vpack.c.bf16 %v855_v1, %v851_v0  ;;  %v864_v0 = vld [vmem:[%s9128_s5 + $0x1f8] sm:$0xff]  ;;  %v857_v1 = vld [vmem:[%s9128_s5 + $0x1c0] sm:$0xff] }
  0x7b   : > { %5287 = vmatprep.subr.bf16.mxu1 %v7806_v8  ;;  %v7842_v8 = vpack.c.bf16 %v864_v0, %v860_v41  ;;  %v7844_v12 = vpack.c.bf16 %v861_v30, %v857_v1  ;;  %v738_v30 = vld [vmem:[%s9127_s4 + $0x8] sm:$0xff]  ;;  %v740_v0 = vld [vmem:[%s9127_s4 + $0x18] sm:$0xff] }
  0x7c   : > { %9389 = vst [vmem:[#allocation61_spill] sm:$0xff] %v7817_v51  ;;  %v742_v41 = vld [vmem:[%s9127_s4 + $0x28] sm:$0xff] }
  0x7d   : > { %9391 = vst [vmem:[#allocation63_spill] sm:$0xff] %v7842_v8  ;;  %9392 = vst [vmem:[#allocation64_spill] sm:$0xff] %v7844_v12  ;;  %5261 = vmatpush1.bf16.msra.mxu0 %v7844_v12  ;;  %v7867_v1 = vpack.c.bf16 %v742_v41, %v738_v30  ;;  %v741_v12 = vld [vmem:[%s9127_s4 + $0x20] sm:$0xff]  ;;  %v739_v30 = vld [vmem:[%s9127_s4 + $0x10] sm:$0xff] }
  0x7e   : > { %5289 = vmatpush1.bf16.msra.mxu1 %v7817_v51  ;;  %v7853_v51 = vpack.c.bf16 %v863_v19, %v859_v10  ;;  %v744_v10 = vld [vmem:[%s9127_s4 + $0x38] sm:$0xff]  ;;  %v737_v19 = vld [vmem:[%s9127_s4] sm:$0xff]  ;;  %v743_v41 = vld [vmem:[%s9127_s4 + $0x30] sm:$0xff] }
  0x7f   : > { %5291 = vmatprep.subr.bf16.mxu1 %v7842_v8  ;;  %9394 = vst [vmem:[#allocation66_spill] sm:$0xff] %v7867_v1  ;;  %v7878_v8 = vpack.c.bf16 %v744_v10, %v740_v0  ;;  %v7880_v48 = vpack.c.bf16 %v741_v12, %v737_v19  ;;  %5295 = vmatprep.subr.bf16.mxu0 %v7867_v1  ;;  %v746_v12 = vld [vmem:[%s9127_s4 + $0x48] sm:$0xff]  ;;  %v748_v10 = vld [vmem:[%s9127_s4 + $0x58] sm:$0xff] }
  0x80   : > { %9393 = vst [vmem:[#allocation65_spill] sm:$0xff] %v7853_v51  ;;  %v7889_v27 = vpack.c.bf16 %v743_v41, %v739_v30  ;;  %v750_v0 = vld [vmem:[%s9127_s4 + $0x68] sm:$0xff]  ;;  %v752_v30 = vld [vmem:[%s9127_s4 + $0x78] sm:$0xff]  ;;  %v745_v41 = vld [vmem:[%s9127_s4 + $0x40] sm:$0xff] }
  0x81   : > { %9395 = vst [vmem:[#allocation67_spill] sm:$0xff] %v7878_v8  ;;  %9396 = vst [vmem:[#allocation68_spill] sm:$0xff] %v7880_v48  ;;  %v7902_v19 = vpack.c.bf16 %v750_v0, %v746_v12  ;;  %v7914_v1 = vpack.c.bf16 %v752_v30, %v748_v10  ;;  %v747_v12 = vld [vmem:[%s9127_s4 + $0x50] sm:$0xff]  ;;  %v758_v10 = vld [vmem:[%s9127_s4 + $0xa8] sm:$0xff] }
  0x82   : > { %5293 = vmatpush1.bf16.msra.mxu1 %v7853_v51  ;;  %v868_v51 = vld [vmem:[#allocation4] sm:$0xff]  ;;  %9397 = vst [vmem:[#allocation69_spill] sm:$0xff] %v7889_v27  ;;  %v756_v30 = vld [vmem:[%s9127_s4 + $0x98] sm:$0xff] }
  0x83   : > { %5327 = vmatprep.subr.bf16.mxu1 %v7878_v8  ;;  %1109 = vmatmul.mubr.f32.vlgmr.msra.gmra.mrb[16].mxu0 %v868_v51  ;;  %9398 = vst [vmem:[#allocation70_spill] sm:$0xff] %v7902_v19  ;;  %v749_v8 = vld [vmem:[%s9127_s4 + $0x60] sm:$0xff]  ;;  %9399 = vst [vmem:[#allocation71_spill] sm:$0xff] %v7914_v1  ;;  %v751_v0 = vld [vmem:[%s9127_s4 + $0x70] sm:$0xff] }
  0x84   : > { %5297 = vmatpush1.bf16.msra.mxu0 %v7880_v48  ;;  %v9401_v48 = vmov 0.0   ;;  %v7926_v9 = vpack.c.bf16 %v751_v0, %v747_v12  ;;  %v760_v12 = vld [vmem:[%s9127_s4 + $0xb8] sm:$0xff]  ;;  %v753_v0 = vld [vmem:[%s9127_s4 + $0x80] sm:$0xff] }
  0x85   : > { %1180 = vmatmul.mubr.f32.vlgmr.msra.gmra.mrb[18].mxu1 %v868_v51  ;;  %v7916_v51 = vpack.c.bf16 %v749_v8, %v745_v41  ;;  %1250 = vmatprep.mubr.f32.mxu0 %v9401_v48  ;;  %v754_v8 = vld [vmem:[%s9127_s4 + $0x88] sm:$0xff] }
  0x86   : > { %5329 = vmatpush1.bf16.msra.mxu1 %v7889_v27  ;;  %5299 = vmatprep.subr.bf16.mxu0 %v7902_v19  ;;  %9402 = vst [vmem:[#allocation73_spill] sm:$0xff] %v7926_v9  ;;  %v7940_v41 = vpack.c.bf16 %v758_v10, %v754_v8  ;;  %v7952_v19 = vpack.c.bf16 %v760_v12, %v756_v30  ;;  %v755_v8 = vld [vmem:[%s9127_s4 + $0x90] sm:$0xff]  ;;  %v762_v30 = vld [vmem:[%s9127_s4 + $0xc8] sm:$0xff]  ;;  %v764_v12 = vld [vmem:[%s9127_s4 + $0xd8] sm:$0xff] }
  0x87   : > { %9400 = vst [vmem:[#allocation72_spill] sm:$0xff] %v7916_v51  ;;  %1321 = vmatprep.mubr.f32.mxu1 %v9401_v48  ;;  %5331 = vmatprep.subr.bf16.mxu1 %v7914_v1  ;;  %v757_v1 = vld [vmem:[%s9127_s4 + $0xa0] sm:$0xff]  ;;  %v759_v10 = vld [vmem:[%s9127_s4 + $0xb0] sm:$0xff] }
  0x88   : > { %5301 = vmatpush1.bf16.msra.mxu0 %v7916_v51  ;;  %9403 = vst [vmem:[#allocation74_spill] sm:$0xff] %v7940_v41  ;;  %9404 = vst [vmem:[#allocation75_spill] sm:$0xff] %v7952_v19  ;;  %v7954_v27 = vpack.c.bf16 %v757_v1, %v753_v0  ;;  %v7963_v51 = vpack.c.bf16 %v759_v10, %v755_v8  ;;  %v766_v1 = vld [vmem:[%s9127_s4 + $0xe8] sm:$0xff]  ;;  %v768_v8 = vld [vmem:[%s9127_s4 + $0xf8] sm:$0xff] }
  0x89   : > { %5303 = vmatprep.subr.bf16.mxu0 %v7940_v41  ;;  %v7976_v0 = vpack.c.bf16 %v766_v1, %v762_v30  ;;  %v761_v10 = vld [vmem:[%s9127_s4 + $0xc0] sm:$0xff]  ;;  %v7988_v41 = vpack.c.bf16 %v768_v8, %v764_v12  ;;  %v763_v30 = vld [vmem:[%s9127_s4 + $0xd0] sm:$0xff]  ;;  %v770_v12 = vld [vmem:[%s9127_s4 + $0x108] sm:$0xff] }
  0x8a   : > { %5333 = vmatpush1.bf16.msra.mxu1 %v7926_v9  ;;  %9405 = vst [vmem:[#allocation76_spill] sm:$0xff] %v7954_v27  ;;  %9406 = vst [vmem:[#allocation77_spill] sm:$0xff] %v7963_v51  ;;  %v767_v1 = vld [vmem:[%s9127_s4 + $0xf0] sm:$0xff]  ;;  %v772_v8 = vld [vmem:[%s9127_s4 + $0x118] sm:$0xff] }
  0x8b   : > { %5335 = vmatprep.subr.bf16.mxu1 %v7952_v19  ;;  %9407 = vst [vmem:[#allocation78_spill] sm:$0xff] %v7976_v0  ;;  %v765_v19 = vld [vmem:[%s9127_s4 + $0xe0] sm:$0xff]  ;;  %9408 = vst [vmem:[#allocation79_spill] sm:$0xff] %v7988_v41 }
  0x8c   : > { %5305 = vmatpush1.bf16.msra.mxu0 %v7954_v27  ;;  %v7990_v9 = vpack.c.bf16 %v765_v19, %v761_v10  ;;  %v7999_v27 = vpack.c.bf16 %v767_v1, %v763_v30  ;;  %v774_v19 = vld [vmem:[%s9127_s4 + $0x128] sm:$0xff]  ;;  %v776_v30 = vld [vmem:[%s9127_s4 + $0x138] sm:$0xff]  ;;  %v769_v1 = vld [vmem:[%s9127_s4 + $0x100] sm:$0xff] }
  0x8d   : > { %5307 = vmatprep.subr.bf16.mxu0 %v7976_v0  ;;  %v8012_v10 = vpack.c.bf16 %v774_v19, %v770_v12  ;;  %v8024_v0 = vpack.c.bf16 %v776_v30, %v772_v8  ;;  %v771_v12 = vld [vmem:[%s9127_s4 + $0x110] sm:$0xff]  ;;  %v778_v8 = vld [vmem:[%s9127_s4 + $0x148] sm:$0xff]  ;;  %v780_v30 = vld [vmem:[%s9127_s4 + $0x158] sm:$0xff] }
  0x8e   : > { %5337 = vmatpush1.bf16.msra.mxu1 %v7963_v51  ;;  %9409 = vst [vmem:[#allocation80_spill] sm:$0xff] %v7990_v9  ;;  %9410 = vst [vmem:[#allocation81_spill] sm:$0xff] %v7999_v27  ;;  %v775_v19 = vld [vmem:[%s9127_s4 + $0x130] sm:$0xff] }
  0x8f   : > { %5339 = vmatprep.subr.bf16.mxu1 %v7988_v41  ;;  %9411 = vst [vmem:[#allocation82_spill] sm:$0xff] %v8012_v10  ;;  %v773_v41 = vld [vmem:[%s9127_s4 + $0x120] sm:$0xff]  ;;  %9412 = vst [vmem:[#allocation83_spill] sm:$0xff] %v8024_v0 }
  0x90   : > { %5309 = vmatpush1.bf16.msra.mxu0 %v7990_v9  ;;  %v8026_v51 = vpack.c.bf16 %v773_v41, %v769_v1  ;;  %v8035_v9 = vpack.c.bf16 %v775_v19, %v771_v12  ;;  %v782_v41 = vld [vmem:[%s9127_s4 + $0x168] sm:$0xff]  ;;  %v784_v12 = vld [vmem:[%s9127_s4 + $0x178] sm:$0xff]  ;;  %v777_v19 = vld [vmem:[%s9127_s4 + $0x140] sm:$0xff] }
  0x91   : > { %5311 = vmatprep.subr.bf16.mxu0 %v8012_v10  ;;  %v8048_v1 = vpack.c.bf16 %v782_v41, %v778_v8  ;;  %v8060_v10 = vpack.c.bf16 %v784_v12, %v780_v30  ;;  %v779_v8 = vld [vmem:[%s9127_s4 + $0x150] sm:$0xff]  ;;  %v788_v30 = vld [vmem:[%s9127_s4 + $0x198] sm:$0xff] }
  0x92   : > { %5341 = vmatpush1.bf16.msra.mxu1 %v7999_v27  ;;  %9413 = vst [vmem:[#allocation84_spill] sm:$0xff] %v8026_v51  ;;  %9414 = vst [vmem:[#allocation85_spill] sm:$0xff] %v8035_v9  ;;  %v783_v41 = vld [vmem:[%s9127_s4 + $0x170] sm:$0xff] }
  0x93   : > { %5343 = vmatprep.subr.bf16.mxu1 %v8024_v0  ;;  %9415 = vst [vmem:[#allocation86_spill] sm:$0xff] %v8048_v1  ;;  %v781_v0 = vld [vmem:[%s9127_s4 + $0x160] sm:$0xff]  ;;  %9416 = vst [vmem:[#allocation87_spill] sm:$0xff] %v8060_v10 }
  0x94   : > { %5313 = vmatpush1.bf16.msra.mxu0 %v8026_v51  ;;  %v8062_v27 = vpack.c.bf16 %v781_v0, %v777_v19  ;;  %v8071_v51 = vpack.c.bf16 %v783_v41, %v779_v8  ;;  %v790_v0 = vld [vmem:[%s9127_s4 + $0x1a8] sm:$0xff]  ;;  %v792_v19 = vld [vmem:[%s9127_s4 + $0x1b8] sm:$0xff]  ;;  %v785_v8 = vld [vmem:[%s9127_s4 + $0x180] sm:$0xff] }
  0x95   : > { %5315 = vmatprep.subr.bf16.mxu0 %v8048_v1  ;;  %v789_v41 = vld [vmem:[%s9127_s4 + $0x1a0] sm:$0xff]  ;;  %v8095_v1 = vpack.c.bf16 %v792_v19, %v788_v30  ;;  %v798_v19 = vld [vmem:[%s9127_s4 + $0x1e8] sm:$0xff] }
  0x96   : > { %5345 = vmatpush1.bf16.msra.mxu1 %v8035_v9  ;;  %9417 = vst [vmem:[#allocation88_spill] sm:$0xff] %v8062_v27  ;;  %9418 = vst [vmem:[#allocation89_spill] sm:$0xff] %v8071_v51  ;;  %v786_v9 = vld [vmem:[%s9127_s4 + $0x188] sm:$0xff]  ;;  %v8097_v49 = vpack.c.bf16 %v789_v41, %v785_v8  ;;  %v796_v8 = vld [vmem:[%s9127_s4 + $0x1d8] sm:$0xff] }
  0x97   : > { %5347 = vmatprep.subr.bf16.mxu1 %v8060_v10  ;;  %v8083_v12 = vpack.c.bf16 %v790_v0, %v786_v9  ;;  %9420 = vst [vmem:[#allocation91_spill] sm:$0xff] %v8095_v1  ;;  %v787_v9 = vld [vmem:[%s9127_s4 + $0x190] sm:$0xff]  ;;  %v794_v10 = vld [vmem:[%s9127_s4 + $0x1c8] sm:$0xff]  ;;  %v800_v41 = vld [vmem:[%s9127_s4 + $0x1f8] sm:$0xff] }
  0x98   : > { %5317 = vmatpush1.bf16.msra.mxu0 %v8062_v27  ;;  %9421 = vst [vmem:[#allocation92_spill] sm:$0xff] %v8097_v49  ;;  %v791_v0 = vld [vmem:[%s9127_s4 + $0x1b0] sm:$0xff]  ;;  %v8122_v27 = vpack.c.bf16 %v798_v19, %v794_v10 }
  0x99   : > { %9419 = vst [vmem:[#allocation90_spill] sm:$0xff] %v8083_v12  ;;  %5319 = vmatprep.subr.bf16.mxu0 %v8083_v12  ;;  %v8110_v30 = vpack.c.bf16 %v791_v0, %v787_v9  ;;  %v793_v9 = vld [vmem:[%s9127_s4 + $0x1c0] sm:$0xff]  ;;  %v795_v12 = vld [vmem:[%s9127_s4 + $0x1d0] sm:$0xff] }
  0x9a   : > { %5349 = vmatpush1.bf16.msra.mxu1 %v8071_v51  ;;  %9423 = vst [vmem:[#allocation94_spill] sm:$0xff] %v8122_v27  ;;  %v8124_v51 = vpack.c.bf16 %v800_v41, %v796_v8  ;;  %v797_v0 = vld [vmem:[%s9127_s4 + $0x1e0] sm:$0xff]  ;;  %v370_v8 = vlaneseq }
  0x9b   : > { %9422 = vst [vmem:[#allocation93_spill] sm:$0xff] %v8110_v30  ;;  %5351 = vmatprep.subr.bf16.mxu1 %v8095_v1  ;;  %v799_v1 = vld [vmem:[%s9127_s4 + $0x1f0] sm:$0xff]  ;;  %v8139_v10 = vpack.c.bf16 %v797_v0, %v793_v9 }
  0x9c   : > { %9424 = vst [vmem:[#allocation95_spill] sm:$0xff] %v8124_v51  ;;  %5321 = vmatpush1.bf16.msra.mxu0 %v8097_v49  ;;  %v8143_v19 = vpack.c.bf16 %v799_v1, %v795_v12  ;;  %v8150_v0 = vshrl.u32 %v370_v8, 7  ;;  %v368_v1 = vld [vmem:[%s9126_s3] sm:$0xf] }
  0x9d   : > { %9425 = vst [vmem:[#allocation96_spill] sm:$0xff] %v8139_v10  ;;  %5323 = vmatprep.subr.bf16.mxu0 %v8122_v27 }
  0x9e   : > { %5353 = vmatpush1.bf16.msra.mxu1 %v8110_v30  ;;  %9426 = vst [vmem:[#allocation97_spill] sm:$0xff] %v8143_v19  ;;  %v9235_v30 = vsub.s32 0, %v8150_v0  ;;  %v9240_v12 = vsub.s32 1, %v8150_v0  ;;  %v9241_v18 = vsub.s32 2, %v8150_v0  ;;  %v9246_v3 = vsub.s32 3, %v8150_v0 }
  0x9f   : > { %5355 = vmatprep.subr.bf16.mxu1 %v8124_v51 }
  0xa0   : > { %5325 = vmatpush1.bf16.msra.mxu0 %v8139_v10 }
  0xa1   : > { %5359 = vmatprep.subr.bf16.mxu0 %v7206_v16 }
  0xa2   : > { %5357 = vmatpush1.bf16.msra.mxu1 %v8143_v19  ;;  %v8159_v19 = vrot.slane %v368_v1, %v9235_v30 }
  0xa3   : > { %5391 = vmatprep.subr.bf16.mxu1 %v7413_v24  ;;  %v8163_v24 = vrot.slane %v368_v1, %v9240_v12 }
  0xa4   : > { %9427 = vst [vmem:[#allocation98_spill] sm:$0xff] %v8159_v19 }
  0xa5   : > { %9428 = vst [vmem:[#allocation99_spill] sm:$0xff] %v8163_v24 }
  0xff   : > { %v481_v41 = vpop.f32.mrb[0].mxu0 }
 0x100   : > { %v483_v9 = vpop.f32.mrb[1].mxu0  ;;  %v482_v16 = vadd.f32 %v481_v41, %v8159_v19  ;;  %v8171_v41 = vrot.slane %v368_v1, %v9241_v18 }
 0x101   : > { %v484_v8 = vadd.f32 %v483_v9, %v8163_v24 }
 0x115   : > { %v940_v10 = vpop.f32.mrb[16].mxu1 }
 0x116   : > { %v1016_v51 = vadd.f32 %v940_v10, %v482_v16  ;;  %v942_v27 = vpop.f32.mrb[17].mxu1  ;;  %v8175_v16 = vrot.slane %v368_v1, %v9246_v3  ;;  %v867_v10 = vld [vmem:[#allocation3] sm:$0xff] }
 0x117   : > { %v1017_v49 = vadd.f32 %v942_v27, %v484_v8 }
 0x118   : > { %v5031_v36 = vmul.f32 -1.442695, %v1016_v51 }
 0x119   : > { %v5032_v37 = vmul.f32 -1.442695, %v1017_v49 }
 0x11b   : > { %6840 = vpow2.f32 %v5032_v37 }
 0x11c   : > { %6842 = vpow2.f32 %v5031_v36 }
 0x125   : > { %v6841_v30 = vpop.eup %6840 }
 0x126   : > { %v6843_v57 = vpop.eup %6842  ;;  %v1029_v12 = vadd.f32 1.0, %v6841_v30 }
 0x127   : > { %v1023_v9 = vadd.f32 1.0, %v6843_v57 }
 0x128   : > { %6844 = vrcp.f32 %v1029_v12 }
 0x129   : > { %6846 = vrcp.f32 %v1023_v9 }
 0x132   : > { %v6845_v30 = vpop.eup %6844 }
 0x133   : > { %v6847_v8 = vpop.eup %6846  ;;  %v1039_v57 = vmul.f32 %v6845_v30, %v867_v10  ;;  %v9437_v30 = vld [vmem:[#allocation56_spill] sm:$0xff]  ;;  %v9438_v10 = vld [vmem:[#allocation57_spill] sm:$0xff] }
 0x135   : > { %v1011_v49 = vpop.f32.mrb[0].mxu1 }
 0x136   : > { %v6752_v36 = vadd.f32 %v1011_v49, %v8171_v41  ;;  %v1013_v37 = vpop.f32.mrb[1].mxu1 }
 0x137   : > { %v6753_v27 = vadd.f32 %v1013_v37, %v8175_v16  ;;  %v9434_v37 = vld [vmem:[#allocation53_spill] sm:$0xff] }
 0x138   : > { %6848 = vtanh.f32 %v6752_v36  ;;  %v9433_v36 = vld [vmem:[#allocation52_spill] sm:$0xff] }
 0x139   : > { %v5033_v51 = vmul.f32 -1.442695, %v6753_v27  ;;  %v9435_v27 = vld [vmem:[#allocation54_spill] sm:$0xff] }
 0x13b   : > { %6850 = vpow2.f32 %v5033_v51  ;;  %v9436_v51 = vld [vmem:[#allocation55_spill] sm:$0xff] }
 0x142   : > { %v6849_v18 = vpop.eup %6848 }
 0x143   : > { %v1040_v24 = vmul.f32 %v6849_v18, %v6847_v8  ;;  %v9431_v18 = vld [vmem:[#allocation50_spill] sm:$0xff] }
 0x144   : > { %v9439_v8 = vld [vmem:[#allocation58_spill] sm:$0xff] }
 0x145   : > { %v6851_v19 = vpop.eup %6850  ;;  %v8179_v1 = vadd.f32 %v1040_v24, %v1039_v57  ;;  %v9429_v24 = vld [vmem:[#allocation48_spill] sm:$0xff]  ;;  %v9440_v57 = vld [vmem:[#allocation59_spill] sm:$0xff] }
 0x146   : > { %v1036_v3 = vadd.f32 1.0, %v6851_v19  ;;  %v9432_v19 = vld [vmem:[#allocation51_spill] sm:$0xff] }
 0x147   : > { %6852 = vtanh.f32 %v8179_v1 }
 0x148   : > { %6854 = vrcp.f32 %v1036_v3  ;;  %v9430_v3 = vld [vmem:[#allocation49_spill] sm:$0xff] }
 0x151   : > { %v6853_v12 = vpop.eup %6852 }
 0x152   : > { %v6855_v9 = vpop.eup %6854 }
 0x153   : > { %v1043_v49 = vmul.f32 %v6855_v9, %v6853_v12  ;;  %v9441_v12 = vld [vmem:[#allocation60_spill] sm:$0xff]  ;;  %v9442_v9 = vld [vmem:[#allocation61_spill] sm:$0xff] }
 0x155   : > { %1251 = vmatmul.mubr.f32.vlgmr.msra.gmra.mrb[16].mxu0 %v1043_v49  ;;  %1322 = vmatmul.mubr.f32.vlgmr.msra.gmra.mrb[18].mxu1 %v1043_v49 }
 0x156   : > { %5361 = vmatpush1.bf16.msra.mxu0 %v7223_v22  ;;  %5393 = vmatpush1.bf16.msra.mxu1 %v7434_v31 }
 0x157   : > { %5363 = vmatprep.subr.bf16.mxu0 %v7226_v23  ;;  %5395 = vmatprep.subr.bf16.mxu1 %v7437_v32 }
 0x158   : > { %1447 = vmatprep.mubr.f32.mxu0 %v9401_v48  ;;  %1518 = vmatprep.mubr.f32.mxu1 %v9401_v48 }
 0x15a   : > { %5365 = vmatpush1.bf16.msra.mxu0 %v7247_v29  ;;  %5397 = vmatpush1.bf16.msra.mxu1 %v7455_v38 }
 0x15b   : > { %5367 = vmatprep.subr.bf16.mxu0 %v7259_v33  ;;  %5399 = vmatprep.subr.bf16.mxu1 %v7459_v39 }
 0x15e   : > { %5369 = vmatpush1.bf16.msra.mxu0 %v7286_v43  ;;  %5401 = vmatpush1.bf16.msra.mxu1 %v7476_v45 }
 0x15f   : > { %5371 = vmatprep.subr.bf16.mxu0 %v7298_v47  ;;  %5403 = vmatprep.subr.bf16.mxu1 %v7479_v46 }
 0x162   : > { %5373 = vmatpush1.bf16.msra.mxu0 %v7317_v55  ;;  %5405 = vmatpush1.bf16.msra.mxu1 %v7496_v52 }
 0x163   : > { %5375 = vmatprep.subr.bf16.mxu0 %v7320_v56  ;;  %5407 = vmatprep.subr.bf16.mxu1 %v7499_v53 }
 0x166   : > { %5377 = vmatpush1.bf16.msra.mxu0 %v7338_v62  ;;  %5409 = vmatpush1.bf16.msra.mxu1 %v7516_v60 }
 0x167   : > { %5379 = vmatprep.subr.bf16.mxu0 %v7341_v63  ;;  %5411 = vmatprep.subr.bf16.mxu1 %v7519_v61 }
 0x16a   : > { %5381 = vmatpush1.bf16.msra.mxu0 %v7362_v5  ;;  %5413 = vmatpush1.bf16.msra.mxu1 %v7534_v4 }
 0x16b   : > { %5383 = vmatprep.subr.bf16.mxu0 %v7365_v6  ;;  %5415 = vmatprep.subr.bf16.mxu1 %v7537_v7 }
 0x16e   : > { %5385 = vmatpush1.bf16.msra.mxu0 %v7386_v13  ;;  %5417 = vmatpush1.bf16.msra.mxu1 %v7552_v15 }
 0x16f   : > { %5387 = vmatprep.subr.bf16.mxu0 %v7389_v14  ;;  %5419 = vmatprep.subr.bf16.mxu1 %v7555_v17 }
 0x172   : > { %5389 = vmatpush1.bf16.msra.mxu0 %v7410_v21  ;;  %5421 = vmatpush1.bf16.msra.mxu1 %v7564_v20 }
 0x173   : > { %5423 = vmatprep.subr.bf16.mxu0 %v7579_v28  ;;  %5455 = vmatprep.subr.bf16.mxu1 %v7584_v34 }
 0x175   : > { %1448 = vmatmul.mubr.f32.vlgmr.msra.gmra.mrb[2].mxu0 %v1043_v49  ;;  %1519 = vmatmul.mubr.f32.vlgmr.msra.gmra.mrb[2].mxu1 %v1043_v49  ;;  %v9443_v49 = vld [vmem:[#allocation62_spill] sm:$0xff] }
 0x176   : > { %5425 = vmatpush1.bf16.msra.mxu0 %v7597_v40  ;;  %5457 = vmatpush1.bf16.msra.mxu1 %v7602_v42 }
 0x177   : > { %5427 = vmatprep.subr.bf16.mxu0 %v7615_v50  ;;  %5459 = vmatprep.subr.bf16.mxu1 %v7626_v58 }
 0x178   : > { %1617 = vmatprep.mubr.f32.mxu0 %v9401_v48  ;;  %1688 = vmatprep.mubr.f32.mxu1 %v9401_v48 }
 0x17a   : > { %5429 = vmatpush1.bf16.msra.mxu0 %v7628_v59  ;;  %5461 = vmatpush1.bf16.msra.mxu1 %v7637_v2 }
 0x17b   : > { %5431 = vmatprep.subr.bf16.mxu0 %v7651_v11  ;;  %5463 = vmatprep.subr.bf16.mxu1 %v7662_v25 }
 0x17e   : > { %5433 = vmatpush1.bf16.msra.mxu0 %v7664_v26  ;;  %5465 = vmatpush1.bf16.msra.mxu1 %v7673_v35 }
 0x17f   : > { %5435 = vmatprep.subr.bf16.mxu0 %v7687_v44  ;;  %5467 = vmatprep.subr.bf16.mxu1 %v7698_v54 }
 0x182   : > { %5437 = vmatpush1.bf16.msra.mxu0 %v9429_v24  ;;  %5469 = vmatpush1.bf16.msra.mxu1 %v9430_v3  ;;  %v9453_v3 = vsub.s32 3, %v8150_v0 }
 0x183   : > { %5439 = vmatprep.subr.bf16.mxu0 %v9431_v18  ;;  %5471 = vmatprep.subr.bf16.mxu1 %v9432_v19 }
 0x186   : > { %5441 = vmatpush1.bf16.msra.mxu0 %v9433_v36  ;;  %5473 = vmatpush1.bf16.msra.mxu1 %v9434_v37  ;;  %v9444_v36 = vld [vmem:[#allocation63_spill] sm:$0xff]  ;;  %v9445_v37 = vld [vmem:[#allocation64_spill] sm:$0xff] }
 0x187   : > { %5443 = vmatprep.subr.bf16.mxu0 %v9435_v27  ;;  %5475 = vmatprep.subr.bf16.mxu1 %v9436_v51  ;;  %v9446_v27 = vld [vmem:[#allocation65_spill] sm:$0xff]  ;;  %v9447_v51 = vld [vmem:[#allocation66_spill] sm:$0xff] }
 0x18a   : > { %5445 = vmatpush1.bf16.msra.mxu0 %v9437_v30  ;;  %5477 = vmatpush1.bf16.msra.mxu1 %v9438_v10  ;;  %v9448_v30 = vld [vmem:[#allocation67_spill] sm:$0xff] }
 0x18b   : > { %5447 = vmatprep.subr.bf16.mxu0 %v9439_v8  ;;  %5479 = vmatprep.subr.bf16.mxu1 %v9440_v57  ;;  %v865_v57 = vld [vmem:[%s9129_s6] sm:$0xf] }
 0x18c   : > { %v8265_v24 = vrot.slane %v865_v57, %v9453_v3 }
 0x18e   : > { %5449 = vmatpush1.bf16.msra.mxu0 %v9441_v12  ;;  %5481 = vmatpush1.bf16.msra.mxu1 %v9442_v9  ;;  %v9449_v12 = vsub.s32 0, %v8150_v0  ;;  %9454 = vst [vmem:[#allocation102_spill] sm:$0xff] %v8265_v24 }
 0x18f   : > { %5451 = vmatprep.subr.bf16.mxu0 %v9443_v49  ;;  %5483 = vmatprep.subr.bf16.mxu1 %v9444_v36  ;;  %v9451_v49 = vsub.s32 1, %v8150_v0 }
 0x190   : > { %v8255_v8 = vrot.slane %v865_v57, %v9449_v12 }
 0x191   : > { %v8259_v9 = vrot.slane %v865_v57, %v9451_v49  ;;  %v9455_v49 = vsub.s32 2, %v8150_v0 }
 0x192   : > { %5453 = vmatpush1.bf16.msra.mxu0 %v9445_v37  ;;  %5485 = vmatpush1.bf16.msra.mxu1 %v9446_v27  ;;  %9450 = vst [vmem:[#allocation100_spill] sm:$0xff] %v8255_v8 }
 0x193   : > { %5487 = vmatprep.subr.bf16.mxu0 %v9447_v51  ;;  %5519 = vmatprep.subr.bf16.mxu1 %v9448_v30  ;;  %9452 = vst [vmem:[#allocation101_spill] sm:$0xff] %v8259_v9  ;;  %v8270_v54 = vrot.slane %v865_v57, %v9455_v49 }
 0x195   : > { %9456 = vst [vmem:[#allocation103_spill] sm:$0xff] %v8270_v54 }
 0x228   : > { %v1252_v36 = vpop.f32.mrb[16].mxu0  ;;  %v1323_v37 = vpop.f32.mrb[18].mxu1 }
 0x229   : > { %v1349_v27 = vadd.f32 %v8255_v8, %v1252_v36  ;;  %v1254_v10 = vpop.f32.mrb[17].mxu0  ;;  %v1325_v51 = vpop.f32.mrb[19].mxu1  ;;  %v1351_v36 = vadd.f32 %v8270_v54, %v1323_v37  ;;  %v9457_v54 = vld [vmem:[#allocation98_spill] sm:$0xff] }
 0x22a   : > { %v1350_v30 = vadd.f32 %v8259_v9, %v1254_v10  ;;  %v1352_v12 = vadd.f32 %v8265_v24, %v1325_v51 }
 0x22b   : > { %v5034_v19 = vmul.f32 -1.442695, %v1349_v27 }
 0x22c   : > { %v5035_v18 = vmul.f32 -1.442695, %v1350_v30  ;;  %v5036_v44 = vmul.f32 -1.442695, %v1352_v12 }
 0x22d   : > { %6856 = vpow2.f32 %v5034_v19 }
 0x22e   : > { %6858 = vpow2.f32 %v5035_v18  ;;  %v869_v18 = vld [vmem:[#allocation5] sm:$0xff] }
 0x22f   : > { %6860 = vpow2.f32 %v5036_v44 }
 0x230   : > { %6862 = vtanh.f32 %v1351_v36 }
 0x237   : > { %v6857_v8 = vpop.eup %6856 }
 0x238   : > { %v6859_v35 = vpop.eup %6858  ;;  %v1356_v10 = vadd.f32 1.0, %v6857_v8 }
 0x239   : > { %v1362_v27 = vadd.f32 1.0, %v6859_v35  ;;  %v6861_v3 = vpop.eup %6860  ;;  %v9458_v35 = vld [vmem:[#allocation99_spill] sm:$0xff] }
 0x23a   : > { %6864 = vrcp.f32 %v1356_v10  ;;  %v6863_v19 = vpop.eup %6862  ;;  %v1369_v0 = vadd.f32 1.0, %v6861_v3 }
 0x23b   : > { %6866 = vrcp.f32 %v1362_v27 }
 0x23c   : > { %6868 = vrcp.f32 %v1369_v0 }
 0x244   : > { %v6865_v30 = vpop.eup %6864 }
 0x245   : > { %v6867_v51 = vpop.eup %6866  ;;  %v1373_v24 = vmul.f32 %v6865_v30, %v6863_v19 }
 0x246   : > { %v1372_v57 = vmul.f32 %v6867_v51, %v869_v18  ;;  %v6869_v19 = vpop.eup %6868 }
 0x248   : > { %v8273_v49 = vadd.f32 %v1373_v24, %v1372_v57  ;;  %v1449_v12 = vpop.f32.mrb[2].mxu0  ;;  %v1520_v37 = vpop.f32.mrb[2].mxu1 }
 0x249   : > { %v6738_v8 = vadd.f32 %v1449_v12, %v9457_v54  ;;  %v1451_v44 = vpop.f32.mrb[3].mxu0  ;;  %v1522_v36 = vpop.f32.mrb[3].mxu1  ;;  %v6754_v30 = vadd.f32 %v1520_v37, %v8171_v41  ;;  %v9464_v37 = vld [vmem:[#allocation72_spill] sm:$0xff] }
 0x24a   : > { %v6739_v10 = vadd.f32 %v1451_v44, %v9458_v35  ;;  %6870 = vtanh.f32 %v8273_v49  ;;  %v6755_v3 = vadd.f32 %v1522_v36, %v8175_v16  ;;  %v9462_v36 = vld [vmem:[#allocation70_spill] sm:$0xff] }
 0x24b   : > { %v5037_v27 = vmul.f32 -1.442695, %v6738_v8  ;;  %v9460_v8 = vld [vmem:[#allocation68_spill] sm:$0xff] }
 0x24c   : > { %v5038_v9 = vmul.f32 -1.442695, %v6739_v10  ;;  %v5039_v18 = vmul.f32 -1.442695, %v6755_v3  ;;  %v9463_v10 = vld [vmem:[#allocation71_spill] sm:$0xff]  ;;  %v9466_v3 = vld [vmem:[#allocation74_spill] sm:$0xff] }
 0x24d   : > { %6872 = vpow2.f32 %v5037_v27  ;;  %v9465_v27 = vld [vmem:[#allocation73_spill] sm:$0xff] }
 0x24e   : > { %6874 = vpow2.f32 %v5038_v9  ;;  %v9461_v9 = vld [vmem:[#allocation69_spill] sm:$0xff] }
 0x24f   : > { %6876 = vpow2.f32 %v5039_v18  ;;  %v9469_v18 = vld [vmem:[#allocation77_spill] sm:$0xff] }
 0x250   : > { %6878 = vtanh.f32 %v6754_v30  ;;  %v9470_v30 = vld [vmem:[#allocation78_spill] sm:$0xff] }
 0x254   : > { %v6871_v24 = vpop.eup %6870 }
 0x255   : > { %v8280_v51 = vmul.f32 %v6871_v24, %v6869_v19  ;;  %v9467_v19 = vld [vmem:[#allocation75_spill] sm:$0xff]  ;;  %v9468_v24 = vld [vmem:[#allocation76_spill] sm:$0xff] }
 0x257   : > { %9459 = vst [vmem:[#allocation98_spill] sm:$0xff] %v8280_v51  ;;  %v6873_v0 = vpop.eup %6872  ;;  %1618 = vmatmul.mubr.f32.vlgmr.msra.gmra.mrb[18].mxu0 %v8280_v51  ;;  %1689 = vmatmul.mubr.f32.vlgmr.msra.gmra.mrb[20].mxu1 %v8280_v51 }
 0x258   : > { %v6875_v57 = vpop.eup %6874  ;;  %v1532_v12 = vadd.f32 1.0, %v6873_v0  ;;  %5489 = vmatpush1.bf16.msra.mxu0 %v9460_v8  ;;  %5521 = vmatpush1.bf16.msra.mxu1 %v9461_v9  ;;  %v9471_v0 = vld [vmem:[#allocation79_spill] sm:$0xff]  ;;  %v9478_v9 = vld [vmem:[#allocation86_spill] sm:$0xff] }
 0x259   : > { %v1538_v44 = vadd.f32 1.0, %v6875_v57  ;;  %5491 = vmatprep.subr.bf16.mxu0 %v9462_v36  ;;  %5523 = vmatprep.subr.bf16.mxu1 %v9463_v10  ;;  %v6877_v57 = vpop.eup %6876  ;;  %v9474_v36 = vld [vmem:[#allocation82_spill] sm:$0xff] }
 0x25a   : > { %6880 = vrcp.f32 %v1532_v12  ;;  %1759 = vmatprep.mubr.f32.mxu0 %v9401_v48  ;;  %1830 = vmatprep.mubr.f32.mxu1 %v9401_v48  ;;  %v6879_v12 = vpop.eup %6878 }
 0x25b   : > { %6882 = vrcp.f32 %v1538_v44  ;;  %v9472_v44 = vld [vmem:[#allocation80_spill] sm:$0xff] }
 0x25c   : > { %5493 = vmatpush1.bf16.msra.mxu0 %v9464_v37  ;;  %5525 = vmatpush1.bf16.msra.mxu1 %v9465_v27  ;;  %v9473_v37 = vld [vmem:[#allocation81_spill] sm:$0xff] }
 0x25d   : > { %5495 = vmatprep.subr.bf16.mxu0 %v9466_v3  ;;  %5527 = vmatprep.subr.bf16.mxu1 %v9467_v19  ;;  %v1545_v3 = vadd.f32 1.0, %v6877_v57  ;;  %v9475_v19 = vld [vmem:[#allocation83_spill] sm:$0xff]  ;;  %v9481_v57 = vld [vmem:[#allocation89_spill] sm:$0xff] }
 0x25f   : > { %6884 = vrcp.f32 %v1545_v3  ;;  %v9487_v3 = vld [vmem:[#allocation95_spill] sm:$0xff] }
 0x260   : > { %5497 = vmatpush1.bf16.msra.mxu0 %v9468_v24  ;;  %5529 = vmatpush1.bf16.msra.mxu1 %v9469_v18 }
 0x261   : > { %5499 = vmatprep.subr.bf16.mxu0 %v9470_v30  ;;  %5531 = vmatprep.subr.bf16.mxu1 %v9471_v0  ;;  %v9476_v30 = vld [vmem:[#allocation84_spill] sm:$0xff]  ;;  %v9477_v0 = vld [vmem:[#allocation85_spill] sm:$0xff] }
 0x264   : > { %v6881_v51 = vpop.eup %6880  ;;  %5501 = vmatpush1.bf16.msra.mxu0 %v9472_v44  ;;  %5533 = vmatpush1.bf16.msra.mxu1 %v9473_v37  ;;  %v9479_v44 = vld [vmem:[#allocation87_spill] sm:$0xff] }
 0x265   : > { %v6883_v27 = vpop.eup %6882  ;;  %v1549_v10 = vmul.f32 %v6881_v51, %v6879_v12  ;;  %5503 = vmatprep.subr.bf16.mxu0 %v9474_v36  ;;  %5535 = vmatprep.subr.bf16.mxu1 %v9475_v19  ;;  %v9480_v51 = vld [vmem:[#allocation88_spill] sm:$0xff]  ;;  %v9482_v12 = vld [vmem:[#allocation90_spill] sm:$0xff] }
 0x266   : > { %v1548_v18 = vmul.f32 %v6883_v27, %v8179_v1  ;;  %v9483_v1 = vld [vmem:[#allocation91_spill] sm:$0xff]  ;;  %v9485_v27 = vld [vmem:[#allocation93_spill] sm:$0xff] }
 0x268   : > { %v8303_v24 = vadd.f32 %v1549_v10, %v1548_v18  ;;  %5505 = vmatpush1.bf16.msra.mxu0 %v9476_v30  ;;  %5537 = vmatpush1.bf16.msra.mxu1 %v9477_v0  ;;  %v9484_v10 = vld [vmem:[#allocation92_spill] sm:$0xff]  ;;  %v9486_v18 = vld [vmem:[#allocation94_spill] sm:$0xff]  ;;  %v9489_v30 = vld [vmem:[#allocation97_spill] sm:$0xff] }
 0x269   : > { %5507 = vmatprep.subr.bf16.mxu0 %v9478_v9  ;;  %5539 = vmatprep.subr.bf16.mxu1 %v9479_v44  ;;  %v6885_v9 = vpop.eup %6884  ;;  %v9488_v0 = vld [vmem:[#allocation96_spill] sm:$0xff] }
 0x26a   : > { %6886 = vtanh.f32 %v8303_v24 }
 0x26c   : > { %5509 = vmatpush1.bf16.msra.mxu0 %v9480_v51  ;;  %5541 = vmatpush1.bf16.msra.mxu1 %v9481_v57  ;;  %v9490_v57 = vld [vmem:[#allocation8_spill] sm:$0xff] }
 0x26d   : > { %5511 = vmatprep.subr.bf16.mxu0 %v9482_v12  ;;  %5543 = vmatprep.subr.bf16.mxu1 %v9483_v1  ;;  %v9491_v12 = vld [vmem:[#allocation21_spill] sm:$0xff] }
 0x270   : > { %5513 = vmatpush1.bf16.msra.mxu0 %v9484_v10  ;;  %5545 = vmatpush1.bf16.msra.mxu1 %v9485_v27 }
 0x271   : > { %5515 = vmatprep.subr.bf16.mxu0 %v9486_v18  ;;  %5547 = vmatprep.subr.bf16.mxu1 %v9487_v3 }
 0x274   : > { %v6887_v44 = vpop.eup %6886  ;;  %5517 = vmatpush1.bf16.msra.mxu0 %v9488_v0  ;;  %5549 = vmatpush1.bf16.msra.mxu1 %v9489_v30 }
 0x275   : > { %v1552_v51 = vmul.f32 %v6887_v44, %v6885_v9  ;;  %5551 = vmatprep.subr.bf16.mxu0 %v9490_v57  ;;  %5583 = vmatprep.subr.bf16.mxu1 %v9491_v12  ;;  %v9492_v9 = vld [vmem:[#allocation45_spill] sm:$0xff]  ;;  %v9493_v44 = vld [vmem:[#allocation46_spill] sm:$0xff] }
 0x277   : > { %1760 = vmatmul.mubr.f32.vlgmr.msra.gmra.mrb[18].mxu0 %v1552_v51  ;;  %1831 = vmatmul.mubr.f32.vlgmr.msra.gmra.mrb[20].mxu1 %v1552_v51 }
 0x278   : > { %5553 = vmatpush1.bf16.msra.mxu0 %v7223_v22  ;;  %5585 = vmatpush1.bf16.msra.mxu1 %v7434_v31 }
 0x279   : > { %5555 = vmatprep.subr.bf16.mxu0 %v7226_v23  ;;  %5587 = vmatprep.subr.bf16.mxu1 %v7437_v32 }
 0x27a   : > { %1936 = vmatprep.mubr.f32.mxu0 %v9401_v48  ;;  %2007 = vmatprep.mubr.f32.mxu1 %v9401_v48 }
 0x27c   : > { %5557 = vmatpush1.bf16.msra.mxu0 %v7247_v29  ;;  %5589 = vmatpush1.bf16.msra.mxu1 %v7455_v38 }
 0x27d   : > { %5559 = vmatprep.subr.bf16.mxu0 %v7259_v33  ;;  %5591 = vmatprep.subr.bf16.mxu1 %v7459_v39 }
 0x280   : > { %5561 = vmatpush1.bf16.msra.mxu0 %v7286_v43  ;;  %5593 = vmatpush1.bf16.msra.mxu1 %v7476_v45 }
 0x281   : > { %5563 = vmatprep.subr.bf16.mxu0 %v7298_v47  ;;  %5595 = vmatprep.subr.bf16.mxu1 %v7479_v46 }
 0x284   : > { %5565 = vmatpush1.bf16.msra.mxu0 %v7317_v55  ;;  %5597 = vmatpush1.bf16.msra.mxu1 %v7496_v52 }
 0x285   : > { %5567 = vmatprep.subr.bf16.mxu0 %v7320_v56  ;;  %5599 = vmatprep.subr.bf16.mxu1 %v7499_v53 }
 0x288   : > { %5569 = vmatpush1.bf16.msra.mxu0 %v7338_v62  ;;  %5601 = vmatpush1.bf16.msra.mxu1 %v7516_v60 }
 0x289   : > { %5571 = vmatprep.subr.bf16.mxu0 %v7341_v63  ;;  %5603 = vmatprep.subr.bf16.mxu1 %v7519_v61 }
 0x28c   : > { %5573 = vmatpush1.bf16.msra.mxu0 %v7362_v5  ;;  %5605 = vmatpush1.bf16.msra.mxu1 %v7534_v4 }
 0x28d   : > { %5575 = vmatprep.subr.bf16.mxu0 %v7365_v6  ;;  %5607 = vmatprep.subr.bf16.mxu1 %v7537_v7 }
 0x290   : > { %5577 = vmatpush1.bf16.msra.mxu0 %v7386_v13  ;;  %5609 = vmatpush1.bf16.msra.mxu1 %v7552_v15 }
 0x291   : > { %5579 = vmatprep.subr.bf16.mxu0 %v7389_v14  ;;  %5611 = vmatprep.subr.bf16.mxu1 %v7555_v17 }
 0x294   : > { %5581 = vmatpush1.bf16.msra.mxu0 %v7410_v21  ;;  %5613 = vmatpush1.bf16.msra.mxu1 %v7564_v20 }
 0x295   : > { %5615 = vmatprep.subr.bf16.mxu0 %v7579_v28  ;;  %5647 = vmatprep.subr.bf16.mxu1 %v7584_v34  ;;  %v9516_v28 = vld [vmem:[#allocation101_spill] sm:$0xff] }
 0x297   : > { %1937 = vmatmul.mubr.f32.vlgmr.msra.gmra.mrb[4].mxu0 %v1552_v51  ;;  %2008 = vmatmul.mubr.f32.vlgmr.msra.gmra.mrb[4].mxu1 %v1552_v51  ;;  %v9494_v51 = vld [vmem:[#allocation47_spill] sm:$0xff] }
 0x298   : > { %5617 = vmatpush1.bf16.msra.mxu0 %v7597_v40  ;;  %5649 = vmatpush1.bf16.msra.mxu1 %v7602_v42  ;;  %v9497_v42 = vld [vmem:[#allocation50_spill] sm:$0xff]  ;;  %v9515_v40 = vld [vmem:[#allocation100_spill] sm:$0xff] }
 0x299   : > { %5619 = vmatprep.subr.bf16.mxu0 %v7615_v50  ;;  %5651 = vmatprep.subr.bf16.mxu1 %v7626_v58  ;;  %v9495_v58 = vld [vmem:[#allocation48_spill] sm:$0xff]  ;;  %v9496_v50 = vld [vmem:[#allocation49_spill] sm:$0xff] }
 0x29a   : > { %2106 = vmatprep.mubr.f32.mxu0 %v9401_v48  ;;  %2177 = vmatprep.mubr.f32.mxu1 %v9401_v48 }
 0x29c   : > { %5621 = vmatpush1.bf16.msra.mxu0 %v7628_v59  ;;  %5653 = vmatpush1.bf16.msra.mxu1 %v7637_v2  ;;  %v9498_v59 = vld [vmem:[#allocation51_spill] sm:$0xff]  ;;  %v9499_v2 = vld [vmem:[#allocation52_spill] sm:$0xff] }
 0x29d   : > { %5623 = vmatprep.subr.bf16.mxu0 %v7651_v11  ;;  %5655 = vmatprep.subr.bf16.mxu1 %v7662_v25  ;;  %v9500_v11 = vld [vmem:[#allocation53_spill] sm:$0xff]  ;;  %v9501_v25 = vld [vmem:[#allocation54_spill] sm:$0xff] }
 0x2a0   : > { %5625 = vmatpush1.bf16.msra.mxu0 %v7664_v26  ;;  %5657 = vmatpush1.bf16.msra.mxu1 %v9492_v9  ;;  %v9502_v26 = vld [vmem:[#allocation55_spill] sm:$0xff]  ;;  %v9503_v9 = vld [vmem:[#allocation56_spill] sm:$0xff] }
 0x2a1   : > { %5627 = vmatprep.subr.bf16.mxu0 %v9493_v44  ;;  %5659 = vmatprep.subr.bf16.mxu1 %v9494_v51  ;;  %v9504_v44 = vld [vmem:[#allocation57_spill] sm:$0xff]  ;;  %v9505_v51 = vld [vmem:[#allocation58_spill] sm:$0xff] }
 0x2a4   : > { %5629 = vmatpush1.bf16.msra.mxu0 %v9495_v58  ;;  %5661 = vmatpush1.bf16.msra.mxu1 %v9496_v50  ;;  %v9506_v58 = vld [vmem:[#allocation59_spill] sm:$0xff]  ;;  %v9507_v50 = vld [vmem:[#allocation60_spill] sm:$0xff] }
 0x2a5   : > { %5631 = vmatprep.subr.bf16.mxu0 %v9497_v42  ;;  %5663 = vmatprep.subr.bf16.mxu1 %v9498_v59  ;;  %v9508_v42 = vld [vmem:[#allocation61_spill] sm:$0xff]  ;;  %v9509_v59 = vld [vmem:[#allocation62_spill] sm:$0xff] }
 0x2a8   : > { %5633 = vmatpush1.bf16.msra.mxu0 %v9499_v2  ;;  %5665 = vmatpush1.bf16.msra.mxu1 %v9500_v11  ;;  %v9510_v2 = vld [vmem:[#allocation63_spill] sm:$0xff]  ;;  %v9511_v11 = vld [vmem:[#allocation64_spill] sm:$0xff] }
 0x2a9   : > { %5635 = vmatprep.subr.bf16.mxu0 %v9501_v25  ;;  %5667 = vmatprep.subr.bf16.mxu1 %v9502_v26  ;;  %v9512_v25 = vld [vmem:[#allocation65_spill] sm:$0xff]  ;;  %v9513_v26 = vld [vmem:[#allocation66_spill] sm:$0xff] }
 0x2ac   : > { %5637 = vmatpush1.bf16.msra.mxu0 %v9503_v9  ;;  %5669 = vmatpush1.bf16.msra.mxu1 %v9504_v44  ;;  %v9514_v9 = vld [vmem:[#allocation67_spill] sm:$0xff] }
 0x2ad   : > { %5639 = vmatprep.subr.bf16.mxu0 %v9505_v51  ;;  %5671 = vmatprep.subr.bf16.mxu1 %v9506_v58 }
 0x2b0   : > { %5641 = vmatpush1.bf16.msra.mxu0 %v9507_v50  ;;  %5673 = vmatpush1.bf16.msra.mxu1 %v9508_v42 }
 0x2b1   : > { %5643 = vmatprep.subr.bf16.mxu0 %v9509_v59  ;;  %5675 = vmatprep.subr.bf16.mxu1 %v9510_v2  ;;  %v9517_v2 = vld [vmem:[#allocation102_spill] sm:$0xff] }
 0x2b4   : > { %5645 = vmatpush1.bf16.msra.mxu0 %v9511_v11  ;;  %5677 = vmatpush1.bf16.msra.mxu1 %v9512_v25  ;;  %v9518_v25 = vld [vmem:[#allocation103_spill] sm:$0xff] }
 0x2b5   : > { %5679 = vmatprep.subr.bf16.mxu0 %v9513_v26  ;;  %5711 = vmatprep.subr.bf16.mxu1 %v9514_v9 }
 0x34a   : > { %v1761_v44 = vpop.f32.mrb[18].mxu0  ;;  %v1832_v51 = vpop.f32.mrb[20].mxu1 }
 0x34b   : > { %v1837_v58 = vadd.f32 %v1761_v44, %v9515_v40  ;;  %v1763_v34 = vpop.f32.mrb[19].mxu0  ;;  %v1834_v50 = vpop.f32.mrb[21].mxu1  ;;  %v1839_v17 = vadd.f32 %v1832_v51, %v9518_v25 }
 0x34c   : > { %v1838_v42 = vadd.f32 %v1763_v34, %v9516_v28  ;;  %v1840_v11 = vadd.f32 %v1834_v50, %v9517_v2 }
 0x34d   : > { %v5040_v20 = vmul.f32 -1.442695, %v1837_v58 }
 0x34e   : > { %v5041_v59 = vmul.f32 -1.442695, %v1838_v42  ;;  %v5042_v21 = vmul.f32 -1.442695, %v1840_v11 }
 0x34f   : > { %6888 = vpow2.f32 %v5040_v20 }
 0x350   : > { %6890 = vpow2.f32 %v5041_v59 }
 0x351   : > { %6892 = vpow2.f32 %v5042_v21 }
 0x352   : > { %6894 = vtanh.f32 %v1839_v17 }
 0x359   : > { %v6889_v26 = vpop.eup %6888 }
 0x35a   : > { %v6891_v14 = vpop.eup %6890  ;;  %v1844_v9 = vadd.f32 1.0, %v6889_v26 }
 0x35b   : > { %v1850_v15 = vadd.f32 1.0, %v6891_v14  ;;  %v6893_v44 = vpop.eup %6892 }
 0x35c   : > { %6896 = vrcp.f32 %v1844_v9  ;;  %v6895_v40 = vpop.eup %6894  ;;  %v1857_v20 = vadd.f32 1.0, %v6893_v44 }
 0x35d   : > { %6898 = vrcp.f32 %v1850_v15 }
 0x35e   : > { %6900 = vrcp.f32 %v1857_v20 }
 0x366   : > { %v6897_v34 = vpop.eup %6896 }
 0x367   : > { %v6899_v58 = vpop.eup %6898  ;;  %v1861_v42 = vmul.f32 %v6897_v34, %v6895_v40 }
 0x368   : > { %v1860_v59 = vmul.f32 %v6899_v58, %v8273_v49  ;;  %v6901_v49 = vpop.eup %6900 }
 0x36a   : > { %v8395_v50 = vadd.f32 %v1861_v42, %v1860_v59  ;;  %v1938_v11 = vpop.f32.mrb[4].mxu0  ;;  %v2009_v51 = vpop.f32.mrb[4].mxu1 }
 0x36b   : > { %v6740_v26 = vadd.f32 %v1938_v11, %v9457_v54  ;;  %v1940_v21 = vpop.f32.mrb[5].mxu0  ;;  %v2011_v17 = vpop.f32.mrb[5].mxu1  ;;  %v6756_v58 = vadd.f32 %v2009_v51, %v8171_v41  ;;  %v9523_v51 = vld [vmem:[#allocation72_spill] sm:$0xff] }
 0x36c   : > { %v6741_v14 = vadd.f32 %v1940_v21, %v9458_v35  ;;  %6902 = vtanh.f32 %v8395_v50  ;;  %v6757_v40 = vadd.f32 %v2011_v17, %v8175_v16  ;;  %v9521_v17 = vld [vmem:[#allocation70_spill] sm:$0xff] }
 0x36d   : > { %v5043_v15 = vmul.f32 -1.442695, %v6740_v26  ;;  %v9520_v26 = vld [vmem:[#allocation69_spill] sm:$0xff] }
 0x36e   : > { %v5044_v9 = vmul.f32 -1.442695, %v6741_v14  ;;  %v5045_v34 = vmul.f32 -1.442695, %v6757_v40  ;;  %v9522_v14 = vld [vmem:[#allocation71_spill] sm:$0xff] }
 0x36f   : > { %6904 = vpow2.f32 %v5043_v15  ;;  %v9524_v15 = vld [vmem:[#allocation73_spill] sm:$0xff]  ;;  %v9526_v40 = vld [vmem:[#allocation75_spill] sm:$0xff] }
 0x370   : > { %6906 = vpow2.f32 %v5044_v9  ;;  %v9525_v9 = vld [vmem:[#allocation74_spill] sm:$0xff] }
 0x371   : > { %6908 = vpow2.f32 %v5045_v34  ;;  %v9529_v34 = vld [vmem:[#allocation78_spill] sm:$0xff] }
 0x372   : > { %6910 = vtanh.f32 %v6756_v58  ;;  %v9530_v58 = vld [vmem:[#allocation79_spill] sm:$0xff] }
 0x376   : > { %v6903_v44 = vpop.eup %6902 }
 0x377   : > { %v8402_v42 = vmul.f32 %v6903_v44, %v6901_v49  ;;  %v9527_v49 = vld [vmem:[#allocation76_spill] sm:$0xff]  ;;  %v9528_v44 = vld [vmem:[#allocation77_spill] sm:$0xff] }
 0x379   : > { %9519 = vst [vmem:[#allocation99_spill] sm:$0xff] %v8402_v42  ;;  %v6905_v20 = vpop.eup %6904  ;;  %2107 = vmatmul.mubr.f32.vlgmr.msra.gmra.mrb[20].mxu0 %v8402_v42  ;;  %2178 = vmatmul.mubr.f32.vlgmr.msra.gmra.mrb[22].mxu1 %v8402_v42 }
 0x37a   : > { %v6907_v59 = vpop.eup %6906  ;;  %v2021_v11 = vadd.f32 1.0, %v6905_v20  ;;  %5681 = vmatpush1.bf16.msra.mxu0 %v9460_v8  ;;  %5713 = vmatpush1.bf16.msra.mxu1 %v9520_v26 }
 0x37b   : > { %v2027_v21 = vadd.f32 1.0, %v6907_v59  ;;  %5683 = vmatprep.subr.bf16.mxu0 %v9521_v17  ;;  %5715 = vmatprep.subr.bf16.mxu1 %v9522_v14  ;;  %v6909_v20 = vpop.eup %6908 }
 0x37c   : > { %6912 = vrcp.f32 %v2021_v11  ;;  %2248 = vmatprep.mubr.f32.mxu0 %v9401_v48  ;;  %2319 = vmatprep.mubr.f32.mxu1 %v9401_v48  ;;  %v6911_v59 = vpop.eup %6910 }
 0x37d   : > { %6914 = vrcp.f32 %v2027_v21  ;;  %v9531_v21 = vld [vmem:[#allocation80_spill] sm:$0xff] }
 0x37e   : > { %5685 = vmatpush1.bf16.msra.mxu0 %v9523_v51  ;;  %5717 = vmatpush1.bf16.msra.mxu1 %v9524_v15 }
 0x37f   : > { %5687 = vmatprep.subr.bf16.mxu0 %v9525_v9  ;;  %5719 = vmatprep.subr.bf16.mxu1 %v9526_v40  ;;  %v2034_v9 = vadd.f32 1.0, %v6909_v20  ;;  %v9534_v40 = vld [vmem:[#allocation86_spill] sm:$0xff]  ;;  %v9536_v20 = vld [vmem:[#allocation88_spill] sm:$0xff] }
 0x381   : > { %6916 = vrcp.f32 %v2034_v9  ;;  %v9539_v9 = vld [vmem:[#allocation31_spill] sm:$0xff] }
 0x382   : > { %5689 = vmatpush1.bf16.msra.mxu0 %v9527_v49  ;;  %5721 = vmatpush1.bf16.msra.mxu1 %v9528_v44 }
 0x383   : > { %5691 = vmatprep.subr.bf16.mxu0 %v9529_v34  ;;  %5723 = vmatprep.subr.bf16.mxu1 %v9530_v58  ;;  %v9532_v34 = vld [vmem:[#allocation84_spill] sm:$0xff]  ;;  %v9533_v58 = vld [vmem:[#allocation85_spill] sm:$0xff] }
 0x386   : > { %v6913_v11 = vpop.eup %6912  ;;  %5693 = vmatpush1.bf16.msra.mxu0 %v9531_v21  ;;  %5725 = vmatpush1.bf16.msra.mxu1 %v9473_v37  ;;  %v9535_v21 = vld [vmem:[#allocation87_spill] sm:$0xff] }
 0x387   : > { %v6915_v42 = vpop.eup %6914  ;;  %v2038_v15 = vmul.f32 %v6913_v11, %v6911_v59  ;;  %5695 = vmatprep.subr.bf16.mxu0 %v9474_v36  ;;  %5727 = vmatprep.subr.bf16.mxu1 %v9475_v19  ;;  %v9537_v59 = vld [vmem:[#allocation89_spill] sm:$0xff]  ;;  %v9538_v11 = vld [vmem:[#allocation90_spill] sm:$0xff] }
 0x388   : > { %v2037_v44 = vmul.f32 %v6915_v42, %v8303_v24 }
 0x38a   : > { %v8425_v49 = vadd.f32 %v2038_v15, %v2037_v44  ;;  %5697 = vmatpush1.bf16.msra.mxu0 %v9532_v34  ;;  %5729 = vmatpush1.bf16.msra.mxu1 %v9533_v58  ;;  %v9540_v44 = vld [vmem:[#allocation19_spill] sm:$0xff] }
 0x38b   : > { %5699 = vmatprep.subr.bf16.mxu0 %v9534_v40  ;;  %5731 = vmatprep.subr.bf16.mxu1 %v9535_v21  ;;  %v6917_v24 = vpop.eup %6916 }
 0x38c   : > { %6918 = vtanh.f32 %v8425_v49 }
 0x38e   : > { %5701 = vmatpush1.bf16.msra.mxu0 %v9536_v20  ;;  %5733 = vmatpush1.bf16.msra.mxu1 %v9537_v59 }
 0x38f   : > { %5703 = vmatprep.subr.bf16.mxu0 %v9538_v11  ;;  %5735 = vmatprep.subr.bf16.mxu1 %v9483_v1 }
 0x392   : > { %5705 = vmatpush1.bf16.msra.mxu0 %v9484_v10  ;;  %5737 = vmatpush1.bf16.msra.mxu1 %v9485_v27 }
 0x393   : > { %5707 = vmatprep.subr.bf16.mxu0 %v9486_v18  ;;  %5739 = vmatprep.subr.bf16.mxu1 %v9487_v3 }
 0x396   : > { %v6919_v42 = vpop.eup %6918  ;;  %5709 = vmatpush1.bf16.msra.mxu0 %v9488_v0  ;;  %5741 = vmatpush1.bf16.msra.mxu1 %v9489_v30 }
 0x397   : > { %5743 = vmatprep.subr.bf16.mxu0 %v9490_v57  ;;  %5775 = vmatprep.subr.bf16.mxu1 %v9491_v12  ;;  %v2041_v15 = vmul.f32 %v6919_v42, %v6917_v24  ;;  %v9541_v24 = vld [vmem:[#allocation32_spill] sm:$0xff] }
 0x398   : > { %v9542_v42 = vld [vmem:[#allocation20_spill] sm:$0xff] }
 0x399   : > { %2249 = vmatmul.mubr.f32.vlgmr.msra.gmra.mrb[20].mxu0 %v2041_v15  ;;  %2320 = vmatmul.mubr.f32.vlgmr.msra.gmra.mrb[22].mxu1 %v2041_v15 }
 0x39a   : > { %5745 = vmatpush1.bf16.msra.mxu0 %v7223_v22  ;;  %5777 = vmatpush1.bf16.msra.mxu1 %v7434_v31 }
 0x39b   : > { %5747 = vmatprep.subr.bf16.mxu0 %v7226_v23  ;;  %5779 = vmatprep.subr.bf16.mxu1 %v7437_v32 }
 0x39c   : > { %2425 = vmatprep.mubr.f32.mxu0 %v9401_v48  ;;  %2496 = vmatprep.mubr.f32.mxu1 %v9401_v48 }
 0x39e   : > { %5749 = vmatpush1.bf16.msra.mxu0 %v7247_v29  ;;  %5781 = vmatpush1.bf16.msra.mxu1 %v7455_v38 }
 0x39f   : > { %5751 = vmatprep.subr.bf16.mxu0 %v7259_v33  ;;  %5783 = vmatprep.subr.bf16.mxu1 %v7459_v39 }
 0x3a2   : > { %5753 = vmatpush1.bf16.msra.mxu0 %v7286_v43  ;;  %5785 = vmatpush1.bf16.msra.mxu1 %v7476_v45 }
 0x3a3   : > { %5755 = vmatprep.subr.bf16.mxu0 %v7298_v47  ;;  %5787 = vmatprep.subr.bf16.mxu1 %v7479_v46 }
 0x3a6   : > { %5757 = vmatpush1.bf16.msra.mxu0 %v7317_v55  ;;  %5789 = vmatpush1.bf16.msra.mxu1 %v7496_v52 }
 0x3a7   : > { %5759 = vmatprep.subr.bf16.mxu0 %v7320_v56  ;;  %5791 = vmatprep.subr.bf16.mxu1 %v7499_v53 }
 0x3aa   : > { %5761 = vmatpush1.bf16.msra.mxu0 %v7338_v62  ;;  %5793 = vmatpush1.bf16.msra.mxu1 %v7516_v60 }
 0x3ab   : > { %5763 = vmatprep.subr.bf16.mxu0 %v7341_v63  ;;  %5795 = vmatprep.subr.bf16.mxu1 %v7519_v61  ;;  %v9543_v63 = vld [vmem:[#allocation33_spill] sm:$0xff]  ;;  %v9544_v61 = vld [vmem:[#allocation34_spill] sm:$0xff] }
 0x3ae   : > { %5765 = vmatpush1.bf16.msra.mxu0 %v7362_v5  ;;  %5797 = vmatpush1.bf16.msra.mxu1 %v7534_v4  ;;  %v9545_v5 = vld [vmem:[#allocation35_spill] sm:$0xff]  ;;  %v9578_v4 = vld [vmem:[#allocation100_spill] sm:$0xff] }
 0x3af   : > { %5767 = vmatprep.subr.bf16.mxu0 %v7365_v6  ;;  %5799 = vmatprep.subr.bf16.mxu1 %v7537_v7  ;;  %v9546_v6 = vld [vmem:[#allocation36_spill] sm:$0xff]  ;;  %v9547_v7 = vld [vmem:[#allocation37_spill] sm:$0xff] }
 0x3b2   : > { %5769 = vmatpush1.bf16.msra.mxu0 %v7386_v13  ;;  %5801 = vmatpush1.bf16.msra.mxu1 %v9539_v9  ;;  %v9548_v13 = vld [vmem:[#allocation38_spill] sm:$0xff]  ;;  %v9549_v9 = vld [vmem:[#allocation39_spill] sm:$0xff] }
 0x3b3   : > { %5771 = vmatprep.subr.bf16.mxu0 %v9540_v44  ;;  %5803 = vmatprep.subr.bf16.mxu1 %v9541_v24  ;;  %v9559_v24 = vld [vmem:[#allocation49_spill] sm:$0xff]  ;;  %v9560_v44 = vld [vmem:[#allocation50_spill] sm:$0xff] }
 0x3b6   : > { %5773 = vmatpush1.bf16.msra.mxu0 %v9542_v42  ;;  %5805 = vmatpush1.bf16.msra.mxu1 %v9543_v63  ;;  %v9550_v42 = vld [vmem:[#allocation40_spill] sm:$0xff]  ;;  %v9551_v63 = vld [vmem:[#allocation41_spill] sm:$0xff] }
 0x3b7   : > { %5807 = vmatprep.subr.bf16.mxu0 %v9544_v61  ;;  %5839 = vmatprep.subr.bf16.mxu1 %v9545_v5  ;;  %v9552_v61 = vld [vmem:[#allocation42_spill] sm:$0xff]  ;;  %v9553_v5 = vld [vmem:[#allocation43_spill] sm:$0xff] }
 0x3b9   : > { %2426 = vmatmul.mubr.f32.vlgmr.msra.gmra.mrb[6].mxu0 %v2041_v15  ;;  %2497 = vmatmul.mubr.f32.vlgmr.msra.gmra.mrb[6].mxu1 %v2041_v15  ;;  %v9554_v15 = vld [vmem:[#allocation44_spill] sm:$0xff] }
 0x3ba   : > { %5809 = vmatpush1.bf16.msra.mxu0 %v9546_v6  ;;  %5841 = vmatpush1.bf16.msra.mxu1 %v9547_v7  ;;  %v9555_v6 = vld [vmem:[#allocation45_spill] sm:$0xff]  ;;  %v9556_v7 = vld [vmem:[#allocation46_spill] sm:$0xff] }
 0x3bb   : > { %5811 = vmatprep.subr.bf16.mxu0 %v9548_v13  ;;  %5843 = vmatprep.subr.bf16.mxu1 %v9549_v9  ;;  %v9557_v13 = vld [vmem:[#allocation47_spill] sm:$0xff]  ;;  %v9558_v9 = vld [vmem:[#allocation48_spill] sm:$0xff] }
 0x3bc   : > { %2595 = vmatprep.mubr.f32.mxu0 %v9401_v48  ;;  %2666 = vmatprep.mubr.f32.mxu1 %v9401_v48 }
 0x3be   : > { %5813 = vmatpush1.bf16.msra.mxu0 %v9550_v42  ;;  %5845 = vmatpush1.bf16.msra.mxu1 %v9551_v63  ;;  %v9561_v42 = vld [vmem:[#allocation51_spill] sm:$0xff]  ;;  %v9562_v63 = vld [vmem:[#allocation52_spill] sm:$0xff] }
 0x3bf   : > { %5815 = vmatprep.subr.bf16.mxu0 %v9552_v61  ;;  %5847 = vmatprep.subr.bf16.mxu1 %v9553_v5  ;;  %v9563_v61 = vld [vmem:[#allocation53_spill] sm:$0xff]  ;;  %v9564_v5 = vld [vmem:[#allocation54_spill] sm:$0xff] }
 0x3c2   : > { %5817 = vmatpush1.bf16.msra.mxu0 %v9554_v15  ;;  %5849 = vmatpush1.bf16.msra.mxu1 %v9555_v6  ;;  %v9565_v15 = vld [vmem:[#allocation55_spill] sm:$0xff]  ;;  %v9566_v6 = vld [vmem:[#allocation56_spill] sm:$0xff] }
 0x3c3   : > { %5819 = vmatprep.subr.bf16.mxu0 %v9556_v7  ;;  %5851 = vmatprep.subr.bf16.mxu1 %v9557_v13  ;;  %v9567_v7 = vld [vmem:[#allocation57_spill] sm:$0xff]  ;;  %v9568_v13 = vld [vmem:[#allocation58_spill] sm:$0xff] }
 0x3c6   : > { %5821 = vmatpush1.bf16.msra.mxu0 %v9558_v9  ;;  %5853 = vmatpush1.bf16.msra.mxu1 %v9559_v24  ;;  %v9569_v9 = vld [vmem:[#allocation59_spill] sm:$0xff]  ;;  %v9570_v24 = vld [vmem:[#allocation60_spill] sm:$0xff] }
 0x3c7   : > { %5823 = vmatprep.subr.bf16.mxu0 %v9560_v44  ;;  %5855 = vmatprep.subr.bf16.mxu1 %v9561_v42  ;;  %v9571_v44 = vld [vmem:[#allocation61_spill] sm:$0xff]  ;;  %v9572_v42 = vld [vmem:[#allocation62_spill] sm:$0xff] }
 0x3ca   : > { %5825 = vmatpush1.bf16.msra.mxu0 %v9562_v63  ;;  %5857 = vmatpush1.bf16.msra.mxu1 %v9563_v61  ;;  %v9573_v63 = vld [vmem:[#allocation63_spill] sm:$0xff]  ;;  %v9574_v61 = vld [vmem:[#allocation64_spill] sm:$0xff] }
 0x3cb   : > { %5827 = vmatprep.subr.bf16.mxu0 %v9564_v5  ;;  %5859 = vmatprep.subr.bf16.mxu1 %v9565_v15  ;;  %v9575_v5 = vld [vmem:[#allocation65_spill] sm:$0xff]  ;;  %v9576_v15 = vld [vmem:[#allocation66_spill] sm:$0xff] }
 0x3ce   : > { %5829 = vmatpush1.bf16.msra.mxu0 %v9566_v6  ;;  %5861 = vmatpush1.bf16.msra.mxu1 %v9567_v7  ;;  %v9577_v6 = vld [vmem:[#allocation67_spill] sm:$0xff] }
 0x3cf   : > { %5831 = vmatprep.subr.bf16.mxu0 %v9568_v13  ;;  %5863 = vmatprep.subr.bf16.mxu1 %v9569_v9 }
 0x3d2   : > { %5833 = vmatpush1.bf16.msra.mxu0 %v9570_v24  ;;  %5865 = vmatpush1.bf16.msra.mxu1 %v9571_v44 }
 0x3d3   : > { %5835 = vmatprep.subr.bf16.mxu0 %v9572_v42  ;;  %5867 = vmatprep.subr.bf16.mxu1 %v9573_v63 }
 0x3d6   : > { %5837 = vmatpush1.bf16.msra.mxu0 %v9574_v61  ;;  %5869 = vmatpush1.bf16.msra.mxu1 %v9575_v5 }
 0x3d7   : > { %5871 = vmatprep.subr.bf16.mxu0 %v9576_v15  ;;  %5903 = vmatprep.subr.bf16.mxu1 %v9577_v6 }
 0x46c   : > { %v2250_v7 = vpop.f32.mrb[20].mxu0  ;;  %v2321_v13 = vpop.f32.mrb[22].mxu1 }
 0x46d   : > { %v2326_v9 = vadd.f32 %v2250_v7, %v9578_v4  ;;  %v2252_v60 = vpop.f32.mrb[21].mxu0  ;;  %v2323_v24 = vpop.f32.mrb[23].mxu1  ;;  %v2328_v5 = vadd.f32 %v2321_v13, %v9518_v25 }
 0x46e   : > { %v2327_v44 = vadd.f32 %v2252_v60, %v9516_v28  ;;  %v2329_v61 = vadd.f32 %v2323_v24, %v9517_v2 }
 0x46f   : > { %v5046_v62 = vmul.f32 -1.442695, %v2326_v9 }
 0x470   : > { %v5047_v42 = vmul.f32 -1.442695, %v2327_v44  ;;  %v5048_v63 = vmul.f32 -1.442695, %v2329_v61 }
 0x471   : > { %6920 = vpow2.f32 %v5046_v62 }
 0x472   : > { %6922 = vpow2.f32 %v5047_v42 }
 0x473   : > { %6924 = vpow2.f32 %v5048_v63 }
 0x474   : > { %6926 = vtanh.f32 %v2328_v5 }
 0x47b   : > { %v6921_v15 = vpop.eup %6920 }
 0x47c   : > { %v6923_v53 = vpop.eup %6922  ;;  %v2333_v6 = vadd.f32 1.0, %v6921_v15 }
 0x47d   : > { %v2339_v56 = vadd.f32 1.0, %v6923_v53  ;;  %v6925_v7 = vpop.eup %6924 }
 0x47e   : > { %6928 = vrcp.f32 %v2333_v6  ;;  %v6927_v4 = vpop.eup %6926  ;;  %v2346_v62 = vadd.f32 1.0, %v6925_v7 }
 0x47f   : > { %6930 = vrcp.f32 %v2339_v56 }
 0x480   : > { %6932 = vrcp.f32 %v2346_v62 }
 0x488   : > { %v6929_v60 = vpop.eup %6928 }
 0x489   : > { %v6931_v9 = vpop.eup %6930  ;;  %v2350_v44 = vmul.f32 %v6929_v60, %v6927_v4 }
 0x48a   : > { %v2349_v42 = vmul.f32 %v6931_v9, %v8395_v50  ;;  %v6933_v50 = vpop.eup %6932 }
 0x48c   : > { %v8517_v24 = vadd.f32 %v2350_v44, %v2349_v42  ;;  %v2427_v61 = vpop.f32.mrb[6].mxu0  ;;  %v2498_v13 = vpop.f32.mrb[6].mxu1 }
 0x48d   : > { %v6742_v15 = vadd.f32 %v2427_v61, %v9457_v54  ;;  %v2429_v63 = vpop.f32.mrb[7].mxu0  ;;  %v2500_v5 = vpop.f32.mrb[7].mxu1  ;;  %v6758_v9 = vadd.f32 %v2498_v13, %v8171_v41  ;;  %v9580_v13 = vld [vmem:[#allocation73_spill] sm:$0xff] }
 0x48e   : > { %v6743_v6 = vadd.f32 %v2429_v63, %v9458_v35  ;;  %6934 = vtanh.f32 %v8517_v24  ;;  %v6759_v4 = vadd.f32 %v2500_v5, %v8175_v16  ;;  %v9581_v63 = vld [vmem:[#allocation74_spill] sm:$0xff]  ;;  %v9582_v5 = vld [vmem:[#allocation75_spill] sm:$0xff] }
 0x48f   : > { %v5049_v56 = vmul.f32 -1.442695, %v6742_v15 }
 0x490   : > { %v5050_v53 = vmul.f32 -1.442695, %v6743_v6  ;;  %v5051_v60 = vmul.f32 -1.442695, %v6759_v4  ;;  %v9583_v6 = vld [vmem:[#allocation76_spill] sm:$0xff]  ;;  %v9586_v4 = vld [vmem:[#allocation79_spill] sm:$0xff] }
 0x491   : > { %6936 = vpow2.f32 %v5049_v56  ;;  %v9584_v56 = vld [vmem:[#allocation77_spill] sm:$0xff] }
 0x492   : > { %6938 = vpow2.f32 %v5050_v53  ;;  %v9585_v53 = vld [vmem:[#allocation78_spill] sm:$0xff] }
 0x493   : > { %6940 = vpow2.f32 %v5051_v60 }
 0x494   : > { %6942 = vtanh.f32 %v6758_v9  ;;  %v9587_v9 = vld [vmem:[#allocation80_spill] sm:$0xff] }
 0x498   : > { %v6935_v7 = vpop.eup %6934 }
 0x499   : > { %v8524_v44 = vmul.f32 %v6935_v7, %v6933_v50 }
 0x49b   : > { %9579 = vst [vmem:[#allocation68_spill] sm:$0xff] %v8524_v44  ;;  %v6937_v62 = vpop.eup %6936  ;;  %2596 = vmatmul.mubr.f32.vlgmr.msra.gmra.mrb[22].mxu0 %v8524_v44  ;;  %2667 = vmatmul.mubr.f32.vlgmr.msra.gmra.mrb[24].mxu1 %v8524_v44 }
 0x49c   : > { %v6939_v42 = vpop.eup %6938  ;;  %v2510_v61 = vadd.f32 1.0, %v6937_v62  ;;  %5873 = vmatpush1.bf16.msra.mxu0 %v9460_v8  ;;  %5905 = vmatpush1.bf16.msra.mxu1 %v9520_v26 }
 0x49d   : > { %v2516_v15 = vadd.f32 1.0, %v6939_v42  ;;  %5875 = vmatprep.subr.bf16.mxu0 %v9521_v17  ;;  %5907 = vmatprep.subr.bf16.mxu1 %v9522_v14  ;;  %v6941_v50 = vpop.eup %6940 }
 0x49e   : > { %6944 = vrcp.f32 %v2510_v61  ;;  %2737 = vmatprep.mubr.f32.mxu0 %v9401_v48  ;;  %2808 = vmatprep.mubr.f32.mxu1 %v9401_v48  ;;  %v6943_v7 = vpop.eup %6942  ;;  %v2523_v61 = vadd.f32 1.0, %v6941_v50 }
 0x49f   : > { %6946 = vrcp.f32 %v2516_v15 }
 0x4a0   : > { %5877 = vmatpush1.bf16.msra.mxu0 %v9523_v51  ;;  %5909 = vmatpush1.bf16.msra.mxu1 %v9580_v13  ;;  %6948 = vrcp.f32 %v2523_v61  ;;  %v9591_v61 = vld [vmem:[#allocation27_spill] sm:$0xff] }
 0x4a1   : > { %5879 = vmatprep.subr.bf16.mxu0 %v9581_v63  ;;  %5911 = vmatprep.subr.bf16.mxu1 %v9582_v5 }
 0x4a4   : > { %5881 = vmatpush1.bf16.msra.mxu0 %v9583_v6  ;;  %5913 = vmatpush1.bf16.msra.mxu1 %v9584_v56 }
 0x4a5   : > { %5883 = vmatprep.subr.bf16.mxu0 %v9585_v53  ;;  %5915 = vmatprep.subr.bf16.mxu1 %v9586_v4 }
 0x4a8   : > { %v6945_v60 = vpop.eup %6944  ;;  %5885 = vmatpush1.bf16.msra.mxu0 %v9587_v9  ;;  %5917 = vmatpush1.bf16.msra.mxu1 %v9473_v37 }
 0x4a9   : > { %v6947_v62 = vpop.eup %6946  ;;  %v2527_v42 = vmul.f32 %v6945_v60, %v6943_v7  ;;  %5887 = vmatprep.subr.bf16.mxu0 %v9474_v36  ;;  %5919 = vmatprep.subr.bf16.mxu1 %v9475_v19  ;;  %v9588_v60 = vld [vmem:[#allocation13_spill] sm:$0xff] }
 0x4aa   : > { %v2526_v15 = vmul.f32 %v6947_v62, %v8425_v49  ;;  %v6949_v49 = vpop.eup %6948  ;;  %v9589_v62 = vld [vmem:[#allocation26_spill] sm:$0xff] }
 0x4ac   : > { %v8547_v44 = vadd.f32 %v2527_v42, %v2526_v15  ;;  %5889 = vmatpush1.bf16.msra.mxu0 %v9532_v34  ;;  %5921 = vmatpush1.bf16.msra.mxu1 %v9533_v58  ;;  %v9590_v42 = vld [vmem:[#allocation14_spill] sm:$0xff]  ;;  %v9592_v15 = vld [vmem:[#allocation15_spill] sm:$0xff] }
 0x4ad   : > { %5891 = vmatprep.subr.bf16.mxu0 %v9534_v40  ;;  %5923 = vmatprep.subr.bf16.mxu1 %v9535_v21 }
 0x4ae   : > { %6950 = vtanh.f32 %v8547_v44 }
 0x4b0   : > { %5893 = vmatpush1.bf16.msra.mxu0 %v9536_v20  ;;  %5925 = vmatpush1.bf16.msra.mxu1 %v9537_v59 }
 0x4b1   : > { %5895 = vmatprep.subr.bf16.mxu0 %v9538_v11  ;;  %5927 = vmatprep.subr.bf16.mxu1 %v9483_v1 }
 0x4b4   : > { %5897 = vmatpush1.bf16.msra.mxu0 %v9484_v10  ;;  %5929 = vmatpush1.bf16.msra.mxu1 %v9485_v27 }
 0x4b5   : > { %5899 = vmatprep.subr.bf16.mxu0 %v9486_v18  ;;  %5931 = vmatprep.subr.bf16.mxu1 %v9487_v3 }
 0x4b8   : > { %v6951_v50 = vpop.eup %6950  ;;  %5901 = vmatpush1.bf16.msra.mxu0 %v9488_v0  ;;  %5933 = vmatpush1.bf16.msra.mxu1 %v9489_v30 }
 0x4b9   : > { %v2530_v7 = vmul.f32 %v6951_v50, %v6949_v49  ;;  %5935 = vmatprep.subr.bf16.mxu0 %v9490_v57  ;;  %5967 = vmatprep.subr.bf16.mxu1 %v9491_v12  ;;  %v9593_v49 = vld [vmem:[#allocation28_spill] sm:$0xff] }
 0x4ba   : > { %v9594_v50 = vld [vmem:[#allocation16_spill] sm:$0xff] }
 0x4bb   : > { %2738 = vmatmul.mubr.f32.vlgmr.msra.gmra.mrb[22].mxu0 %v2530_v7  ;;  %2809 = vmatmul.mubr.f32.vlgmr.msra.gmra.mrb[24].mxu1 %v2530_v7 }
 0x4bc   : > { %5937 = vmatpush1.bf16.msra.mxu0 %v7223_v22  ;;  %5969 = vmatpush1.bf16.msra.mxu1 %v7434_v31 }
 0x4bd   : > { %5939 = vmatprep.subr.bf16.mxu0 %v7226_v23  ;;  %5971 = vmatprep.subr.bf16.mxu1 %v7437_v32 }
 0x4be   : > { %2914 = vmatprep.mubr.f32.mxu0 %v9401_v48  ;;  %2985 = vmatprep.mubr.f32.mxu1 %v9401_v48 }
 0x4c0   : > { %5941 = vmatpush1.bf16.msra.mxu0 %v7247_v29  ;;  %5973 = vmatpush1.bf16.msra.mxu1 %v7455_v38 }
 0x4c1   : > { %5943 = vmatprep.subr.bf16.mxu0 %v7259_v33  ;;  %5975 = vmatprep.subr.bf16.mxu1 %v7459_v39 }
 0x4c4   : > { %5945 = vmatpush1.bf16.msra.mxu0 %v7286_v43  ;;  %5977 = vmatpush1.bf16.msra.mxu1 %v7476_v45 }
 0x4c5   : > { %5947 = vmatprep.subr.bf16.mxu0 %v7298_v47  ;;  %5979 = vmatprep.subr.bf16.mxu1 %v7479_v46  ;;  %v9595_v47 = vld [vmem:[#allocation29_spill] sm:$0xff] }
 0x4c6   : > { %v9596_v46 = vld [vmem:[#allocation17_spill] sm:$0xff] }
 0x4c8   : > { %5949 = vmatpush1.bf16.msra.mxu0 %v7317_v55  ;;  %5981 = vmatpush1.bf16.msra.mxu1 %v7496_v52  ;;  %v9597_v55 = vld [vmem:[#allocation30_spill] sm:$0xff] }
 0x4c9   : > { %5951 = vmatprep.subr.bf16.mxu0 %v9588_v60  ;;  %5983 = vmatprep.subr.bf16.mxu1 %v9589_v62  ;;  %v9598_v52 = vld [vmem:[#allocation18_spill] sm:$0xff]  ;;  %v9599_v60 = vld [vmem:[#allocation31_spill] sm:$0xff] }
 0x4ca   : > { %v9600_v62 = vld [vmem:[#allocation19_spill] sm:$0xff] }
 0x4cc   : > { %5953 = vmatpush1.bf16.msra.mxu0 %v9590_v42  ;;  %5985 = vmatpush1.bf16.msra.mxu1 %v9591_v61  ;;  %v9601_v42 = vld [vmem:[#allocation32_spill] sm:$0xff] }
 0x4cd   : > { %5955 = vmatprep.subr.bf16.mxu0 %v9592_v15  ;;  %5987 = vmatprep.subr.bf16.mxu1 %v9593_v49  ;;  %v9602_v61 = vld [vmem:[#allocation20_spill] sm:$0xff]  ;;  %v9603_v15 = vld [vmem:[#allocation33_spill] sm:$0xff]  ;;  %v9604_v49 = vld [vmem:[#allocation34_spill] sm:$0xff] }
 0x4d0   : > { %5957 = vmatpush1.bf16.msra.mxu0 %v9594_v50  ;;  %5989 = vmatpush1.bf16.msra.mxu1 %v9595_v47  ;;  %v9605_v50 = vld [vmem:[#allocation35_spill] sm:$0xff]  ;;  %v9638_v47 = vld [vmem:[#allocation100_spill] sm:$0xff] }
 0x4d1   : > { %5959 = vmatprep.subr.bf16.mxu0 %v9596_v46  ;;  %5991 = vmatprep.subr.bf16.mxu1 %v9597_v55  ;;  %v9606_v46 = vld [vmem:[#allocation36_spill] sm:$0xff]  ;;  %v9607_v55 = vld [vmem:[#allocation37_spill] sm:$0xff] }
 0x4d4   : > { %5961 = vmatpush1.bf16.msra.mxu0 %v9598_v52  ;;  %5993 = vmatpush1.bf16.msra.mxu1 %v9599_v60  ;;  %v9608_v52 = vld [vmem:[#allocation38_spill] sm:$0xff]  ;;  %v9609_v60 = vld [vmem:[#allocation39_spill] sm:$0xff] }
 0x4d5   : > { %5963 = vmatprep.subr.bf16.mxu0 %v9600_v62  ;;  %5995 = vmatprep.subr.bf16.mxu1 %v9601_v42  ;;  %v9619_v42 = vld [vmem:[#allocation49_spill] sm:$0xff]  ;;  %v9620_v62 = vld [vmem:[#allocation50_spill] sm:$0xff] }
 0x4d8   : > { %5965 = vmatpush1.bf16.msra.mxu0 %v9602_v61  ;;  %5997 = vmatpush1.bf16.msra.mxu1 %v9603_v15  ;;  %v9610_v61 = vld [vmem:[#allocation40_spill] sm:$0xff]  ;;  %v9611_v15 = vld [vmem:[#allocation41_spill] sm:$0xff] }
 0x4d9   : > { %5999 = vmatprep.subr.bf16.mxu0 %v9604_v49  ;;  %6031 = vmatprep.subr.bf16.mxu1 %v9605_v50  ;;  %v9612_v49 = vld [vmem:[#allocation42_spill] sm:$0xff]  ;;  %v9613_v50 = vld [vmem:[#allocation43_spill] sm:$0xff] }
 0x4db   : > { %2915 = vmatmul.mubr.f32.vlgmr.msra.gmra.mrb[8].mxu0 %v2530_v7  ;;  %2986 = vmatmul.mubr.f32.vlgmr.msra.gmra.mrb[8].mxu1 %v2530_v7  ;;  %v9614_v7 = vld [vmem:[#allocation44_spill] sm:$0xff] }
 0x4dc   : > { %6001 = vmatpush1.bf16.msra.mxu0 %v9606_v46  ;;  %6033 = vmatpush1.bf16.msra.mxu1 %v9607_v55  ;;  %v9615_v46 = vld [vmem:[#allocation45_spill] sm:$0xff]  ;;  %v9616_v55 = vld [vmem:[#allocation46_spill] sm:$0xff] }
 0x4dd   : > { %6003 = vmatprep.subr.bf16.mxu0 %v9608_v52  ;;  %6035 = vmatprep.subr.bf16.mxu1 %v9609_v60  ;;  %v9617_v52 = vld [vmem:[#allocation47_spill] sm:$0xff]  ;;  %v9618_v60 = vld [vmem:[#allocation48_spill] sm:$0xff] }
 0x4de   : > { %3084 = vmatprep.mubr.f32.mxu0 %v9401_v48  ;;  %3155 = vmatprep.mubr.f32.mxu1 %v9401_v48 }
 0x4e0   : > { %6005 = vmatpush1.bf16.msra.mxu0 %v9610_v61  ;;  %6037 = vmatpush1.bf16.msra.mxu1 %v9611_v15  ;;  %v9621_v61 = vld [vmem:[#allocation51_spill] sm:$0xff]  ;;  %v9622_v15 = vld [vmem:[#allocation52_spill] sm:$0xff] }
 0x4e1   : > { %6007 = vmatprep.subr.bf16.mxu0 %v9612_v49  ;;  %6039 = vmatprep.subr.bf16.mxu1 %v9613_v50  ;;  %v9623_v49 = vld [vmem:[#allocation53_spill] sm:$0xff]  ;;  %v9624_v50 = vld [vmem:[#allocation54_spill] sm:$0xff] }
 0x4e4   : > { %6009 = vmatpush1.bf16.msra.mxu0 %v9614_v7  ;;  %6041 = vmatpush1.bf16.msra.mxu1 %v9615_v46  ;;  %v9625_v7 = vld [vmem:[#allocation55_spill] sm:$0xff]  ;;  %v9626_v46 = vld [vmem:[#allocation56_spill] sm:$0xff] }
 0x4e5   : > { %6011 = vmatprep.subr.bf16.mxu0 %v9616_v55  ;;  %6043 = vmatprep.subr.bf16.mxu1 %v9617_v52  ;;  %v9627_v55 = vld [vmem:[#allocation57_spill] sm:$0xff]  ;;  %v9628_v52 = vld [vmem:[#allocation58_spill] sm:$0xff] }
 0x4e8   : > { %6013 = vmatpush1.bf16.msra.mxu0 %v9618_v60  ;;  %6045 = vmatpush1.bf16.msra.mxu1 %v9619_v42  ;;  %v9629_v60 = vld [vmem:[#allocation59_spill] sm:$0xff]  ;;  %v9630_v42 = vld [vmem:[#allocation60_spill] sm:$0xff] }
 0x4e9   : > { %6015 = vmatprep.subr.bf16.mxu0 %v9620_v62  ;;  %6047 = vmatprep.subr.bf16.mxu1 %v9621_v61  ;;  %v9631_v62 = vld [vmem:[#allocation61_spill] sm:$0xff]  ;;  %v9632_v61 = vld [vmem:[#allocation62_spill] sm:$0xff] }
 0x4ec   : > { %6017 = vmatpush1.bf16.msra.mxu0 %v9622_v15  ;;  %6049 = vmatpush1.bf16.msra.mxu1 %v9623_v49  ;;  %v9633_v15 = vld [vmem:[#allocation63_spill] sm:$0xff]  ;;  %v9634_v49 = vld [vmem:[#allocation64_spill] sm:$0xff] }
 0x4ed   : > { %6019 = vmatprep.subr.bf16.mxu0 %v9624_v50  ;;  %6051 = vmatprep.subr.bf16.mxu1 %v9625_v7  ;;  %v9635_v50 = vld [vmem:[#allocation65_spill] sm:$0xff]  ;;  %v9636_v7 = vld [vmem:[#allocation66_spill] sm:$0xff] }
 0x4f0   : > { %6021 = vmatpush1.bf16.msra.mxu0 %v9626_v46  ;;  %6053 = vmatpush1.bf16.msra.mxu1 %v9627_v55  ;;  %v9637_v46 = vld [vmem:[#allocation67_spill] sm:$0xff] }
 0x4f1   : > { %6023 = vmatprep.subr.bf16.mxu0 %v9628_v52  ;;  %6055 = vmatprep.subr.bf16.mxu1 %v9629_v60 }
 0x4f4   : > { %6025 = vmatpush1.bf16.msra.mxu0 %v9630_v42  ;;  %6057 = vmatpush1.bf16.msra.mxu1 %v9631_v62 }
 0x4f5   : > { %6027 = vmatprep.subr.bf16.mxu0 %v9632_v61  ;;  %6059 = vmatprep.subr.bf16.mxu1 %v9633_v15 }
 0x4f8   : > { %6029 = vmatpush1.bf16.msra.mxu0 %v9634_v49  ;;  %6061 = vmatpush1.bf16.msra.mxu1 %v9635_v50 }
 0x4f9   : > { %6063 = vmatprep.subr.bf16.mxu0 %v9636_v7  ;;  %6095 = vmatprep.subr.bf16.mxu1 %v9637_v46 }
 0x58e   : > { %v2739_v55 = vpop.f32.mrb[22].mxu0  ;;  %v2810_v52 = vpop.f32.mrb[24].mxu1 }
 0x58f   : > { %v2815_v60 = vadd.f32 %v2739_v55, %v9638_v47  ;;  %v2741_v45 = vpop.f32.mrb[23].mxu0  ;;  %v2812_v42 = vpop.f32.mrb[25].mxu1  ;;  %v2817_v50 = vadd.f32 %v2810_v52, %v9518_v25 }
 0x590   : > { %v2816_v62 = vadd.f32 %v2741_v45, %v9516_v28  ;;  %v2818_v49 = vadd.f32 %v2812_v42, %v9517_v2 }
 0x591   : > { %v5052_v43 = vmul.f32 -1.442695, %v2815_v60 }
 0x592   : > { %v5053_v61 = vmul.f32 -1.442695, %v2816_v62  ;;  %v5054_v15 = vmul.f32 -1.442695, %v2818_v49 }
 0x593   : > { %6952 = vpow2.f32 %v5052_v43 }
 0x594   : > { %6954 = vpow2.f32 %v5053_v61 }
 0x595   : > { %6956 = vpow2.f32 %v5054_v15 }
 0x596   : > { %6958 = vtanh.f32 %v2817_v50 }
 0x59d   : > { %v6953_v7 = vpop.eup %6952 }
 0x59e   : > { %v6955_v39 = vpop.eup %6954  ;;  %v2822_v46 = vadd.f32 1.0, %v6953_v7 }
 0x59f   : > { %v2828_v33 = vadd.f32 1.0, %v6955_v39  ;;  %v6957_v55 = vpop.eup %6956 }
 0x5a0   : > { %6960 = vrcp.f32 %v2822_v46  ;;  %v6959_v47 = vpop.eup %6958  ;;  %v2835_v43 = vadd.f32 1.0, %v6957_v55 }
 0x5a1   : > { %6962 = vrcp.f32 %v2828_v33 }
 0x5a2   : > { %6964 = vrcp.f32 %v2835_v43 }
 0x5aa   : > { %v6961_v45 = vpop.eup %6960 }
 0x5ab   : > { %v6963_v60 = vpop.eup %6962  ;;  %v2839_v62 = vmul.f32 %v6961_v45, %v6959_v47 }
 0x5ac   : > { %v2838_v61 = vmul.f32 %v6963_v60, %v8517_v24  ;;  %v6965_v24 = vpop.eup %6964 }
 0x5ae   : > { %v8639_v42 = vadd.f32 %v2839_v62, %v2838_v61  ;;  %v2916_v49 = vpop.f32.mrb[8].mxu0  ;;  %v2987_v52 = vpop.f32.mrb[8].mxu1 }
 0x5af   : > { %v6744_v7 = vadd.f32 %v2916_v49, %v9457_v54  ;;  %v2918_v15 = vpop.f32.mrb[9].mxu0  ;;  %v2989_v50 = vpop.f32.mrb[9].mxu1  ;;  %v6760_v60 = vadd.f32 %v2987_v52, %v8171_v41 }
 0x5b0   : > { %v6745_v39 = vadd.f32 %v2918_v15, %v9458_v35  ;;  %6966 = vtanh.f32 %v8639_v42  ;;  %v6761_v47 = vadd.f32 %v2989_v50, %v8175_v16 }
 0x5b1   : > { %v5055_v33 = vmul.f32 -1.442695, %v6744_v7 }
 0x5b2   : > { %v5056_v46 = vmul.f32 -1.442695, %v6745_v39  ;;  %v5057_v45 = vmul.f32 -1.442695, %v6761_v47 }
 0x5b3   : > { %6968 = vpow2.f32 %v5055_v33 }
 0x5b4   : > { %6970 = vpow2.f32 %v5056_v46 }
 0x5b5   : > { %6972 = vpow2.f32 %v5057_v45 }
 0x5b6   : > { %6974 = vtanh.f32 %v6760_v60  ;;  %v9640_v60 = vld [vmem:[#allocation9_spill] sm:$0xff] }
 0x5ba   : > { %v6967_v55 = vpop.eup %6966 }
 0x5bb   : > { %v8646_v62 = vmul.f32 %v6967_v55, %v6965_v24 }
 0x5bd   : > { %9639 = vst [vmem:[#allocation81_spill] sm:$0xff] %v8646_v62  ;;  %v6969_v43 = vpop.eup %6968  ;;  %3085 = vmatmul.mubr.f32.vlgmr.msra.gmra.mrb[24].mxu0 %v8646_v62  ;;  %3156 = vmatmul.mubr.f32.vlgmr.msra.gmra.mrb[26].mxu1 %v8646_v62  ;;  %v9654_v62 = vld [vmem:[#allocation16_spill] sm:$0xff] }
 0x5be   : > { %v6971_v61 = vpop.eup %6970  ;;  %v2999_v49 = vadd.f32 1.0, %v6969_v43  ;;  %6065 = vmatpush1.bf16.msra.mxu0 %v9460_v8  ;;  %6097 = vmatpush1.bf16.msra.mxu1 %v9520_v26  ;;  %v9641_v43 = vld [vmem:[#allocation22_spill] sm:$0xff] }
 0x5bf   : > { %v3005_v7 = vadd.f32 1.0, %v6971_v61  ;;  %6067 = vmatprep.subr.bf16.mxu0 %v9521_v17  ;;  %6099 = vmatprep.subr.bf16.mxu1 %v9522_v14  ;;  %v6973_v52 = vpop.eup %6972  ;;  %v9642_v61 = vld [vmem:[#allocation10_spill] sm:$0xff] }
 0x5c0   : > { %6976 = vrcp.f32 %v2999_v49  ;;  %3226 = vmatprep.mubr.f32.mxu0 %v9401_v48  ;;  %3297 = vmatprep.mubr.f32.mxu1 %v9401_v48  ;;  %v6975_v15 = vpop.eup %6974  ;;  %v3012_v46 = vadd.f32 1.0, %v6973_v52  ;;  %v9643_v49 = vld [vmem:[#allocation23_spill] sm:$0xff]  ;;  %v9645_v52 = vld [vmem:[#allocation24_spill] sm:$0xff] }
 0x5c1   : > { %6978 = vrcp.f32 %v3005_v7  ;;  %v9644_v7 = vld [vmem:[#allocation11_spill] sm:$0xff] }
 0x5c2   : > { %6069 = vmatpush1.bf16.msra.mxu0 %v9523_v51  ;;  %6101 = vmatpush1.bf16.msra.mxu1 %v9580_v13  ;;  %6980 = vrcp.f32 %v3012_v46  ;;  %v9650_v46 = vld [vmem:[#allocation14_spill] sm:$0xff] }
 0x5c3   : > { %6071 = vmatprep.subr.bf16.mxu0 %v9581_v63  ;;  %6103 = vmatprep.subr.bf16.mxu1 %v9582_v5 }
 0x5c6   : > { %6073 = vmatpush1.bf16.msra.mxu0 %v9583_v6  ;;  %6105 = vmatpush1.bf16.msra.mxu1 %v9584_v56 }
 0x5c7   : > { %6075 = vmatprep.subr.bf16.mxu0 %v9585_v53  ;;  %6107 = vmatprep.subr.bf16.mxu1 %v9586_v4 }
 0x5ca   : > { %v6977_v50 = vpop.eup %6976  ;;  %6077 = vmatpush1.bf16.msra.mxu0 %v9587_v9  ;;  %6109 = vmatpush1.bf16.msra.mxu1 %v9473_v37 }
 0x5cb   : > { %v6979_v39 = vpop.eup %6978  ;;  %v3016_v33 = vmul.f32 %v6977_v50, %v6975_v15  ;;  %6079 = vmatprep.subr.bf16.mxu0 %v9474_v36  ;;  %6111 = vmatprep.subr.bf16.mxu1 %v9475_v19  ;;  %v9646_v15 = vld [vmem:[#allocation12_spill] sm:$0xff]  ;;  %v9647_v50 = vld [vmem:[#allocation25_spill] sm:$0xff] }
 0x5cc   : > { %v3015_v47 = vmul.f32 %v6979_v39, %v8547_v44  ;;  %v6981_v44 = vpop.eup %6980  ;;  %v9648_v39 = vld [vmem:[#allocation13_spill] sm:$0xff] }
 0x5ce   : > { %v8669_v24 = vadd.f32 %v3016_v33, %v3015_v47  ;;  %6081 = vmatpush1.bf16.msra.mxu0 %v9532_v34  ;;  %6113 = vmatpush1.bf16.msra.mxu1 %v9533_v58  ;;  %v9649_v33 = vld [vmem:[#allocation26_spill] sm:$0xff]  ;;  %v9651_v47 = vld [vmem:[#allocation27_spill] sm:$0xff] }
 0x5cf   : > { %6083 = vmatprep.subr.bf16.mxu0 %v9534_v40  ;;  %6115 = vmatprep.subr.bf16.mxu1 %v9535_v21 }
 0x5d0   : > { %6982 = vtanh.f32 %v8669_v24 }
 0x5d2   : > { %6085 = vmatpush1.bf16.msra.mxu0 %v9536_v20  ;;  %6117 = vmatpush1.bf16.msra.mxu1 %v9537_v59 }
 0x5d3   : > { %6087 = vmatprep.subr.bf16.mxu0 %v9538_v11  ;;  %6119 = vmatprep.subr.bf16.mxu1 %v9483_v1 }
 0x5d6   : > { %6089 = vmatpush1.bf16.msra.mxu0 %v9484_v10  ;;  %6121 = vmatpush1.bf16.msra.mxu1 %v9485_v27 }
 0x5d7   : > { %6091 = vmatprep.subr.bf16.mxu0 %v9486_v18  ;;  %6123 = vmatprep.subr.bf16.mxu1 %v9487_v3 }
 0x5da   : > { %v6983_v55 = vpop.eup %6982  ;;  %6093 = vmatpush1.bf16.msra.mxu0 %v9488_v0  ;;  %6125 = vmatpush1.bf16.msra.mxu1 %v9489_v30 }
 0x5db   : > { %6127 = vmatprep.subr.bf16.mxu0 %v9490_v57  ;;  %6159 = vmatprep.subr.bf16.mxu1 %v9491_v12  ;;  %v3019_v45 = vmul.f32 %v6983_v55, %v6981_v44  ;;  %v9652_v44 = vld [vmem:[#allocation15_spill] sm:$0xff]  ;;  %v9653_v55 = vld [vmem:[#allocation28_spill] sm:$0xff] }
 0x5dd   : > { %3227 = vmatmul.mubr.f32.vlgmr.msra.gmra.mrb[24].mxu0 %v3019_v45  ;;  %3298 = vmatmul.mubr.f32.vlgmr.msra.gmra.mrb[26].mxu1 %v3019_v45 }
 0x5de   : > { %6129 = vmatpush1.bf16.msra.mxu0 %v7223_v22  ;;  %6161 = vmatpush1.bf16.msra.mxu1 %v7434_v31 }
 0x5df   : > { %6131 = vmatprep.subr.bf16.mxu0 %v7226_v23  ;;  %6163 = vmatprep.subr.bf16.mxu1 %v7437_v32 }
 0x5e0   : > { %3403 = vmatprep.mubr.f32.mxu0 %v9401_v48  ;;  %3474 = vmatprep.mubr.f32.mxu1 %v9401_v48 }
 0x5e2   : > { %6133 = vmatpush1.bf16.msra.mxu0 %v7247_v29  ;;  %6165 = vmatpush1.bf16.msra.mxu1 %v7455_v38 }
 0x5e3   : > { %6135 = vmatprep.subr.bf16.mxu0 %v9640_v60  ;;  %6167 = vmatprep.subr.bf16.mxu1 %v9641_v43 }
 0x5e6   : > { %6137 = vmatpush1.bf16.msra.mxu0 %v9642_v61  ;;  %6169 = vmatpush1.bf16.msra.mxu1 %v9643_v49 }
 0x5e7   : > { %6139 = vmatprep.subr.bf16.mxu0 %v9644_v7  ;;  %6171 = vmatprep.subr.bf16.mxu1 %v9645_v52  ;;  %v9655_v7 = vld [vmem:[#allocation29_spill] sm:$0xff] }
 0x5e8   : > { %v9656_v52 = vld [vmem:[#allocation17_spill] sm:$0xff] }
 0x5ea   : > { %6141 = vmatpush1.bf16.msra.mxu0 %v9646_v15  ;;  %6173 = vmatpush1.bf16.msra.mxu1 %v9647_v50  ;;  %v9657_v15 = vld [vmem:[#allocation30_spill] sm:$0xff] }
 0x5eb   : > { %6143 = vmatprep.subr.bf16.mxu0 %v9648_v39  ;;  %6175 = vmatprep.subr.bf16.mxu1 %v9649_v33  ;;  %v9658_v50 = vld [vmem:[#allocation18_spill] sm:$0xff]  ;;  %v9659_v39 = vld [vmem:[#allocation31_spill] sm:$0xff] }
 0x5ec   : > { %v9660_v33 = vld [vmem:[#allocation19_spill] sm:$0xff] }
 0x5ee   : > { %6145 = vmatpush1.bf16.msra.mxu0 %v9650_v46  ;;  %6177 = vmatpush1.bf16.msra.mxu1 %v9651_v47  ;;  %v9661_v46 = vld [vmem:[#allocation32_spill] sm:$0xff] }
 0x5ef   : > { %6147 = vmatprep.subr.bf16.mxu0 %v9652_v44  ;;  %6179 = vmatprep.subr.bf16.mxu1 %v9653_v55  ;;  %v9662_v47 = vld [vmem:[#allocation20_spill] sm:$0xff]  ;;  %v9663_v44 = vld [vmem:[#allocation33_spill] sm:$0xff]  ;;  %v9664_v55 = vld [vmem:[#allocation34_spill] sm:$0xff] }
 0x5f2   : > { %6149 = vmatpush1.bf16.msra.mxu0 %v9654_v62  ;;  %6181 = vmatpush1.bf16.msra.mxu1 %v9655_v7  ;;  %v9665_v62 = vld [vmem:[#allocation35_spill] sm:$0xff]  ;;  %v9698_v7 = vld [vmem:[#allocation100_spill] sm:$0xff] }
 0x5f3   : > { %6151 = vmatprep.subr.bf16.mxu0 %v9656_v52  ;;  %6183 = vmatprep.subr.bf16.mxu1 %v9657_v15  ;;  %v9666_v52 = vld [vmem:[#allocation36_spill] sm:$0xff]  ;;  %v9667_v15 = vld [vmem:[#allocation37_spill] sm:$0xff] }
 0x5f6   : > { %6153 = vmatpush1.bf16.msra.mxu0 %v9658_v50  ;;  %6185 = vmatpush1.bf16.msra.mxu1 %v9659_v39  ;;  %v9668_v50 = vld [vmem:[#allocation38_spill] sm:$0xff]  ;;  %v9669_v39 = vld [vmem:[#allocation39_spill] sm:$0xff] }
 0x5f7   : > { %6155 = vmatprep.subr.bf16.mxu0 %v9660_v33  ;;  %6187 = vmatprep.subr.bf16.mxu1 %v9661_v46  ;;  %v9679_v46 = vld [vmem:[#allocation49_spill] sm:$0xff]  ;;  %v9680_v33 = vld [vmem:[#allocation50_spill] sm:$0xff] }
 0x5fa   : > { %6157 = vmatpush1.bf16.msra.mxu0 %v9662_v47  ;;  %6189 = vmatpush1.bf16.msra.mxu1 %v9663_v44  ;;  %v9670_v47 = vld [vmem:[#allocation40_spill] sm:$0xff]  ;;  %v9671_v44 = vld [vmem:[#allocation41_spill] sm:$0xff] }
 0x5fb   : > { %6191 = vmatprep.subr.bf16.mxu0 %v9664_v55  ;;  %6223 = vmatprep.subr.bf16.mxu1 %v9665_v62  ;;  %v9672_v55 = vld [vmem:[#allocation42_spill] sm:$0xff]  ;;  %v9673_v62 = vld [vmem:[#allocation43_spill] sm:$0xff] }
 0x5fd   : > { %3404 = vmatmul.mubr.f32.vlgmr.msra.gmra.mrb[10].mxu0 %v3019_v45  ;;  %3475 = vmatmul.mubr.f32.vlgmr.msra.gmra.mrb[10].mxu1 %v3019_v45  ;;  %v9674_v45 = vld [vmem:[#allocation44_spill] sm:$0xff] }
 0x5fe   : > { %6193 = vmatpush1.bf16.msra.mxu0 %v9666_v52  ;;  %6225 = vmatpush1.bf16.msra.mxu1 %v9667_v15  ;;  %v9675_v52 = vld [vmem:[#allocation45_spill] sm:$0xff]  ;;  %v9676_v15 = vld [vmem:[#allocation46_spill] sm:$0xff] }
 0x5ff   : > { %6195 = vmatprep.subr.bf16.mxu0 %v9668_v50  ;;  %6227 = vmatprep.subr.bf16.mxu1 %v9669_v39  ;;  %v9677_v50 = vld [vmem:[#allocation47_spill] sm:$0xff]  ;;  %v9678_v39 = vld [vmem:[#allocation48_spill] sm:$0xff] }
 0x600   : > { %3573 = vmatprep.mubr.f32.mxu0 %v9401_v48  ;;  %3644 = vmatprep.mubr.f32.mxu1 %v9401_v48 }
 0x602   : > { %6197 = vmatpush1.bf16.msra.mxu0 %v9670_v47  ;;  %6229 = vmatpush1.bf16.msra.mxu1 %v9671_v44  ;;  %v9681_v47 = vld [vmem:[#allocation51_spill] sm:$0xff]  ;;  %v9682_v44 = vld [vmem:[#allocation52_spill] sm:$0xff] }
 0x603   : > { %6199 = vmatprep.subr.bf16.mxu0 %v9672_v55  ;;  %6231 = vmatprep.subr.bf16.mxu1 %v9673_v62  ;;  %v9683_v55 = vld [vmem:[#allocation53_spill] sm:$0xff]  ;;  %v9684_v62 = vld [vmem:[#allocation54_spill] sm:$0xff] }
 0x606   : > { %6201 = vmatpush1.bf16.msra.mxu0 %v9674_v45  ;;  %6233 = vmatpush1.bf16.msra.mxu1 %v9675_v52  ;;  %v9685_v45 = vld [vmem:[#allocation55_spill] sm:$0xff]  ;;  %v9686_v52 = vld [vmem:[#allocation56_spill] sm:$0xff] }
 0x607   : > { %6203 = vmatprep.subr.bf16.mxu0 %v9676_v15  ;;  %6235 = vmatprep.subr.bf16.mxu1 %v9677_v50  ;;  %v9687_v15 = vld [vmem:[#allocation57_spill] sm:$0xff]  ;;  %v9688_v50 = vld [vmem:[#allocation58_spill] sm:$0xff] }
 0x60a   : > { %6205 = vmatpush1.bf16.msra.mxu0 %v9678_v39  ;;  %6237 = vmatpush1.bf16.msra.mxu1 %v9679_v46  ;;  %v9689_v39 = vld [vmem:[#allocation59_spill] sm:$0xff]  ;;  %v9690_v46 = vld [vmem:[#allocation60_spill] sm:$0xff] }
 0x60b   : > { %6207 = vmatprep.subr.bf16.mxu0 %v9680_v33  ;;  %6239 = vmatprep.subr.bf16.mxu1 %v9681_v47  ;;  %v9691_v33 = vld [vmem:[#allocation61_spill] sm:$0xff]  ;;  %v9692_v47 = vld [vmem:[#allocation62_spill] sm:$0xff] }
 0x60e   : > { %6209 = vmatpush1.bf16.msra.mxu0 %v9682_v44  ;;  %6241 = vmatpush1.bf16.msra.mxu1 %v9683_v55  ;;  %v9693_v44 = vld [vmem:[#allocation63_spill] sm:$0xff]  ;;  %v9694_v55 = vld [vmem:[#allocation64_spill] sm:$0xff] }
 0x60f   : > { %6211 = vmatprep.subr.bf16.mxu0 %v9684_v62  ;;  %6243 = vmatprep.subr.bf16.mxu1 %v9685_v45  ;;  %v9695_v62 = vld [vmem:[#allocation65_spill] sm:$0xff]  ;;  %v9696_v45 = vld [vmem:[#allocation66_spill] sm:$0xff] }
 0x612   : > { %6213 = vmatpush1.bf16.msra.mxu0 %v9686_v52  ;;  %6245 = vmatpush1.bf16.msra.mxu1 %v9687_v15  ;;  %v9697_v52 = vld [vmem:[#allocation67_spill] sm:$0xff] }
 0x613   : > { %6215 = vmatprep.subr.bf16.mxu0 %v9688_v50  ;;  %6247 = vmatprep.subr.bf16.mxu1 %v9689_v39 }
 0x616   : > { %6217 = vmatpush1.bf16.msra.mxu0 %v9690_v46  ;;  %6249 = vmatpush1.bf16.msra.mxu1 %v9691_v33 }
 0x617   : > { %6219 = vmatprep.subr.bf16.mxu0 %v9692_v47  ;;  %6251 = vmatprep.subr.bf16.mxu1 %v9693_v44 }
 0x61a   : > { %6221 = vmatpush1.bf16.msra.mxu0 %v9694_v55  ;;  %6253 = vmatpush1.bf16.msra.mxu1 %v9695_v62 }
 0x61b   : > { %6255 = vmatprep.subr.bf16.mxu0 %v9696_v45  ;;  %6287 = vmatprep.subr.bf16.mxu1 %v9697_v52 }
 0x6b0   : > { %v3228_v15 = vpop.f32.mrb[24].mxu0  ;;  %v3299_v50 = vpop.f32.mrb[26].mxu1 }
 0x6b1   : > { %v3304_v39 = vadd.f32 %v3228_v15, %v9698_v7  ;;  %v3230_v49 = vpop.f32.mrb[25].mxu0  ;;  %v3301_v46 = vpop.f32.mrb[27].mxu1  ;;  %v3306_v62 = vadd.f32 %v3299_v50, %v9518_v25 }
 0x6b2   : > { %v3305_v33 = vadd.f32 %v3230_v49, %v9516_v28  ;;  %v3307_v55 = vadd.f32 %v3301_v46, %v9517_v2 }
 0x6b3   : > { %v5058_v61 = vmul.f32 -1.442695, %v3304_v39 }
 0x6b4   : > { %v5059_v47 = vmul.f32 -1.442695, %v3305_v33  ;;  %v5060_v44 = vmul.f32 -1.442695, %v3307_v55 }
 0x6b5   : > { %6984 = vpow2.f32 %v5058_v61 }
 0x6b6   : > { %6986 = vpow2.f32 %v5059_v47 }
 0x6b7   : > { %6988 = vpow2.f32 %v5060_v44 }
 0x6b8   : > { %6990 = vtanh.f32 %v3306_v62 }
 0x6bf   : > { %v6985_v45 = vpop.eup %6984 }
 0x6c0   : > { %v6987_v43 = vpop.eup %6986  ;;  %v3311_v52 = vadd.f32 1.0, %v6985_v45 }
 0x6c1   : > { %v3317_v60 = vadd.f32 1.0, %v6987_v43  ;;  %v6989_v15 = vpop.eup %6988 }
 0x6c2   : > { %6992 = vrcp.f32 %v3311_v52  ;;  %v6991_v7 = vpop.eup %6990  ;;  %v3324_v61 = vadd.f32 1.0, %v6989_v15 }
 0x6c3   : > { %6994 = vrcp.f32 %v3317_v60 }
 0x6c4   : > { %6996 = vrcp.f32 %v3324_v61 }
 0x6cc   : > { %v6993_v49 = vpop.eup %6992 }
 0x6cd   : > { %v6995_v39 = vpop.eup %6994  ;;  %v3328_v33 = vmul.f32 %v6993_v49, %v6991_v7 }
 0x6ce   : > { %v3327_v47 = vmul.f32 %v6995_v39, %v8639_v42  ;;  %v6997_v42 = vpop.eup %6996 }
 0x6d0   : > { %v8761_v46 = vadd.f32 %v3328_v33, %v3327_v47  ;;  %v3405_v55 = vpop.f32.mrb[10].mxu0  ;;  %v3476_v50 = vpop.f32.mrb[10].mxu1 }
 0x6d1   : > { %v6746_v45 = vadd.f32 %v3405_v55, %v9457_v54  ;;  %v3407_v44 = vpop.f32.mrb[11].mxu0  ;;  %v3478_v62 = vpop.f32.mrb[11].mxu1  ;;  %v6762_v39 = vadd.f32 %v3476_v50, %v8171_v41 }
 0x6d2   : > { %v6747_v43 = vadd.f32 %v3407_v44, %v9458_v35  ;;  %6998 = vtanh.f32 %v8761_v46  ;;  %v6763_v7 = vadd.f32 %v3478_v62, %v8175_v16 }
 0x6d3   : > { %v5061_v60 = vmul.f32 -1.442695, %v6746_v45 }
 0x6d4   : > { %v5062_v52 = vmul.f32 -1.442695, %v6747_v43  ;;  %v5063_v49 = vmul.f32 -1.442695, %v6763_v7 }
 0x6d5   : > { %7000 = vpow2.f32 %v5061_v60 }
 0x6d6   : > { %7002 = vpow2.f32 %v5062_v52 }
 0x6d7   : > { %7004 = vpow2.f32 %v5063_v49 }
 0x6d8   : > { %7006 = vtanh.f32 %v6762_v39  ;;  %v9700_v39 = vld [vmem:[#allocation9_spill] sm:$0xff] }
 0x6dc   : > { %v6999_v15 = vpop.eup %6998 }
 0x6dd   : > { %v8768_v33 = vmul.f32 %v6999_v15, %v6997_v42 }
 0x6df   : > { %9699 = vst [vmem:[#allocation82_spill] sm:$0xff] %v8768_v33  ;;  %v7001_v61 = vpop.eup %7000  ;;  %3574 = vmatmul.mubr.f32.vlgmr.msra.gmra.mrb[26].mxu0 %v8768_v33  ;;  %3645 = vmatmul.mubr.f32.vlgmr.msra.gmra.mrb[28].mxu1 %v8768_v33  ;;  %v9714_v33 = vld [vmem:[#allocation16_spill] sm:$0xff] }
 0x6e0   : > { %v7003_v47 = vpop.eup %7002  ;;  %v3488_v55 = vadd.f32 1.0, %v7001_v61  ;;  %6257 = vmatpush1.bf16.msra.mxu0 %v9460_v8  ;;  %6289 = vmatpush1.bf16.msra.mxu1 %v9520_v26  ;;  %v9701_v61 = vld [vmem:[#allocation22_spill] sm:$0xff] }
 0x6e1   : > { %v3494_v45 = vadd.f32 1.0, %v7003_v47  ;;  %6259 = vmatprep.subr.bf16.mxu0 %v9521_v17  ;;  %6291 = vmatprep.subr.bf16.mxu1 %v9522_v14  ;;  %v7005_v50 = vpop.eup %7004  ;;  %v9702_v47 = vld [vmem:[#allocation10_spill] sm:$0xff] }
 0x6e2   : > { %7008 = vrcp.f32 %v3488_v55  ;;  %3715 = vmatprep.mubr.f32.mxu0 %v9401_v48  ;;  %3786 = vmatprep.mubr.f32.mxu1 %v9401_v48  ;;  %v7007_v44 = vpop.eup %7006  ;;  %v3501_v52 = vadd.f32 1.0, %v7005_v50  ;;  %v9703_v55 = vld [vmem:[#allocation23_spill] sm:$0xff]  ;;  %v9705_v50 = vld [vmem:[#allocation24_spill] sm:$0xff] }
 0x6e3   : > { %7010 = vrcp.f32 %v3494_v45  ;;  %v9704_v45 = vld [vmem:[#allocation11_spill] sm:$0xff] }
 0x6e4   : > { %6261 = vmatpush1.bf16.msra.mxu0 %v9523_v51  ;;  %6293 = vmatpush1.bf16.msra.mxu1 %v9580_v13  ;;  %7012 = vrcp.f32 %v3501_v52  ;;  %v9710_v52 = vld [vmem:[#allocation14_spill] sm:$0xff] }
 0x6e5   : > { %6263 = vmatprep.subr.bf16.mxu0 %v9581_v63  ;;  %6295 = vmatprep.subr.bf16.mxu1 %v9582_v5 }
 0x6e8   : > { %6265 = vmatpush1.bf16.msra.mxu0 %v9583_v6  ;;  %6297 = vmatpush1.bf16.msra.mxu1 %v9584_v56 }
 0x6e9   : > { %6267 = vmatprep.subr.bf16.mxu0 %v9585_v53  ;;  %6299 = vmatprep.subr.bf16.mxu1 %v9586_v4 }
 0x6ec   : > { %v7009_v62 = vpop.eup %7008  ;;  %6269 = vmatpush1.bf16.msra.mxu0 %v9587_v9  ;;  %6301 = vmatpush1.bf16.msra.mxu1 %v9473_v37 }
 0x6ed   : > { %v7011_v43 = vpop.eup %7010  ;;  %v3505_v60 = vmul.f32 %v7009_v62, %v7007_v44  ;;  %6271 = vmatprep.subr.bf16.mxu0 %v9474_v36  ;;  %6303 = vmatprep.subr.bf16.mxu1 %v9475_v19  ;;  %v9706_v44 = vld [vmem:[#allocation12_spill] sm:$0xff]  ;;  %v9707_v62 = vld [vmem:[#allocation25_spill] sm:$0xff] }
 0x6ee   : > { %v3504_v7 = vmul.f32 %v7011_v43, %v8669_v24  ;;  %v7013_v24 = vpop.eup %7012  ;;  %v9708_v43 = vld [vmem:[#allocation13_spill] sm:$0xff] }
 0x6f0   : > { %v8791_v42 = vadd.f32 %v3505_v60, %v3504_v7  ;;  %6273 = vmatpush1.bf16.msra.mxu0 %v9532_v34  ;;  %6305 = vmatpush1.bf16.msra.mxu1 %v9533_v58  ;;  %v9709_v60 = vld [vmem:[#allocation26_spill] sm:$0xff]  ;;  %v9711_v7 = vld [vmem:[#allocation27_spill] sm:$0xff] }
 0x6f1   : > { %6275 = vmatprep.subr.bf16.mxu0 %v9534_v40  ;;  %6307 = vmatprep.subr.bf16.mxu1 %v9535_v21 }
 0x6f2   : > { %7014 = vtanh.f32 %v8791_v42 }
 0x6f4   : > { %6277 = vmatpush1.bf16.msra.mxu0 %v9536_v20  ;;  %6309 = vmatpush1.bf16.msra.mxu1 %v9537_v59 }
 0x6f5   : > { %6279 = vmatprep.subr.bf16.mxu0 %v9538_v11  ;;  %6311 = vmatprep.subr.bf16.mxu1 %v9483_v1 }
 0x6f8   : > { %6281 = vmatpush1.bf16.msra.mxu0 %v9484_v10  ;;  %6313 = vmatpush1.bf16.msra.mxu1 %v9485_v27 }
 0x6f9   : > { %6283 = vmatprep.subr.bf16.mxu0 %v9486_v18  ;;  %6315 = vmatprep.subr.bf16.mxu1 %v9487_v3 }
 0x6fc   : > { %v7015_v15 = vpop.eup %7014  ;;  %6285 = vmatpush1.bf16.msra.mxu0 %v9488_v0  ;;  %6317 = vmatpush1.bf16.msra.mxu1 %v9489_v30 }
 0x6fd   : > { %v3508_v49 = vmul.f32 %v7015_v15, %v7013_v24  ;;  %6319 = vmatprep.subr.bf16.mxu0 %v9490_v57  ;;  %6351 = vmatprep.subr.bf16.mxu1 %v9491_v12  ;;  %v9712_v24 = vld [vmem:[#allocation15_spill] sm:$0xff]  ;;  %v9713_v15 = vld [vmem:[#allocation28_spill] sm:$0xff] }
 0x6ff   : > { %3716 = vmatmul.mubr.f32.vlgmr.msra.gmra.mrb[26].mxu0 %v3508_v49  ;;  %3787 = vmatmul.mubr.f32.vlgmr.msra.gmra.mrb[28].mxu1 %v3508_v49 }
 0x700   : > { %6321 = vmatpush1.bf16.msra.mxu0 %v7223_v22  ;;  %6353 = vmatpush1.bf16.msra.mxu1 %v7434_v31 }
 0x701   : > { %6323 = vmatprep.subr.bf16.mxu0 %v7226_v23  ;;  %6355 = vmatprep.subr.bf16.mxu1 %v7437_v32 }
 0x702   : > { %3892 = vmatprep.mubr.f32.mxu0 %v9401_v48  ;;  %3963 = vmatprep.mubr.f32.mxu1 %v9401_v48 }
 0x704   : > { %6325 = vmatpush1.bf16.msra.mxu0 %v7247_v29  ;;  %6357 = vmatpush1.bf16.msra.mxu1 %v7455_v38 }
 0x705   : > { %6327 = vmatprep.subr.bf16.mxu0 %v9700_v39  ;;  %6359 = vmatprep.subr.bf16.mxu1 %v9701_v61 }
 0x708   : > { %6329 = vmatpush1.bf16.msra.mxu0 %v9702_v47  ;;  %6361 = vmatpush1.bf16.msra.mxu1 %v9703_v55 }
 0x709   : > { %6331 = vmatprep.subr.bf16.mxu0 %v9704_v45  ;;  %6363 = vmatprep.subr.bf16.mxu1 %v9705_v50  ;;  %v9715_v45 = vld [vmem:[#allocation29_spill] sm:$0xff] }
 0x70a   : > { %v9716_v50 = vld [vmem:[#allocation17_spill] sm:$0xff] }
 0x70c   : > { %6333 = vmatpush1.bf16.msra.mxu0 %v9706_v44  ;;  %6365 = vmatpush1.bf16.msra.mxu1 %v9707_v62  ;;  %v9717_v44 = vld [vmem:[#allocation30_spill] sm:$0xff] }
 0x70d   : > { %6335 = vmatprep.subr.bf16.mxu0 %v9708_v43  ;;  %6367 = vmatprep.subr.bf16.mxu1 %v9709_v60  ;;  %v9718_v62 = vld [vmem:[#allocation18_spill] sm:$0xff]  ;;  %v9719_v43 = vld [vmem:[#allocation31_spill] sm:$0xff] }
 0x70e   : > { %v9720_v60 = vld [vmem:[#allocation19_spill] sm:$0xff] }
 0x710   : > { %6337 = vmatpush1.bf16.msra.mxu0 %v9710_v52  ;;  %6369 = vmatpush1.bf16.msra.mxu1 %v9711_v7  ;;  %v9721_v52 = vld [vmem:[#allocation32_spill] sm:$0xff] }
 0x711   : > { %6339 = vmatprep.subr.bf16.mxu0 %v9712_v24  ;;  %6371 = vmatprep.subr.bf16.mxu1 %v9713_v15  ;;  %v9722_v7 = vld [vmem:[#allocation20_spill] sm:$0xff]  ;;  %v9723_v24 = vld [vmem:[#allocation33_spill] sm:$0xff]  ;;  %v9724_v15 = vld [vmem:[#allocation34_spill] sm:$0xff] }
 0x714   : > { %6341 = vmatpush1.bf16.msra.mxu0 %v9714_v33  ;;  %6373 = vmatpush1.bf16.msra.mxu1 %v9715_v45  ;;  %v9725_v33 = vld [vmem:[#allocation35_spill] sm:$0xff]  ;;  %v9758_v45 = vld [vmem:[#allocation100_spill] sm:$0xff] }
 0x715   : > { %6343 = vmatprep.subr.bf16.mxu0 %v9716_v50  ;;  %6375 = vmatprep.subr.bf16.mxu1 %v9717_v44  ;;  %v9726_v50 = vld [vmem:[#allocation36_spill] sm:$0xff]  ;;  %v9727_v44 = vld [vmem:[#allocation37_spill] sm:$0xff] }
 0x718   : > { %6345 = vmatpush1.bf16.msra.mxu0 %v9718_v62  ;;  %6377 = vmatpush1.bf16.msra.mxu1 %v9719_v43  ;;  %v9728_v62 = vld [vmem:[#allocation38_spill] sm:$0xff]  ;;  %v9729_v43 = vld [vmem:[#allocation39_spill] sm:$0xff] }
 0x719   : > { %6347 = vmatprep.subr.bf16.mxu0 %v9720_v60  ;;  %6379 = vmatprep.subr.bf16.mxu1 %v9721_v52  ;;  %v9739_v52 = vld [vmem:[#allocation49_spill] sm:$0xff]  ;;  %v9740_v60 = vld [vmem:[#allocation50_spill] sm:$0xff] }
 0x71c   : > { %6349 = vmatpush1.bf16.msra.mxu0 %v9722_v7  ;;  %6381 = vmatpush1.bf16.msra.mxu1 %v9723_v24  ;;  %v9730_v7 = vld [vmem:[#allocation40_spill] sm:$0xff]  ;;  %v9731_v24 = vld [vmem:[#allocation41_spill] sm:$0xff] }
 0x71d   : > { %6383 = vmatprep.subr.bf16.mxu0 %v9724_v15  ;;  %6415 = vmatprep.subr.bf16.mxu1 %v9725_v33  ;;  %v9732_v15 = vld [vmem:[#allocation42_spill] sm:$0xff]  ;;  %v9733_v33 = vld [vmem:[#allocation43_spill] sm:$0xff] }
 0x71f   : > { %3893 = vmatmul.mubr.f32.vlgmr.msra.gmra.mrb[12].mxu0 %v3508_v49  ;;  %3964 = vmatmul.mubr.f32.vlgmr.msra.gmra.mrb[12].mxu1 %v3508_v49  ;;  %v9734_v49 = vld [vmem:[#allocation44_spill] sm:$0xff] }
 0x720   : > { %6385 = vmatpush1.bf16.msra.mxu0 %v9726_v50  ;;  %6417 = vmatpush1.bf16.msra.mxu1 %v9727_v44  ;;  %v9735_v50 = vld [vmem:[#allocation45_spill] sm:$0xff]  ;;  %v9736_v44 = vld [vmem:[#allocation46_spill] sm:$0xff] }
 0x721   : > { %6387 = vmatprep.subr.bf16.mxu0 %v9728_v62  ;;  %6419 = vmatprep.subr.bf16.mxu1 %v9729_v43  ;;  %v9737_v62 = vld [vmem:[#allocation47_spill] sm:$0xff]  ;;  %v9738_v43 = vld [vmem:[#allocation48_spill] sm:$0xff] }
 0x722   : > { %4062 = vmatprep.mubr.f32.mxu0 %v9401_v48  ;;  %4133 = vmatprep.mubr.f32.mxu1 %v9401_v48 }
 0x724   : > { %6389 = vmatpush1.bf16.msra.mxu0 %v9730_v7  ;;  %6421 = vmatpush1.bf16.msra.mxu1 %v9731_v24  ;;  %v9741_v7 = vld [vmem:[#allocation51_spill] sm:$0xff]  ;;  %v9742_v24 = vld [vmem:[#allocation52_spill] sm:$0xff] }
 0x725   : > { %6391 = vmatprep.subr.bf16.mxu0 %v9732_v15  ;;  %6423 = vmatprep.subr.bf16.mxu1 %v9733_v33  ;;  %v9743_v15 = vld [vmem:[#allocation53_spill] sm:$0xff]  ;;  %v9744_v33 = vld [vmem:[#allocation54_spill] sm:$0xff] }
 0x728   : > { %6393 = vmatpush1.bf16.msra.mxu0 %v9734_v49  ;;  %6425 = vmatpush1.bf16.msra.mxu1 %v9735_v50  ;;  %v9745_v49 = vld [vmem:[#allocation55_spill] sm:$0xff]  ;;  %v9746_v50 = vld [vmem:[#allocation56_spill] sm:$0xff] }
 0x729   : > { %6395 = vmatprep.subr.bf16.mxu0 %v9736_v44  ;;  %6427 = vmatprep.subr.bf16.mxu1 %v9737_v62  ;;  %v9747_v44 = vld [vmem:[#allocation57_spill] sm:$0xff]  ;;  %v9748_v62 = vld [vmem:[#allocation58_spill] sm:$0xff] }
 0x72c   : > { %6397 = vmatpush1.bf16.msra.mxu0 %v9738_v43  ;;  %6429 = vmatpush1.bf16.msra.mxu1 %v9739_v52  ;;  %v9749_v43 = vld [vmem:[#allocation59_spill] sm:$0xff]  ;;  %v9750_v52 = vld [vmem:[#allocation60_spill] sm:$0xff] }
 0x72d   : > { %6399 = vmatprep.subr.bf16.mxu0 %v9740_v60  ;;  %6431 = vmatprep.subr.bf16.mxu1 %v9741_v7  ;;  %v9751_v60 = vld [vmem:[#allocation61_spill] sm:$0xff]  ;;  %v9752_v7 = vld [vmem:[#allocation62_spill] sm:$0xff] }
 0x730   : > { %6401 = vmatpush1.bf16.msra.mxu0 %v9742_v24  ;;  %6433 = vmatpush1.bf16.msra.mxu1 %v9743_v15  ;;  %v9753_v24 = vld [vmem:[#allocation63_spill] sm:$0xff]  ;;  %v9754_v15 = vld [vmem:[#allocation64_spill] sm:$0xff] }
 0x731   : > { %6403 = vmatprep.subr.bf16.mxu0 %v9744_v33  ;;  %6435 = vmatprep.subr.bf16.mxu1 %v9745_v49  ;;  %v9755_v33 = vld [vmem:[#allocation65_spill] sm:$0xff]  ;;  %v9756_v49 = vld [vmem:[#allocation66_spill] sm:$0xff] }
 0x734   : > { %6405 = vmatpush1.bf16.msra.mxu0 %v9746_v50  ;;  %6437 = vmatpush1.bf16.msra.mxu1 %v9747_v44  ;;  %v9757_v50 = vld [vmem:[#allocation67_spill] sm:$0xff] }
 0x735   : > { %6407 = vmatprep.subr.bf16.mxu0 %v9748_v62  ;;  %6439 = vmatprep.subr.bf16.mxu1 %v9749_v43 }
 0x738   : > { %6409 = vmatpush1.bf16.msra.mxu0 %v9750_v52  ;;  %6441 = vmatpush1.bf16.msra.mxu1 %v9751_v60 }
 0x739   : > { %6411 = vmatprep.subr.bf16.mxu0 %v9752_v7  ;;  %6443 = vmatprep.subr.bf16.mxu1 %v9753_v24 }
 0x73c   : > { %6413 = vmatpush1.bf16.msra.mxu0 %v9754_v15  ;;  %6445 = vmatpush1.bf16.msra.mxu1 %v9755_v33 }
 0x73d   : > { %6447 = vmatprep.subr.bf16.mxu0 %v9756_v49  ;;  %6479 = vmatprep.subr.bf16.mxu1 %v9757_v50 }
 0x7d2   : > { %v3717_v44 = vpop.f32.mrb[26].mxu0  ;;  %v3788_v62 = vpop.f32.mrb[28].mxu1 }
 0x7d3   : > { %v3793_v43 = vadd.f32 %v3717_v44, %v9758_v45  ;;  %v3719_v55 = vpop.f32.mrb[27].mxu0  ;;  %v3790_v52 = vpop.f32.mrb[29].mxu1  ;;  %v3795_v33 = vadd.f32 %v3788_v62, %v9518_v25 }
 0x7d4   : > { %v3794_v60 = vadd.f32 %v3719_v55, %v9516_v28  ;;  %v3796_v15 = vadd.f32 %v3790_v52, %v9517_v2 }
 0x7d5   : > { %v5064_v47 = vmul.f32 -1.442695, %v3793_v43 }
 0x7d6   : > { %v5065_v7 = vmul.f32 -1.442695, %v3794_v60  ;;  %v5066_v24 = vmul.f32 -1.442695, %v3796_v15 }
 0x7d7   : > { %7016 = vpow2.f32 %v5064_v47 }
 0x7d8   : > { %7018 = vpow2.f32 %v5065_v7 }
 0x7d9   : > { %7020 = vpow2.f32 %v5066_v24 }
 0x7da   : > { %7022 = vtanh.f32 %v3795_v33 }
 0x7e1   : > { %v7017_v49 = vpop.eup %7016 }
 0x7e2   : > { %v7019_v61 = vpop.eup %7018  ;;  %v3800_v50 = vadd.f32 1.0, %v7017_v49 }
 0x7e3   : > { %v3806_v39 = vadd.f32 1.0, %v7019_v61  ;;  %v7021_v44 = vpop.eup %7020 }
 0x7e4   : > { %7024 = vrcp.f32 %v3800_v50  ;;  %v7023_v45 = vpop.eup %7022  ;;  %v3813_v47 = vadd.f32 1.0, %v7021_v44 }
 0x7e5   : > { %7026 = vrcp.f32 %v3806_v39 }
 0x7e6   : > { %7028 = vrcp.f32 %v3813_v47 }
 0x7ee   : > { %v7025_v55 = vpop.eup %7024 }
 0x7ef   : > { %v7027_v43 = vpop.eup %7026  ;;  %v3817_v60 = vmul.f32 %v7025_v55, %v7023_v45 }
 0x7f0   : > { %v3816_v7 = vmul.f32 %v7027_v43, %v8761_v46  ;;  %v7029_v46 = vpop.eup %7028 }
 0x7f2   : > { %v8883_v52 = vadd.f32 %v3817_v60, %v3816_v7  ;;  %v3894_v15 = vpop.f32.mrb[12].mxu0  ;;  %v3965_v62 = vpop.f32.mrb[12].mxu1 }
 0x7f3   : > { %v6748_v49 = vadd.f32 %v3894_v15, %v9457_v54  ;;  %v3896_v24 = vpop.f32.mrb[13].mxu0  ;;  %v3967_v33 = vpop.f32.mrb[13].mxu1  ;;  %v6764_v43 = vadd.f32 %v3965_v62, %v8171_v41 }
 0x7f4   : > { %v6749_v61 = vadd.f32 %v3896_v24, %v9458_v35  ;;  %7030 = vtanh.f32 %v8883_v52  ;;  %v6765_v45 = vadd.f32 %v3967_v33, %v8175_v16 }
 0x7f5   : > { %v5067_v39 = vmul.f32 -1.442695, %v6748_v49 }
 0x7f6   : > { %v5068_v50 = vmul.f32 -1.442695, %v6749_v61  ;;  %v5069_v55 = vmul.f32 -1.442695, %v6765_v45 }
 0x7f7   : > { %7032 = vpow2.f32 %v5067_v39 }
 0x7f8   : > { %7034 = vpow2.f32 %v5068_v50 }
 0x7f9   : > { %7036 = vpow2.f32 %v5069_v55 }
 0x7fa   : > { %7038 = vtanh.f32 %v6764_v43  ;;  %v9761_v43 = vld [vmem:[#allocation10_spill] sm:$0xff] }
 0x7fe   : > { %v7031_v44 = vpop.eup %7030 }
 0x7ff   : > { %v8890_v60 = vmul.f32 %v7031_v44, %v7029_v46 }
 0x801   : > { %v7033_v47 = vpop.eup %7032  ;;  %4063 = vmatmul.mubr.f32.vlgmr.msra.gmra.mrb[28].mxu0 %v8890_v60  ;;  %4134 = vmatmul.mubr.f32.vlgmr.msra.gmra.mrb[30].mxu1 %v8890_v60 }
 0x802   : > { %v7035_v7 = vpop.eup %7034  ;;  %v3977_v15 = vadd.f32 1.0, %v7033_v47  ;;  %6449 = vmatpush1.bf16.msra.mxu0 %v9460_v8  ;;  %6481 = vmatpush1.bf16.msra.mxu1 %v9520_v26  ;;  %v9766_v47 = vld [vmem:[#allocation25_spill] sm:$0xff] }
 0x803   : > { %v3983_v49 = vadd.f32 1.0, %v7035_v7  ;;  %6451 = vmatprep.subr.bf16.mxu0 %v9521_v17  ;;  %6483 = vmatprep.subr.bf16.mxu1 %v9522_v14  ;;  %v7037_v62 = vpop.eup %7036  ;;  %v9767_v7 = vld [vmem:[#allocation13_spill] sm:$0xff] }
 0x804   : > { %7040 = vrcp.f32 %v3977_v15  ;;  %4204 = vmatprep.mubr.f32.mxu0 %v9401_v48  ;;  %4275 = vmatprep.mubr.f32.mxu1 %v9401_v48  ;;  %v7039_v24 = vpop.eup %7038  ;;  %v3990_v50 = vadd.f32 1.0, %v7037_v62  ;;  %v9770_v15 = vld [vmem:[#allocation27_spill] sm:$0xff]  ;;  %v9772_v62 = vld [vmem:[#allocation28_spill] sm:$0xff] }
 0x805   : > { %7042 = vrcp.f32 %v3983_v49  ;;  %v9771_v49 = vld [vmem:[#allocation15_spill] sm:$0xff] }
 0x806   : > { %6453 = vmatpush1.bf16.msra.mxu0 %v9523_v51  ;;  %6485 = vmatpush1.bf16.msra.mxu1 %v9580_v13  ;;  %7044 = vrcp.f32 %v3990_v50  ;;  %v9777_v50 = vld [vmem:[#allocation18_spill] sm:$0xff] }
 0x807   : > { %6455 = vmatprep.subr.bf16.mxu0 %v9581_v63  ;;  %6487 = vmatprep.subr.bf16.mxu1 %v9582_v5 }
 0x80a   : > { %6457 = vmatpush1.bf16.msra.mxu0 %v9583_v6  ;;  %6489 = vmatpush1.bf16.msra.mxu1 %v9584_v56 }
 0x80b   : > { %6459 = vmatprep.subr.bf16.mxu0 %v9585_v53  ;;  %6491 = vmatprep.subr.bf16.mxu1 %v9586_v4 }
 0x80e   : > { %v7041_v33 = vpop.eup %7040  ;;  %6461 = vmatpush1.bf16.msra.mxu0 %v9587_v9  ;;  %6493 = vmatpush1.bf16.msra.mxu1 %v9473_v37 }
 0x80f   : > { %v7043_v61 = vpop.eup %7042  ;;  %v3994_v39 = vmul.f32 %v7041_v33, %v7039_v24  ;;  %6463 = vmatprep.subr.bf16.mxu0 %v9474_v36  ;;  %6495 = vmatprep.subr.bf16.mxu1 %v9475_v19  ;;  %v9773_v24 = vld [vmem:[#allocation16_spill] sm:$0xff]  ;;  %v9774_v33 = vld [vmem:[#allocation29_spill] sm:$0xff] }
 0x810   : > { %v3993_v45 = vmul.f32 %v7043_v61, %v8791_v42  ;;  %v7045_v42 = vpop.eup %7044  ;;  %v9775_v61 = vld [vmem:[#allocation17_spill] sm:$0xff] }
 0x812   : > { %v8913_v46 = vadd.f32 %v3994_v39, %v3993_v45  ;;  %6465 = vmatpush1.bf16.msra.mxu0 %v9532_v34  ;;  %6497 = vmatpush1.bf16.msra.mxu1 %v9533_v58  ;;  %v9776_v39 = vld [vmem:[#allocation30_spill] sm:$0xff]  ;;  %v9778_v45 = vld [vmem:[#allocation31_spill] sm:$0xff] }
 0x813   : > { %6467 = vmatprep.subr.bf16.mxu0 %v9534_v40  ;;  %6499 = vmatprep.subr.bf16.mxu1 %v9535_v21 }
 0x814   : > { %7046 = vtanh.f32 %v8913_v46 }
 0x816   : > { %6469 = vmatpush1.bf16.msra.mxu0 %v9536_v20  ;;  %6501 = vmatpush1.bf16.msra.mxu1 %v9537_v59 }
 0x817   : > { %6471 = vmatprep.subr.bf16.mxu0 %v9538_v11  ;;  %6503 = vmatprep.subr.bf16.mxu1 %v9483_v1 }
 0x81a   : > { %6473 = vmatpush1.bf16.msra.mxu0 %v9484_v10  ;;  %6505 = vmatpush1.bf16.msra.mxu1 %v9485_v27 }
 0x81b   : > { %6475 = vmatprep.subr.bf16.mxu0 %v9486_v18  ;;  %6507 = vmatprep.subr.bf16.mxu1 %v9487_v3 }
 0x81e   : > { %v7047_v44 = vpop.eup %7046  ;;  %6477 = vmatpush1.bf16.msra.mxu0 %v9488_v0  ;;  %6509 = vmatpush1.bf16.msra.mxu1 %v9489_v30 }
 0x81f   : > { %6511 = vmatprep.subr.bf16.mxu0 %v9490_v57  ;;  %6543 = vmatprep.subr.bf16.mxu1 %v9491_v12  ;;  %v3997_v55 = vmul.f32 %v7047_v44, %v7045_v42  ;;  %v9759_v57 = vld [vmem:[#allocation9_spill] sm:$0xff]  ;;  %v9760_v12 = vld [vmem:[#allocation22_spill] sm:$0xff]  ;;  %v9779_v42 = vld [vmem:[#allocation19_spill] sm:$0xff] }
 0x820   : > { %v9780_v44 = vld [vmem:[#allocation32_spill] sm:$0xff] }
 0x821   : > { %4205 = vmatmul.mubr.f32.vlgmr.msra.gmra.mrb[28].mxu0 %v3997_v55  ;;  %4276 = vmatmul.mubr.f32.vlgmr.msra.gmra.mrb[30].mxu1 %v3997_v55 }
 0x822   : > { %6513 = vmatpush1.bf16.msra.mxu0 %v7223_v22  ;;  %6545 = vmatpush1.bf16.msra.mxu1 %v7434_v31  ;;  %v9762_v22 = vld [vmem:[#allocation23_spill] sm:$0xff] }
 0x823   : > { %6515 = vmatprep.subr.bf16.mxu0 %v7226_v23  ;;  %6547 = vmatprep.subr.bf16.mxu1 %v7437_v32  ;;  %v9763_v31 = vld [vmem:[#allocation11_spill] sm:$0xff]  ;;  %v9764_v23 = vld [vmem:[#allocation24_spill] sm:$0xff] }
 0x824   : > { %4381 = vmatprep.mubr.f32.mxu0 %v9401_v48  ;;  %4452 = vmatprep.mubr.f32.mxu1 %v9401_v48  ;;  %v9765_v32 = vld [vmem:[#allocation12_spill] sm:$0xff] }
 0x826   : > { %6517 = vmatpush1.bf16.msra.mxu0 %v7247_v29  ;;  %6549 = vmatpush1.bf16.msra.mxu1 %v7455_v38  ;;  %v9768_v29 = vld [vmem:[#allocation26_spill] sm:$0xff] }
 0x827   : > { %6519 = vmatprep.subr.bf16.mxu0 %v9759_v57  ;;  %6551 = vmatprep.subr.bf16.mxu1 %v9760_v12  ;;  %v9769_v38 = vld [vmem:[#allocation14_spill] sm:$0xff]  ;;  %v9781_v57 = vld [vmem:[#allocation20_spill] sm:$0xff]  ;;  %v9782_v12 = vld [vmem:[#allocation33_spill] sm:$0xff] }
 0x82a   : > { %6521 = vmatpush1.bf16.msra.mxu0 %v9761_v43  ;;  %6553 = vmatpush1.bf16.msra.mxu1 %v9762_v22  ;;  %v9783_v43 = vld [vmem:[#allocation34_spill] sm:$0xff]  ;;  %v9784_v22 = vld [vmem:[#allocation35_spill] sm:$0xff] }
 0x82b   : > { %6523 = vmatprep.subr.bf16.mxu0 %v9763_v31  ;;  %6555 = vmatprep.subr.bf16.mxu1 %v9764_v23  ;;  %v9785_v31 = vld [vmem:[#allocation36_spill] sm:$0xff]  ;;  %v9786_v23 = vld [vmem:[#allocation37_spill] sm:$0xff] }
 0x82e   : > { %6525 = vmatpush1.bf16.msra.mxu0 %v9765_v32  ;;  %6557 = vmatpush1.bf16.msra.mxu1 %v9766_v47  ;;  %v9787_v32 = vld [vmem:[#allocation38_spill] sm:$0xff]  ;;  %v9788_v47 = vld [vmem:[#allocation39_spill] sm:$0xff] }
 0x82f   : > { %6527 = vmatprep.subr.bf16.mxu0 %v9767_v7  ;;  %6559 = vmatprep.subr.bf16.mxu1 %v9768_v29  ;;  %v9789_v7 = vld [vmem:[#allocation40_spill] sm:$0xff]  ;;  %v9790_v29 = vld [vmem:[#allocation41_spill] sm:$0xff] }
 0x832   : > { %6529 = vmatpush1.bf16.msra.mxu0 %v9769_v38  ;;  %6561 = vmatpush1.bf16.msra.mxu1 %v9770_v15  ;;  %v9791_v38 = vld [vmem:[#allocation42_spill] sm:$0xff]  ;;  %v9792_v15 = vld [vmem:[#allocation43_spill] sm:$0xff] }
 0x833   : > { %6531 = vmatprep.subr.bf16.mxu0 %v9771_v49  ;;  %6563 = vmatprep.subr.bf16.mxu1 %v9772_v62  ;;  %v9794_v49 = vld [vmem:[#allocation45_spill] sm:$0xff]  ;;  %v9795_v62 = vld [vmem:[#allocation46_spill] sm:$0xff] }
 0x836   : > { %6533 = vmatpush1.bf16.msra.mxu0 %v9773_v24  ;;  %6565 = vmatpush1.bf16.msra.mxu1 %v9774_v33  ;;  %v9796_v24 = vld [vmem:[#allocation47_spill] sm:$0xff]  ;;  %v9797_v33 = vld [vmem:[#allocation48_spill] sm:$0xff] }
 0x837   : > { %6535 = vmatprep.subr.bf16.mxu0 %v9775_v61  ;;  %6567 = vmatprep.subr.bf16.mxu1 %v9776_v39  ;;  %v9798_v61 = vld [vmem:[#allocation49_spill] sm:$0xff]  ;;  %v9799_v39 = vld [vmem:[#allocation50_spill] sm:$0xff] }
 0x83a   : > { %6537 = vmatpush1.bf16.msra.mxu0 %v9777_v50  ;;  %6569 = vmatpush1.bf16.msra.mxu1 %v9778_v45  ;;  %v9800_v50 = vld [vmem:[#allocation51_spill] sm:$0xff]  ;;  %v9801_v45 = vld [vmem:[#allocation52_spill] sm:$0xff] }
 0x83b   : > { %6539 = vmatprep.subr.bf16.mxu0 %v9779_v42  ;;  %6571 = vmatprep.subr.bf16.mxu1 %v9780_v44  ;;  %v9802_v42 = vld [vmem:[#allocation53_spill] sm:$0xff]  ;;  %v9803_v44 = vld [vmem:[#allocation54_spill] sm:$0xff] }
 0x83e   : > { %6541 = vmatpush1.bf16.msra.mxu0 %v9781_v57  ;;  %6573 = vmatpush1.bf16.msra.mxu1 %v9782_v12  ;;  %v9804_v57 = vld [vmem:[#allocation55_spill] sm:$0xff]  ;;  %v9805_v12 = vld [vmem:[#allocation56_spill] sm:$0xff] }
 0x83f   : > { %6575 = vmatprep.subr.bf16.mxu0 %v9783_v43  ;;  %6607 = vmatprep.subr.bf16.mxu1 %v9784_v22  ;;  %v9806_v43 = vld [vmem:[#allocation57_spill] sm:$0xff]  ;;  %v9807_v22 = vld [vmem:[#allocation58_spill] sm:$0xff] }
 0x841   : > { %4382 = vmatmul.mubr.f32.vlgmr.msra.gmra.mrb[14].mxu0 %v3997_v55  ;;  %4453 = vmatmul.mubr.f32.vlgmr.msra.gmra.mrb[14].mxu1 %v3997_v55  ;;  %v9793_v55 = vld [vmem:[#allocation44_spill] sm:$0xff] }
 0x842   : > { %6577 = vmatpush1.bf16.msra.mxu0 %v9785_v31  ;;  %6609 = vmatpush1.bf16.msra.mxu1 %v9786_v23  ;;  %v9808_v31 = vld [vmem:[#allocation59_spill] sm:$0xff]  ;;  %v9809_v23 = vld [vmem:[#allocation60_spill] sm:$0xff] }
 0x843   : > { %6579 = vmatprep.subr.bf16.mxu0 %v9787_v32  ;;  %6611 = vmatprep.subr.bf16.mxu1 %v9788_v47  ;;  %v9810_v32 = vld [vmem:[#allocation61_spill] sm:$0xff]  ;;  %v9811_v47 = vld [vmem:[#allocation62_spill] sm:$0xff] }
 0x844   : > { %4551 = vmatprep.mubr.f32.mxu0 %v9401_v48  ;;  %4622 = vmatprep.mubr.f32.mxu1 %v9401_v48 }
 0x846   : > { %6581 = vmatpush1.bf16.msra.mxu0 %v9789_v7  ;;  %6613 = vmatpush1.bf16.msra.mxu1 %v9790_v29  ;;  %v9812_v7 = vld [vmem:[#allocation63_spill] sm:$0xff]  ;;  %v9813_v29 = vld [vmem:[#allocation64_spill] sm:$0xff] }
 0x847   : > { %6583 = vmatprep.subr.bf16.mxu0 %v9791_v38  ;;  %6615 = vmatprep.subr.bf16.mxu1 %v9792_v15  ;;  %v9814_v38 = vld [vmem:[#allocation65_spill] sm:$0xff]  ;;  %v9815_v15 = vld [vmem:[#allocation66_spill] sm:$0xff] }
 0x84a   : > { %6585 = vmatpush1.bf16.msra.mxu0 %v9793_v55  ;;  %6617 = vmatpush1.bf16.msra.mxu1 %v9794_v49  ;;  %v9816_v55 = vld [vmem:[#allocation67_spill] sm:$0xff] }
 0x84b   : > { %6587 = vmatprep.subr.bf16.mxu0 %v9795_v62  ;;  %6619 = vmatprep.subr.bf16.mxu1 %v9796_v24  ;;  %v9817_v24 = vld [vmem:[#allocation100_spill] sm:$0xff] }
 0x84e   : > { %6589 = vmatpush1.bf16.msra.mxu0 %v9797_v33  ;;  %6621 = vmatpush1.bf16.msra.mxu1 %v9798_v61 }
 0x84f   : > { %6591 = vmatprep.subr.bf16.mxu0 %v9799_v39  ;;  %6623 = vmatprep.subr.bf16.mxu1 %v9800_v50 }
 0x852   : > { %6593 = vmatpush1.bf16.msra.mxu0 %v9801_v45  ;;  %6625 = vmatpush1.bf16.msra.mxu1 %v9802_v42 }
 0x853   : > { %6595 = vmatprep.subr.bf16.mxu0 %v9803_v44  ;;  %6627 = vmatprep.subr.bf16.mxu1 %v9804_v57 }
 0x856   : > { %6597 = vmatpush1.bf16.msra.mxu0 %v9805_v12  ;;  %6629 = vmatpush1.bf16.msra.mxu1 %v9806_v43 }
 0x857   : > { %6599 = vmatprep.subr.bf16.mxu0 %v9807_v22  ;;  %6631 = vmatprep.subr.bf16.mxu1 %v9808_v31 }
 0x85a   : > { %6601 = vmatpush1.bf16.msra.mxu0 %v9809_v23  ;;  %6633 = vmatpush1.bf16.msra.mxu1 %v9810_v32 }
 0x85b   : > { %6603 = vmatprep.subr.bf16.mxu0 %v9811_v47  ;;  %6635 = vmatprep.subr.bf16.mxu1 %v9812_v7 }
 0x85e   : > { %6605 = vmatpush1.bf16.msra.mxu0 %v9813_v29  ;;  %6637 = vmatpush1.bf16.msra.mxu1 %v9814_v38 }
 0x85f   : > { %6639 = vmatprep.subr.bf16.mxu0 %v9815_v15  ;;  %6671 = vmatprep.subr.bf16.mxu1 %v9816_v55 }
 0x8f4   : > { %v4206_v49 = vpop.f32.mrb[28].mxu0  ;;  %v4277_v62 = vpop.f32.mrb[30].mxu1 }
 0x8f5   : > { %v4282_v33 = vadd.f32 %v4206_v49, %v9817_v24  ;;  %v4208_v61 = vpop.f32.mrb[29].mxu0  ;;  %v4279_v39 = vpop.f32.mrb[31].mxu1  ;;  %v4284_v12 = vadd.f32 %v4277_v62, %v9518_v25 }
 0x8f6   : > { %v4283_v50 = vadd.f32 %v4208_v61, %v9516_v28  ;;  %v4285_v44 = vadd.f32 %v4279_v39, %v9517_v2 }
 0x8f7   : > { %v5070_v45 = vmul.f32 -1.442695, %v4282_v33 }
 0x8f8   : > { %v5071_v42 = vmul.f32 -1.442695, %v4283_v50  ;;  %v5072_v57 = vmul.f32 -1.442695, %v4285_v44 }
 0x8f9   : > { %7048 = vpow2.f32 %v5070_v45 }
 0x8fa   : > { %7050 = vpow2.f32 %v5071_v42 }
 0x8fb   : > { %7052 = vpow2.f32 %v5072_v57 }
 0x8fc   : > { %7054 = vtanh.f32 %v4284_v12 }
 0x903   : > { %v7049_v43 = vpop.eup %7048 }
 0x904   : > { %v7051_v22 = vpop.eup %7050  ;;  %v4289_v31 = vadd.f32 1.0, %v7049_v43 }
 0x905   : > { %v4295_v23 = vadd.f32 1.0, %v7051_v22  ;;  %v7053_v32 = vpop.eup %7052 }
 0x906   : > { %7056 = vrcp.f32 %v4289_v31  ;;  %v7055_v47 = vpop.eup %7054  ;;  %v4302_v15 = vadd.f32 1.0, %v7053_v32  ;;  %v4827_v32 = vld [vmem:[%s9130_s7 + $0x70] sm:$0xff] }
 0x907   : > { %7058 = vrcp.f32 %v4295_v23 }
 0x908   : > { %7060 = vrcp.f32 %v4302_v15  ;;  %v9821_v15 = vld [vmem:[#allocation81_spill] sm:$0xff] }
 0x910   : > { %v7057_v7 = vpop.eup %7056 }
 0x911   : > { %v7059_v29 = vpop.eup %7058  ;;  %v4306_v38 = vmul.f32 %v7057_v7, %v7055_v47  ;;  %v4828_v47 = vld [vmem:[%s9130_s7 + $0x78] sm:$0xff] }
 0x912   : > { %v4305_v55 = vmul.f32 %v7059_v29, %v8883_v52  ;;  %v7061_v52 = vpop.eup %7060  ;;  %v6730_v7 = vpack.c.bf16 %v4828_v47, %v4827_v32  ;;  %v9819_v29 = vld [vmem:[#allocation99_spill] sm:$0xff] }
 0x914   : > { %v9005_v49 = vadd.f32 %v4306_v38, %v4305_v55  ;;  %v4383_v33 = vpop.f32.mrb[14].mxu0  ;;  %v4454_v62 = vpop.f32.mrb[14].mxu1  ;;  %v9820_v38 = vld [vmem:[#allocation68_spill] sm:$0xff]  ;;  %v9822_v55 = vld [vmem:[#allocation82_spill] sm:$0xff] }
 0x915   : > { %v6750_v61 = vadd.f32 %v4383_v33, %v9457_v54  ;;  %v4385_v39 = vpop.f32.mrb[15].mxu0  ;;  %v4456_v50 = vpop.f32.mrb[15].mxu1  ;;  %v6766_v22 = vadd.f32 %v4454_v62, %v8171_v41 }
 0x916   : > { %v6751_v45 = vadd.f32 %v4385_v39, %v9458_v35  ;;  %7062 = vtanh.f32 %v9005_v49  ;;  %v6767_v57 = vadd.f32 %v4456_v50, %v8175_v16 }
 0x917   : > { %v5073_v42 = vmul.f32 -1.442695, %v6750_v61 }
 0x918   : > { %v5074_v44 = vmul.f32 -1.442695, %v6751_v45  ;;  %v5075_v43 = vmul.f32 -1.442695, %v6767_v57 }
 0x919   : > { %7064 = vpow2.f32 %v5073_v42 }
 0x91a   : > { %7066 = vpow2.f32 %v5074_v44 }
 0x91b   : > { %7068 = vpow2.f32 %v5075_v43 }
 0x91c   : > { %7070 = vtanh.f32 %v6766_v22 }
 0x920   : > { %v7063_v12 = vpop.eup %7062 }
 0x921   : > { %v9012_v31 = vmul.f32 %v7063_v12, %v7061_v52 }
 0x923   : > { %v7065_v54 = vpop.eup %7064  ;;  %4552 = vmatmul.mubr.f32.vlgmr.msra.gmra.mrb[30].mxu0 %v9012_v31  ;;  %4623 = vmatmul.mubr.f32.vlgmr.msra.gmra.mrb[32].mxu1 %v9012_v31 }
 0x924   : > { %v7067_v35 = vpop.eup %7066  ;;  %v4466_v23 = vadd.f32 1.0, %v7065_v54  ;;  %6641 = vmatpush1.bf16.msra.mxu0 %v9460_v8  ;;  %6673 = vmatpush1.bf16.msra.mxu1 %v9520_v26 }
 0x925   : > { %v4472_v16 = vadd.f32 1.0, %v7067_v35  ;;  %6643 = vmatprep.subr.bf16.mxu0 %v9521_v17  ;;  %6675 = vmatprep.subr.bf16.mxu1 %v9522_v14  ;;  %v7069_v41 = vpop.eup %7068 }
 0x926   : > { %7072 = vrcp.f32 %v4466_v23  ;;  %4693 = vmatprep.mubr.f32.mxu0 %v9401_v48  ;;  %4764 = vmatprep.mubr.f32.mxu1 %v9401_v48  ;;  %v7071_v8 = vpop.eup %7070  ;;  %v4479_v14 = vadd.f32 1.0, %v7069_v41 }
 0x927   : > { %7074 = vrcp.f32 %v4472_v16 }
 0x928   : > { %6645 = vmatpush1.bf16.msra.mxu0 %v9523_v51  ;;  %6677 = vmatpush1.bf16.msra.mxu1 %v9580_v13  ;;  %7076 = vrcp.f32 %v4479_v14 }
 0x929   : > { %6647 = vmatprep.subr.bf16.mxu0 %v9581_v63  ;;  %6679 = vmatprep.subr.bf16.mxu1 %v9582_v5  ;;  %v4822_v63 = vld [vmem:[%s9130_s7 + $0x48] sm:$0xff] }
 0x92c   : > { %6649 = vmatpush1.bf16.msra.mxu0 %v9583_v6  ;;  %6681 = vmatpush1.bf16.msra.mxu1 %v9584_v56  ;;  %v4823_v6 = vld [vmem:[%s9130_s7 + $0x50] sm:$0xff]  ;;  %v4824_v56 = vld [vmem:[%s9130_s7 + $0x58] sm:$0xff] }
 0x92d   : > { %6651 = vmatprep.subr.bf16.mxu0 %v9585_v53  ;;  %6683 = vmatprep.subr.bf16.mxu1 %v9586_v4  ;;  %v6722_v53 = vpack.c.bf16 %v4824_v56, %v4823_v6  ;;  %v4825_v4 = vld [vmem:[%s9130_s7 + $0x60] sm:$0xff] }
 0x930   : > { %v7073_v48 = vpop.eup %7072  ;;  %6653 = vmatpush1.bf16.msra.mxu0 %v9587_v9  ;;  %6685 = vmatpush1.bf16.msra.mxu1 %v9473_v37  ;;  %v4814_v37 = vld [vmem:[%s9130_s7 + $0x8] sm:$0xff] }
 0x931   : > { %v7075_v26 = vpop.eup %7074  ;;  %v4483_v17 = vmul.f32 %v7073_v48, %v7071_v8  ;;  %6655 = vmatprep.subr.bf16.mxu0 %v9474_v36  ;;  %6687 = vmatprep.subr.bf16.mxu1 %v9475_v19  ;;  %v4813_v36 = vld [vmem:[%s9130_s7] sm:$0xff]  ;;  %v4826_v9 = vld [vmem:[%s9130_s7 + $0x68] sm:$0xff] }
 0x932   : > { %v4482_v51 = vmul.f32 %v7075_v26, %v8913_v46  ;;  %v6702_v19 = vpack.c.bf16 %v4814_v37, %v4813_v36  ;;  %v6726_v46 = vpack.c.bf16 %v4826_v9, %v4825_v4 }
 0x934   : > { %v4484_v13 = vadd.f32 %v4483_v17, %v4482_v51  ;;  %6657 = vmatpush1.bf16.msra.mxu0 %v9532_v34  ;;  %6689 = vmatpush1.bf16.msra.mxu1 %v9533_v58  ;;  %v7077_v34 = vpop.eup %7076 }
 0x935   : > { %6659 = vmatprep.subr.bf16.mxu0 %v9534_v40  ;;  %6691 = vmatprep.subr.bf16.mxu1 %v9535_v21  ;;  %v4816_v40 = vld [vmem:[%s9130_s7 + $0x18] sm:$0xff]  ;;  %v9818_v21 = vld [vmem:[#allocation98_spill] sm:$0xff] }
 0x936   : > { %4802 = vst [vmem:[#allocation3] sm:$0xff] %v4484_v13  ;;  %7078 = vtanh.f32 %v4484_v13 }
 0x938   : > { %6661 = vmatpush1.bf16.msra.mxu0 %v9536_v20  ;;  %6693 = vmatpush1.bf16.msra.mxu1 %v9537_v59  ;;  %v4820_v20 = vld [vmem:[%s9130_s7 + $0x38] sm:$0xff] }
 0x939   : > { %6663 = vmatprep.subr.bf16.mxu0 %v9538_v11  ;;  %6695 = vmatprep.subr.bf16.mxu1 %v9483_v1  ;;  %v4815_v1 = vld [vmem:[%s9130_s7 + $0x10] sm:$0xff]  ;;  %v4821_v11 = vld [vmem:[%s9130_s7 + $0x40] sm:$0xff] }
 0x93a   : > { %v6718_v5 = vpack.c.bf16 %v4822_v63, %v4821_v11 }
 0x93c   : > { %6665 = vmatpush1.bf16.msra.mxu0 %v9484_v10  ;;  %6697 = vmatpush1.bf16.msra.mxu1 %v9485_v27  ;;  %v6706_v27 = vpack.c.bf16 %v4816_v40, %v4815_v1 }
 0x93d   : > { %6667 = vmatprep.subr.bf16.mxu0 %v9486_v18  ;;  %6699 = vmatprep.subr.bf16.mxu1 %v9487_v3  ;;  %v4817_v18 = vld [vmem:[%s9130_s7 + $0x20] sm:$0xff]  ;;  %v4818_v3 = vld [vmem:[%s9130_s7 + $0x28] sm:$0xff] }
 0x940   : > { %v7079_v58 = vpop.eup %7078  ;;  %6669 = vmatpush1.bf16.msra.mxu0 %v9488_v0  ;;  %6701 = vmatpush1.bf16.msra.mxu1 %v9489_v30  ;;  %v6710_v0 = vpack.c.bf16 %v4818_v3, %v4817_v18  ;;  %v4819_v30 = vld [vmem:[%s9130_s7 + $0x30] sm:$0xff] }
 0x941   : > { %v4486_v10 = vmul.f32 %v7079_v58, %v7077_v34  ;;  %6703 = vmatprep.subr.bf16.mxu0 %v6702_v19  ;;  %v6714_v59 = vpack.c.bf16 %v4820_v20, %v4819_v30 }
 0x943   : > { %4694 = vmatmul.mubr.f32.vlgmr.msra.gmra.mrb[30].mxu0 %v4486_v10  ;;  %4801 = vst [vmem:[#allocation2] sm:$0xff] %v4486_v10  ;;  %4765 = vmatmul.mubr.f32.vlgmr.msra.gmra.mrb[32].mxu1 %v4486_v10 }
 0x944   : > { %6705 = vmatpush3.bf16.msra.mxu0 %v6702_v19  ;;  %5138 = vmatprep.mubr.f32.mxu0 %v9818_v21 }
 0x945   : > { %6707 = vmatprep.subr.bf16.mxu0 %v6706_v27 }
 0x948   : > { %6709 = vmatpush3.bf16.msra.mxu0 %v6706_v27 }
 0x949   : > { %6711 = vmatprep.subr.bf16.mxu0 %v6710_v0 }
 0x94c   : > { %6713 = vmatpush3.bf16.msra.mxu0 %v6710_v0 }
 0x94d   : > { %6715 = vmatprep.subr.bf16.mxu0 %v6714_v59 }
 0x950   : > { %6717 = vmatpush3.bf16.msra.mxu0 %v6714_v59 }
 0x951   : > { %6719 = vmatprep.subr.bf16.mxu0 %v6718_v5 }
 0x954   : > { %6721 = vmatpush3.bf16.msra.mxu0 %v6718_v5 }
 0x955   : > { %6723 = vmatprep.subr.bf16.mxu0 %v6722_v53 }
 0x958   : > { %6725 = vmatpush3.bf16.msra.mxu0 %v6722_v53 }
 0x959   : > { %6727 = vmatprep.subr.bf16.mxu0 %v6726_v46 }
 0x95c   : > { %6729 = vmatpush3.bf16.msra.mxu0 %v6726_v46 }
 0x95d   : > { %6731 = vmatprep.subr.bf16.mxu0 %v6730_v7 }
 0x960   : > { %6733 = vmatpush3.bf16.msra.mxu0 %v6730_v7 }
 0x963   : > { %5139 = vmatmul.mubr.f32.vlgmr.msra.gmra.mrb[32].mxu0 %v9819_v29 }
 0x964   : > { %5141 = vmatprep.mubr.f32.mxu0 %v9820_v38 }
 0x967   : > { %5142 = vmatmul.mubr.f32.gmra.mrb[34].mxu0 %v9821_v15 }
 0x968   : > { %5144 = vmatprep.mubr.f32.mxu0 %v9822_v55 }
 0x96b   : > { %5145 = vmatmul.mubr.f32.gmra.mrb[36].mxu0 %v8890_v60 }
 0x96c   : > { %5147 = vmatprep.mubr.f32.mxu0 %v9012_v31 }
 0xa16   : > { %v4695_v33 = vpop.f32.mrb[30].mxu0  ;;  %v4766_v62 = vpop.f32.mrb[32].mxu1 }
 0xa17   : > { %v4771_v61 = vadd.f32 %v4695_v33, %v9817_v24  ;;  %v4697_v39 = vpop.f32.mrb[31].mxu0  ;;  %v4768_v50 = vpop.f32.mrb[33].mxu1  ;;  %v4773_v12 = vadd.f32 %v4766_v62, %v9518_v25  ;;  %v5079_v25 = vld [vmem:[%s9131_s8] ss:$0 sm:$0xff] }
 0xa18   : > { %v4772_v45 = vadd.f32 %v4697_v39, %v9516_v28  ;;  %v4774_v57 = vadd.f32 %v4768_v50, %v9517_v2 }
 0xa19   : > { %v5076_v42 = vmul.f32 -1.442695, %v4771_v61 }
 0xa1a   : > { %v5077_v44 = vmul.f32 -1.442695, %v4772_v45  ;;  %v5078_v52 = vmul.f32 -1.442695, %v4774_v57 }
 0xa1b   : > { %7080 = vpow2.f32 %v5076_v42 }
 0xa1c   : > { %7082 = vpow2.f32 %v5077_v44 }
 0xa1d   : > { %7084 = vpow2.f32 %v5078_v52 }
 0xa1e   : > { %7086 = vtanh.f32 %v4773_v12 }
 0xa25   : > { %v7081_v60 = vpop.eup %7080 }
 0xa26   : > { %v7083_v43 = vpop.eup %7082  ;;  %v4778_v22 = vadd.f32 1.0, %v7081_v60 }
 0xa27   : > { %v4784_v31 = vadd.f32 1.0, %v7083_v43  ;;  %v7085_v24 = vpop.eup %7084 }
 0xa28   : > { %7088 = vrcp.f32 %v4778_v22  ;;  %v7087_v28 = vpop.eup %7086  ;;  %v4791_v16 = vadd.f32 1.0, %v7085_v24 }
 0xa29   : > { %7090 = vrcp.f32 %v4784_v31 }
 0xa2a   : > { %7092 = vrcp.f32 %v4791_v16 }
 0xa32   : > { %v7089_v54 = vpop.eup %7088 }
 0xa33   : > { %v7091_v35 = vpop.eup %7090  ;;  %v4795_v23 = vmul.f32 %v7089_v54, %v7087_v28 }
 0xa34   : > { %v4794_v2 = vmul.f32 %v7091_v35, %v9005_v49  ;;  %v7093_v40 = vpop.eup %7092 }
 0xa36   : > { %v5140_v41 = vpop.f32.mrb[32].mxu0  ;;  %v4796_v8 = vadd.f32 %v4795_v23, %v4794_v2 }
 0xa37   : > { %v4908_v48 = vadd.f32 %v5140_v41, %v5079_v25  ;;  %v4902_v26 = vpop.f32.mrb[33].mxu0 }
 0xa38   : > { %v4903_v17 = vadd.f32 %v5079_v25, %v4902_v26  ;;  %7094 = vtanh.f32 %v4796_v8  ;;  %4804 = vst [vmem:[#allocation5] sm:$0xff] %v4796_v8 }
 0xa39   : > { %4942 = vst [vmem:[%s7172_s18 + $0x8] sm:$0xff] %v4908_v48 }
 0xa3a   : > { %4941 = vst [vmem:[%s7172_s18] sm:$0xff] %v4903_v17  ;;  %v5143_v14 = vpop.f32.mrb[34].mxu0 }
 0xa3b   : > { %v4918_v49 = vadd.f32 %v5143_v14, %v5079_v25  ;;  %v4912_v51 = vpop.f32.mrb[35].mxu0 }
 0xa3c   : > { %v4913_v13 = vadd.f32 %v5079_v25, %v4912_v51 }
 0xa3d   : > { %4944 = vst [vmem:[%s7172_s18 + $0x18] sm:$0xff] %v4918_v49 }
 0xa3e   : > { %4943 = vst [vmem:[%s7172_s18 + $0x10] sm:$0xff] %v4913_v13  ;;  %v5146_v36 = vpop.f32.mrb[36].mxu0 }
 0xa3f   : > { %v4928_v37 = vadd.f32 %v5146_v36, %v5079_v25  ;;  %v4922_v19 = vpop.f32.mrb[37].mxu0 }
 0xa40   : > { %v4923_v1 = vadd.f32 %v5079_v25, %v4922_v19 }
 0xa41   : > { %4946 = vst [vmem:[%s7172_s18 + $0x28] sm:$0xff] %v4928_v37 }
 0xa42   : > { %v7095_v34 = vpop.eup %7094  ;;  %4945 = vst [vmem:[%s7172_s18 + $0x20] sm:$0xff] %v4923_v1 }
 0xa43   : > { %v4798_v58 = vmul.f32 %v7095_v34, %v7093_v40 }
 0xa45   : > { %4803 = vst [vmem:[#allocation4] sm:$0xff] %v4798_v58  ;;  %5148 = vmatmul.mubr.f32.gmra.mrb[38].mxu0 %v4798_v58 }
 0xb18   : > { %v5149_v10 = vpop.f32.mrb[38].mxu0 }
 0xb19   : > { %v4938_v27 = vadd.f32 %v5149_v10, %v5079_v25  ;;  %v4932_v18 = vpop.f32.mrb[39].mxu0 }
 0xb1a   : > { %v4933_v3 = vadd.f32 %v5079_v25, %v4932_v18 }
 0xb1b   : > { %4948 = vst [vmem:[%s7172_s18 + $0x38] sm:$0xff] %v4938_v27 }
 0xb1c   : > { %4947 = vst [vmem:[%s7172_s18 + $0x30] sm:$0xff] %v4933_v3 }
 0xb1d PF: > { %s19_s30 = sadd.s32 1, %s7102_s30  }
 0xb1e   : > { %p16_p5 = scmp.ge.s32.totalorder %s19_s30, 4  }
 0xb20   :  { %18 = sbr.rel (!%p16_p5) target bundleno = 1 (0x1), region = 104 }

</bundles_post_ra>
